<compile_context>
chip_gen: v7x
topology: tpu7x:2x2x1
jax: 0.10.0
libtpu: 0.0.40
codegen_flags: <defaults>
</compile_context>

<pallas_src>
import math

import jax
import jax.numpy as jnp
from jax import lax
from jax.experimental import pallas as pl
from jax.experimental.pallas import tpu as pltpu

LOG2 = math.log(2.0)


def _shifted_softplus(x):
    # numerically stable softplus(x) - log(2)  (== schnetpack ShiftedSoftplus)
    return jnp.maximum(x, 0.0) + jnp.log1p(jnp.exp(-jnp.abs(x))) - LOG2


def _round_up(v, m):
    return ((v + m - 1) // m) * m


def _pick_tiles():
    """256-wide tiles fill the v6e/v7x 2x256 MXU; 128 matches v5e's 4x128 MXU."""
    kind = ""
    try:
        kind = (getattr(jax.devices()[0], "device_kind", "") or "").lower()
    except Exception:
        pass
    if any(t in kind for t in ("v6", "v7", "trillium", "ironwood")):
        return 256, 256
    return 128, 128


def _make_kernel(tile_p, tile_m, num_m, gather_chunk=8):
    def kernel(idxj_sm,                  # scalar prefetch: (PP,) int32 in SMEM
               xf_ref,                   # (MP, FP)  resident precomputed x @ W_in + b_in
               f_ref,                    # (tile_p, RP) rbf tile
               rcut_ref,                 # (tile_p, 1)  cutoff tile
               idxi_ref,                 # (1, tile_p)  int32 scatter indices
               w_f_ref, b_f_ref,         # (RP, FP), (1, FP)  filter network
               w_out_ref, b_out_ref,     # (FP, A), (1, A)    output linear
               o_ref,                    # (MP, A)  whole output (written at p==last)
               gbuf,                     # VMEM (tile_p, FP) gathered xf[idx_j] rows
               agg):                     # VMEM (MP, FP)     full-MP accumulator
        p = pl.program_id(0)

        @pl.when(p == 0)
        def _():
            agg[...] = jnp.zeros_like(agg)

        # ---- gather xf[idx_j] rows for this pair tile (ONCE per pair tile).
        # 8 dynamic (1, FP) loads are batched into one (8, FP) full-sublane store.
        base = p * tile_p
        for g in range(tile_p // gather_chunk):
            rows = [xf_ref[pl.ds(idxj_sm[base + g * gather_chunk + r], 1), :]
                    for r in range(gather_chunk)]
            gbuf[g * gather_chunk:(g + 1) * gather_chunk, :] = jnp.concatenate(rows, axis=0)

        # ---- filter network (once per pair tile): Linear(RBF -> F) + ssp, * rcut
        wij = jnp.dot(f_ref[...], w_f_ref[...],
                      preferred_element_type=jnp.float32) + b_f_ref[...]
        wij = _shifted_softplus(wij) * rcut_ref[...]
        x_ij = gbuf[...] * wij                                   # (tile_p, FP)

        # ---- scatter-add into the resident accumulator via a pre-transposed one-hot
        idxi = idxi_ref[...]                                     # (1, tile_p)
        row_iota = lax.broadcasted_iota(jnp.int32, (tile_m, tile_p), 0)
        for mi in range(num_m):                                  # static unroll over atom tiles
            oh_t = (idxi == (row_iota + mi * tile_m)).astype(jnp.float32)  # (tile_m, tile_p)
            sl = slice(mi * tile_m, (mi + 1) * tile_m)
            agg[sl, :] = agg[sl, :] + jnp.dot(oh_t, x_ij,
                                              preferred_element_type=jnp.float32)

        # ---- finalize: feature_to_output linear + shifted softplus
        @pl.when(p == pl.num_programs(0) - 1)
        def _():
            for mi in range(num_m):
                sl = slice(mi * tile_m, (mi + 1) * tile_m)
                out = jnp.dot(agg[sl, :], w_out_ref[...],
                              preferred_element_type=jnp.float32) + b_out_ref[...]
                o_ref[sl, :] = _shifted_softplus(out).astype(o_ref.dtype)

    return kernel


def schnet_interaction_block(x, f_ij, idx_i, idx_j, rcut_ij, params,
                             *, tile_m=None, tile_p=None):
    """x: [B, N, A=128]; f_ij: [P, R]; idx_i/idx_j: [P]; rcut_ij: [P] -> [B, N, 128]."""
    B, N, A = x.shape
    assert A == 128, "module hard-codes the final reshape to (..., 128)"
    P, R = f_ij.shape
    F = params["w_in"].shape[1]
    M = B * N

    if tile_m is None or tile_p is None:
        tm_d, tp_d = _pick_tiles()
        tile_m = tile_m or tm_d
        tile_p = tile_p or tp_d
    assert tile_p % 128 == 0 and tile_m % 8 == 0

    MP = _round_up(max(M, 8), tile_m)      # padded atoms
    PP = _round_up(max(P, 8), tile_p)      # padded pairs
    FP = _round_up(F, 128)                 # lane-dense filter dim
    RP = _round_up(R, 32)                  # padded rbf contraction dim
    num_m = MP // tile_m
    num_p = PP // tile_p

    f32 = jnp.float32

    # ---- input linear precomputed in plain XLA (gather commutes with a row-wise linear)
    xf = (x.reshape(M, A).astype(f32) @ params["w_in"].astype(f32)
          + params["b_in"].reshape(1, F).astype(f32))
    xf_pad = jnp.zeros((MP, FP), f32).at[:M, :F].set(xf)

    # ---- pad pair-side inputs (zero padding is exact: padded pairs have rcut=0 -> x_ij=0)
    f_pad = jnp.zeros((PP, RP), f32).at[:P, :R].set(f_ij.astype(f32))
    rcut_pad = jnp.zeros((PP, 1), f32).at[:P, 0].set(rcut_ij.astype(f32))
    idxi_pad = jnp.zeros((1, PP), jnp.int32).at[0, :P].set(idx_i.astype(jnp.int32))
    idxj_pad = jnp.zeros((PP,), jnp.int32).at[:P].set(idx_j.astype(jnp.int32))

    # ---- pad params (F -> FP, R -> RP); zero padding exact since ssp(0) == 0
    w_f = jnp.zeros((RP, FP), f32).at[:R, :F].set(params["w_f"].astype(f32))
    b_f = jnp.zeros((1, FP), f32).at[:, :F].set(params["b_f"].reshape(1, F).astype(f32))
    w_out = jnp.zeros((FP, A), f32).at[:F, :].set(params["w_out"].astype(f32))
    b_out = params["b_out"].reshape(1, A).astype(f32)

    # grid-invariant operands: whole-array VMEM residency (single-buffered, no per-step DMA)
    resident = pl.BlockSpec(memory_space=pltpu.MemorySpace.VMEM)

    grid_spec = pltpu.PrefetchScalarGridSpec(
        num_scalar_prefetch=1,
        grid=(num_p,),
        in_specs=[
            resident,                                              # xf slab
            pl.BlockSpec((tile_p, RP), lambda p, idxj: (p, 0)),    # f_ij tile
            pl.BlockSpec((tile_p, 1), lambda p, idxj: (p, 0)),     # rcut tile
            pl.BlockSpec((1, tile_p), lambda p, idxj: (0, p)),     # idx_i tile
            resident,                                              # W_filter
            resident,                                              # b_filter
            resident,                                              # W_out
            resident,                                              # b_out
        ],
        out_specs=pl.BlockSpec((MP, A), lambda p, idxj: (0, 0)),
        scratch_shapes=[
            pltpu.VMEM((tile_p, FP), jnp.float32),   # gathered xf[idx_j] rows
            pltpu.VMEM((MP, FP), jnp.float32),       # full-MP accumulator
        ],
    )

    # ---- VMEM budget: resident slabs (single-buffered) + double-buffered pair tiles
    #      + output block + scratch + matmul temporaries.
    est = 4 * (MP * FP                                # xf slab
               + MP * FP                              # accumulator scratch
               + MP * A                               # output block
               + tile_p * FP                          # gather scratch
               + RP * FP + FP + FP * A + A            # resident weights/biases
               + 2 * (tile_p * RP + tile_p * 128 + 8 * 128)     # pipelined pair tiles
               + 2 * (tile_m * tile_p + tile_p * FP + tile_m * FP))  # temporaries
    vmem_limit = int(min(48 * 2**20, max(16 * 2**20, 2 * est)))

    flops = (2 * PP * RP * FP          # filter network matmul (once per pair)
             + 2 * MP * PP * FP        # one-hot scatter matmuls
             + 2 * MP * FP * A)        # output linear
    transcendentals = 2 * (PP * FP + MP * A)
    bytes_accessed = 4 * (MP * FP                     # xf slab read once
                          + PP * RP + 2 * PP + PP     # f_ij, rcut, idx_i, idx_j
                          + RP * FP + FP + FP * A + A # weights
                          + MP * A)                   # output

    out = pl.pallas_call(
        _make_kernel(tile_p, tile_m, num_m),
        grid_spec=grid_spec,
        out_shape=jax.ShapeDtypeStruct((MP, A), jnp.float32),
        compiler_params=pltpu.CompilerParams(
            dimension_semantics=("arbitrary",),
            vmem_limit_bytes=vmem_limit,
        ),
        cost_estimate=pl.CostEstimate(
            flops=int(flops),
            transcendentals=int(transcendentals),
            bytes_accessed=int(bytes_accessed),
        ),
    )(idxj_pad, xf_pad, f_pad, rcut_pad, idxi_pad, w_f, b_f, w_out, b_out)

    # drop atom padding; module hard-codes reshape to (..., 128)
    return out[:M].reshape(B, N, 128)


def reference(x, f_ij, idx_i, idx_j, rcut_ij, params):
    B, N, A = x.shape
    M = B * N
    xf = x.reshape(M, A) @ params["w_in"] + params["b_in"]
    wij = _shifted_softplus(f_ij @ params["w_f"] + params["b_f"])
    wij = wij * rcut_ij[:, None]
    x_ij = xf[idx_j] * wij
    agg = jax.ops.segment_sum(x_ij, idx_i, num_segments=M)
    out = _shifted_softplus(agg @ params["w_out"] + params["b_out"])
    return out.reshape(B, N, 128)


if __name__ == "__main__":
    # Module hyper-parameters (nr_atom_basis must be 128 due to hard-coded reshape).
    nr_atom_basis = 128   # A
    nr_filters = 64       # F
    nr_rbf = 20           # R (hard-coded to 20 in __init__)

    # Small but multi-tile sizes: M = 192 atoms, P = 320 pairs.
    B, N, P = 2, 96, 320
    M = B * N

    key = jax.random.PRNGKey(0)
    ks = jax.random.split(key, 12)

    params = {
        "w_in": 0.1 * jax.random.normal(ks[0], (nr_atom_basis, nr_filters), jnp.float32),
        "b_in": 0.1 * jax.random.normal(ks[1], (1, nr_filters), jnp.float32),
        "w_f": 0.1 * jax.random.normal(ks[2], (nr_rbf, nr_filters), jnp.float32),
        "b_f": 0.1 * jax.random.normal(ks[3], (1, nr_filters), jnp.float32),
        "w_out": 0.1 * jax.random.normal(ks[4], (nr_filters, nr_atom_basis), jnp.float32),
        "b_out": 0.1 * jax.random.normal(ks[5], (1, nr_atom_basis), jnp.float32),
    }

    x = jax.random.normal(ks[6], (B, N, nr_atom_basis), jnp.float32)
    f_ij = jax.random.normal(ks[7], (P, nr_rbf), jnp.float32)
    idx_i = jax.random.randint(ks[8], (P,), 0, M, jnp.int32)
    idx_j = jax.random.randint(ks[9], (P,), 0, M, jnp.int32)
    rcut_ij = jax.random.uniform(ks[10], (P,), jnp.float32)

    out = schnet_interaction_block(x, f_ij, idx_i, idx_j, rcut_ij, params)
    out = jax.block_until_ready(out)

    ref = reference(x, f_ij, idx_i, idx_j, rcut_ij, params)
    assert out.shape == (B, N, 128)
    assert jnp.allclose(out, ref, atol=1e-4, rtol=1e-4), "mismatch vs JAX reference"

    print("KERNEL_OK")
</pallas_src>

<mosaic_0001>
module attributes {stable_mosaic.version = 11 : i64} {
  func.func @kernel(%arg0: i32, %arg1: memref<384xi32, #tpu.memory_space<smem>>, %arg2: memref<256x128xf32, #tpu.memory_space<vmem>>, %arg3: memref<128x32xf32, #tpu.memory_space<vmem>>, %arg4: memref<128x1xf32, #tpu.memory_space<vmem>>, %arg5: memref<1x128xi32, #tpu.memory_space<vmem>>, %arg6: memref<32x128xf32, #tpu.memory_space<vmem>>, %arg7: memref<1x128xf32, #tpu.memory_space<vmem>>, %arg8: memref<128x128xf32, #tpu.memory_space<vmem>>, %arg9: memref<1x128xf32, #tpu.memory_space<vmem>>, %arg10: memref<256x128xf32, #tpu.memory_space<vmem>>, %arg11: memref<128x128xf32, #tpu.memory_space<vmem>>, %arg12: memref<256x128xf32, #tpu.memory_space<vmem>>) attributes {dimension_semantics = [#tpu.dimension_semantics<arbitrary>], iteration_bounds = array<i64: 3>, scalar_prefetch = 1 : i64, scratch_operands = 2 : i64, tpu.core_type = #tpu.core_type<tc>, window_params = [{pipeline_mode = #tpu.pipeline_mode<synchronous>, transform_indices = @transform_0, window_bounds = array<i64: 256, 128>}, {transform_indices = @transform_1, window_bounds = array<i64: 128, 32>}, {transform_indices = @transform_2, window_bounds = array<i64: 128, 1>}, {transform_indices = @transform_3, window_bounds = array<i64: 1, 128>}, {pipeline_mode = #tpu.pipeline_mode<synchronous>, transform_indices = @transform_4, window_bounds = array<i64: 32, 128>}, {pipeline_mode = #tpu.pipeline_mode<synchronous>, transform_indices = @transform_5, window_bounds = array<i64: 1, 128>}, {pipeline_mode = #tpu.pipeline_mode<synchronous>, transform_indices = @transform_6, window_bounds = array<i64: 128, 128>}, {pipeline_mode = #tpu.pipeline_mode<synchronous>, transform_indices = @transform_7, window_bounds = array<i64: 1, 128>}, {pipeline_mode = #tpu.pipeline_mode<synchronous>, transform_indices = @transform_8, window_bounds = array<i64: 256, 128>}]} {
    %c0_i32 = arith.constant 0 : i32
    %0 = arith.cmpi eq, %arg0, %c0_i32 : i32
    %1 = arith.extui %0 : i1 to i32
    %c0_i32_0 = arith.constant 0 : i32
    %2 = arith.cmpi ne, %1, %c0_i32_0 : i32
    scf.if %2 {
      %cst_407 = arith.constant 0.000000e+00 : f32
      %850 = vector.broadcast %cst_407 : f32 to vector<256x128xf32>
      %c0_408 = arith.constant 0 : index
      %c0_409 = arith.constant 0 : index
      %851 = vector.load %arg12[%c0_408, %c0_409] : memref<256x128xf32, #tpu.memory_space<vmem>>, vector<256x128xf32>
      tpu.vector_store %arg12[%c0_408, %c0_409], %850 {strides = array<i32>} : memref<256x128xf32, #tpu.memory_space<vmem>>, vector<256x128xf32>,
    } else {
    }
    %c128_i32 = arith.constant 128 : i32
    %3 = arith.muli %arg0, %c128_i32 : i32
    %c0_i32_1 = arith.constant 0 : i32
    %4 = arith.addi %3, %c0_i32_1 : i32
    %c0_i32_2 = arith.constant 0 : i32
    %5 = arith.addi %4, %c0_i32_2 : i32
    %6 = arith.index_cast %5 : i32 to index
    %7 = memref.load %arg1[%6] : memref<384xi32, #tpu.memory_space<smem>>
    %8 = arith.index_cast %7 : i32 to index
    %c0 = arith.constant 0 : index
    %9 = vector.load %arg2[%8, %c0] : memref<256x128xf32, #tpu.memory_space<vmem>>, vector<1x128xf32>
    %c0_i32_3 = arith.constant 0 : i32
    %10 = arith.addi %3, %c0_i32_3 : i32
    %c1_i32 = arith.constant 1 : i32
    %11 = arith.addi %10, %c1_i32 : i32
    %12 = arith.index_cast %11 : i32 to index
    %13 = memref.load %arg1[%12] : memref<384xi32, #tpu.memory_space<smem>>
    %14 = arith.index_cast %13 : i32 to index
    %c0_4 = arith.constant 0 : index
    %15 = vector.load %arg2[%14, %c0_4] : memref<256x128xf32, #tpu.memory_space<vmem>>, vector<1x128xf32>
    %c0_i32_5 = arith.constant 0 : i32
    %16 = arith.addi %3, %c0_i32_5 : i32
    %c2_i32 = arith.constant 2 : i32
    %17 = arith.addi %16, %c2_i32 : i32
    %18 = arith.index_cast %17 : i32 to index
    %19 = memref.load %arg1[%18] : memref<384xi32, #tpu.memory_space<smem>>
    %20 = arith.index_cast %19 : i32 to index
    %c0_6 = arith.constant 0 : index
    %21 = vector.load %arg2[%20, %c0_6] : memref<256x128xf32, #tpu.memory_space<vmem>>, vector<1x128xf32>
    %c0_i32_7 = arith.constant 0 : i32
    %22 = arith.addi %3, %c0_i32_7 : i32
    %c3_i32 = arith.constant 3 : i32
    %23 = arith.addi %22, %c3_i32 : i32
    %24 = arith.index_cast %23 : i32 to index
    %25 = memref.load %arg1[%24] : memref<384xi32, #tpu.memory_space<smem>>
    %26 = arith.index_cast %25 : i32 to index
    %c0_8 = arith.constant 0 : index
    %27 = vector.load %arg2[%26, %c0_8] : memref<256x128xf32, #tpu.memory_space<vmem>>, vector<1x128xf32>
    %c0_i32_9 = arith.constant 0 : i32
    %28 = arith.addi %3, %c0_i32_9 : i32
    %c4_i32 = arith.constant 4 : i32
    %29 = arith.addi %28, %c4_i32 : i32
    %30 = arith.index_cast %29 : i32 to index
    %31 = memref.load %arg1[%30] : memref<384xi32, #tpu.memory_space<smem>>
    %32 = arith.index_cast %31 : i32 to index
    %c0_10 = arith.constant 0 : index
    %33 = vector.load %arg2[%32, %c0_10] : memref<256x128xf32, #tpu.memory_space<vmem>>, vector<1x128xf32>
    %c0_i32_11 = arith.constant 0 : i32
    %34 = arith.addi %3, %c0_i32_11 : i32
    %c5_i32 = arith.constant 5 : i32
    %35 = arith.addi %34, %c5_i32 : i32
    %36 = arith.index_cast %35 : i32 to index
    %37 = memref.load %arg1[%36] : memref<384xi32, #tpu.memory_space<smem>>
    %38 = arith.index_cast %37 : i32 to index
    %c0_12 = arith.constant 0 : index
    %39 = vector.load %arg2[%38, %c0_12] : memref<256x128xf32, #tpu.memory_space<vmem>>, vector<1x128xf32>
    %c0_i32_13 = arith.constant 0 : i32
    %40 = arith.addi %3, %c0_i32_13 : i32
    %c6_i32 = arith.constant 6 : i32
    %41 = arith.addi %40, %c6_i32 : i32
    %42 = arith.index_cast %41 : i32 to index
    %43 = memref.load %arg1[%42] : memref<384xi32, #tpu.memory_space<smem>>
    %44 = arith.index_cast %43 : i32 to index
    %c0_14 = arith.constant 0 : index
    %45 = vector.load %arg2[%44, %c0_14] : memref<256x128xf32, #tpu.memory_space<vmem>>, vector<1x128xf32>
    %c0_i32_15 = arith.constant 0 : i32
    %46 = arith.addi %3, %c0_i32_15 : i32
    %c7_i32 = arith.constant 7 : i32
    %47 = arith.addi %46, %c7_i32 : i32
    %48 = arith.index_cast %47 : i32 to index
    %49 = memref.load %arg1[%48] : memref<384xi32, #tpu.memory_space<smem>>
    %50 = arith.index_cast %49 : i32 to index
    %c0_16 = arith.constant 0 : index
    %51 = vector.load %arg2[%50, %c0_16] : memref<256x128xf32, #tpu.memory_space<vmem>>, vector<1x128xf32>
    %52 = tpu.concatenate %9, %15, %21, %27, %33, %39, %45, %51 in 0 : vector<1x128xf32>, vector<1x128xf32>, vector<1x128xf32>, vector<1x128xf32>, vector<1x128xf32>, vector<1x128xf32>, vector<1x128xf32>, vector<1x128xf32> -> vector<8x128xf32>
    %c0_17 = arith.constant 0 : index
    %c0_18 = arith.constant 0 : index
    %53 = vector.load %arg11[%c0_17, %c0_18] : memref<128x128xf32, #tpu.memory_space<vmem>>, vector<8x128xf32>
    tpu.vector_store %arg11[%c0_17, %c0_18], %52 {strides = array<i32>} : memref<128x128xf32, #tpu.memory_space<vmem>>, vector<8x128xf32>,
    %c8_i32 = arith.constant 8 : i32
    %54 = arith.addi %3, %c8_i32 : i32
    %c0_i32_19 = arith.constant 0 : i32
    %55 = arith.addi %54, %c0_i32_19 : i32
    %56 = arith.index_cast %55 : i32 to index
    %57 = memref.load %arg1[%56] : memref<384xi32, #tpu.memory_space<smem>>
    %58 = arith.index_cast %57 : i32 to index
    %c0_20 = arith.constant 0 : index
    %59 = vector.load %arg2[%58, %c0_20] : memref<256x128xf32, #tpu.memory_space<vmem>>, vector<1x128xf32>
    %c8_i32_21 = arith.constant 8 : i32
    %60 = arith.addi %3, %c8_i32_21 : i32
    %c1_i32_22 = arith.constant 1 : i32
    %61 = arith.addi %60, %c1_i32_22 : i32
    %62 = arith.index_cast %61 : i32 to index
    %63 = memref.load %arg1[%62] : memref<384xi32, #tpu.memory_space<smem>>
    %64 = arith.index_cast %63 : i32 to index
    %c0_23 = arith.constant 0 : index
    %65 = vector.load %arg2[%64, %c0_23] : memref<256x128xf32, #tpu.memory_space<vmem>>, vector<1x128xf32>
    %c8_i32_24 = arith.constant 8 : i32
    %66 = arith.addi %3, %c8_i32_24 : i32
    %c2_i32_25 = arith.constant 2 : i32
    %67 = arith.addi %66, %c2_i32_25 : i32
    %68 = arith.index_cast %67 : i32 to index
    %69 = memref.load %arg1[%68] : memref<384xi32, #tpu.memory_space<smem>>
    %70 = arith.index_cast %69 : i32 to index
    %c0_26 = arith.constant 0 : index
    %71 = vector.load %arg2[%70, %c0_26] : memref<256x128xf32, #tpu.memory_space<vmem>>, vector<1x128xf32>
    %c8_i32_27 = arith.constant 8 : i32
    %72 = arith.addi %3, %c8_i32_27 : i32
    %c3_i32_28 = arith.constant 3 : i32
    %73 = arith.addi %72, %c3_i32_28 : i32
    %74 = arith.index_cast %73 : i32 to index
    %75 = memref.load %arg1[%74] : memref<384xi32, #tpu.memory_space<smem>>
    %76 = arith.index_cast %75 : i32 to index
    %c0_29 = arith.constant 0 : index
    %77 = vector.load %arg2[%76, %c0_29] : memref<256x128xf32, #tpu.memory_space<vmem>>, vector<1x128xf32>
    %c8_i32_30 = arith.constant 8 : i32
    %78 = arith.addi %3, %c8_i32_30 : i32
    %c4_i32_31 = arith.constant 4 : i32
    %79 = arith.addi %78, %c4_i32_31 : i32
    %80 = arith.index_cast %79 : i32 to index
    %81 = memref.load %arg1[%80] : memref<384xi32, #tpu.memory_space<smem>>
    %82 = arith.index_cast %81 : i32 to index
    %c0_32 = arith.constant 0 : index
    %83 = vector.load %arg2[%82, %c0_32] : memref<256x128xf32, #tpu.memory_space<vmem>>, vector<1x128xf32>
    %c8_i32_33 = arith.constant 8 : i32
    %84 = arith.addi %3, %c8_i32_33 : i32
    %c5_i32_34 = arith.constant 5 : i32
    %85 = arith.addi %84, %c5_i32_34 : i32
    %86 = arith.index_cast %85 : i32 to index
    %87 = memref.load %arg1[%86] : memref<384xi32, #tpu.memory_space<smem>>
    %88 = arith.index_cast %87 : i32 to index
    %c0_35 = arith.constant 0 : index
    %89 = vector.load %arg2[%88, %c0_35] : memref<256x128xf32, #tpu.memory_space<vmem>>, vector<1x128xf32>
    %c8_i32_36 = arith.constant 8 : i32
    %90 = arith.addi %3, %c8_i32_36 : i32
    %c6_i32_37 = arith.constant 6 : i32
    %91 = arith.addi %90, %c6_i32_37 : i32
    %92 = arith.index_cast %91 : i32 to index
    %93 = memref.load %arg1[%92] : memref<384xi32, #tpu.memory_space<smem>>
    %94 = arith.index_cast %93 : i32 to index
    %c0_38 = arith.constant 0 : index
    %95 = vector.load %arg2[%94, %c0_38] : memref<256x128xf32, #tpu.memory_space<vmem>>, vector<1x128xf32>
    %c8_i32_39 = arith.constant 8 : i32
    %96 = arith.addi %3, %c8_i32_39 : i32
    %c7_i32_40 = arith.constant 7 : i32
    %97 = arith.addi %96, %c7_i32_40 : i32
    %98 = arith.index_cast %97 : i32 to index
    %99 = memref.load %arg1[%98] : memref<384xi32, #tpu.memory_space<smem>>
    %100 = arith.index_cast %99 : i32 to index
    %c0_41 = arith.constant 0 : index
    %101 = vector.load %arg2[%100, %c0_41] : memref<256x128xf32, #tpu.memory_space<vmem>>, vector<1x128xf32>
    %102 = tpu.concatenate %59, %65, %71, %77, %83, %89, %95, %101 in 0 : vector<1x128xf32>, vector<1x128xf32>, vector<1x128xf32>, vector<1x128xf32>, vector<1x128xf32>, vector<1x128xf32>, vector<1x128xf32>, vector<1x128xf32> -> vector<8x128xf32>
    %c8 = arith.constant 8 : index
    %c0_42 = arith.constant 0 : index
    %103 = vector.load %arg11[%c8, %c0_42] : memref<128x128xf32, #tpu.memory_space<vmem>>, vector<8x128xf32>
    tpu.vector_store %arg11[%c8, %c0_42], %102 {strides = array<i32>} : memref<128x128xf32, #tpu.memory_space<vmem>>, vector<8x128xf32>,
    %c16_i32 = arith.constant 16 : i32
    %104 = arith.addi %3, %c16_i32 : i32
    %c0_i32_43 = arith.constant 0 : i32
    %105 = arith.addi %104, %c0_i32_43 : i32
    %106 = arith.index_cast %105 : i32 to index
    %107 = memref.load %arg1[%106] : memref<384xi32, #tpu.memory_space<smem>>
    %108 = arith.index_cast %107 : i32 to index
    %c0_44 = arith.constant 0 : index
    %109 = vector.load %arg2[%108, %c0_44] : memref<256x128xf32, #tpu.memory_space<vmem>>, vector<1x128xf32>
    %c16_i32_45 = arith.constant 16 : i32
    %110 = arith.addi %3, %c16_i32_45 : i32
    %c1_i32_46 = arith.constant 1 : i32
    %111 = arith.addi %110, %c1_i32_46 : i32
    %112 = arith.index_cast %111 : i32 to index
    %113 = memref.load %arg1[%112] : memref<384xi32, #tpu.memory_space<smem>>
    %114 = arith.index_cast %113 : i32 to index
    %c0_47 = arith.constant 0 : index
    %115 = vector.load %arg2[%114, %c0_47] : memref<256x128xf32, #tpu.memory_space<vmem>>, vector<1x128xf32>
    %c16_i32_48 = arith.constant 16 : i32
    %116 = arith.addi %3, %c16_i32_48 : i32
    %c2_i32_49 = arith.constant 2 : i32
    %117 = arith.addi %116, %c2_i32_49 : i32
    %118 = arith.index_cast %117 : i32 to index
    %119 = memref.load %arg1[%118] : memref<384xi32, #tpu.memory_space<smem>>
    %120 = arith.index_cast %119 : i32 to index
    %c0_50 = arith.constant 0 : index
    %121 = vector.load %arg2[%120, %c0_50] : memref<256x128xf32, #tpu.memory_space<vmem>>, vector<1x128xf32>
    %c16_i32_51 = arith.constant 16 : i32
    %122 = arith.addi %3, %c16_i32_51 : i32
    %c3_i32_52 = arith.constant 3 : i32
    %123 = arith.addi %122, %c3_i32_52 : i32
    %124 = arith.index_cast %123 : i32 to index
    %125 = memref.load %arg1[%124] : memref<384xi32, #tpu.memory_space<smem>>
    %126 = arith.index_cast %125 : i32 to index
    %c0_53 = arith.constant 0 : index
    %127 = vector.load %arg2[%126, %c0_53] : memref<256x128xf32, #tpu.memory_space<vmem>>, vector<1x128xf32>
    %c16_i32_54 = arith.constant 16 : i32
    %128 = arith.addi %3, %c16_i32_54 : i32
    %c4_i32_55 = arith.constant 4 : i32
    %129 = arith.addi %128, %c4_i32_55 : i32
    %130 = arith.index_cast %129 : i32 to index
    %131 = memref.load %arg1[%130] : memref<384xi32, #tpu.memory_space<smem>>
    %132 = arith.index_cast %131 : i32 to index
    %c0_56 = arith.constant 0 : index
    %133 = vector.load %arg2[%132, %c0_56] : memref<256x128xf32, #tpu.memory_space<vmem>>, vector<1x128xf32>
    %c16_i32_57 = arith.constant 16 : i32
    %134 = arith.addi %3, %c16_i32_57 : i32
    %c5_i32_58 = arith.constant 5 : i32
    %135 = arith.addi %134, %c5_i32_58 : i32
    %136 = arith.index_cast %135 : i32 to index
    %137 = memref.load %arg1[%136] : memref<384xi32, #tpu.memory_space<smem>>
    %138 = arith.index_cast %137 : i32 to index
    %c0_59 = arith.constant 0 : index
    %139 = vector.load %arg2[%138, %c0_59] : memref<256x128xf32, #tpu.memory_space<vmem>>, vector<1x128xf32>
    %c16_i32_60 = arith.constant 16 : i32
    %140 = arith.addi %3, %c16_i32_60 : i32
    %c6_i32_61 = arith.constant 6 : i32
    %141 = arith.addi %140, %c6_i32_61 : i32
    %142 = arith.index_cast %141 : i32 to index
    %143 = memref.load %arg1[%142] : memref<384xi32, #tpu.memory_space<smem>>
    %144 = arith.index_cast %143 : i32 to index
    %c0_62 = arith.constant 0 : index
    %145 = vector.load %arg2[%144, %c0_62] : memref<256x128xf32, #tpu.memory_space<vmem>>, vector<1x128xf32>
    %c16_i32_63 = arith.constant 16 : i32
    %146 = arith.addi %3, %c16_i32_63 : i32
    %c7_i32_64 = arith.constant 7 : i32
    %147 = arith.addi %146, %c7_i32_64 : i32
    %148 = arith.index_cast %147 : i32 to index
    %149 = memref.load %arg1[%148] : memref<384xi32, #tpu.memory_space<smem>>
    %150 = arith.index_cast %149 : i32 to index
    %c0_65 = arith.constant 0 : index
    %151 = vector.load %arg2[%150, %c0_65] : memref<256x128xf32, #tpu.memory_space<vmem>>, vector<1x128xf32>
    %152 = tpu.concatenate %109, %115, %121, %127, %133, %139, %145, %151 in 0 : vector<1x128xf32>, vector<1x128xf32>, vector<1x128xf32>, vector<1x128xf32>, vector<1x128xf32>, vector<1x128xf32>, vector<1x128xf32>, vector<1x128xf32> -> vector<8x128xf32>
    %c16 = arith.constant 16 : index
    %c0_66 = arith.constant 0 : index
    %153 = vector.load %arg11[%c16, %c0_66] : memref<128x128xf32, #tpu.memory_space<vmem>>, vector<8x128xf32>
    tpu.vector_store %arg11[%c16, %c0_66], %152 {strides = array<i32>} : memref<128x128xf32, #tpu.memory_space<vmem>>, vector<8x128xf32>,
    %c24_i32 = arith.constant 24 : i32
    %154 = arith.addi %3, %c24_i32 : i32
    %c0_i32_67 = arith.constant 0 : i32
    %155 = arith.addi %154, %c0_i32_67 : i32
    %156 = arith.index_cast %155 : i32 to index
    %157 = memref.load %arg1[%156] : memref<384xi32, #tpu.memory_space<smem>>
    %158 = arith.index_cast %157 : i32 to index
    %c0_68 = arith.constant 0 : index
    %159 = vector.load %arg2[%158, %c0_68] : memref<256x128xf32, #tpu.memory_space<vmem>>, vector<1x128xf32>
    %c24_i32_69 = arith.constant 24 : i32
    %160 = arith.addi %3, %c24_i32_69 : i32
    %c1_i32_70 = arith.constant 1 : i32
    %161 = arith.addi %160, %c1_i32_70 : i32
    %162 = arith.index_cast %161 : i32 to index
    %163 = memref.load %arg1[%162] : memref<384xi32, #tpu.memory_space<smem>>
    %164 = arith.index_cast %163 : i32 to index
    %c0_71 = arith.constant 0 : index
    %165 = vector.load %arg2[%164, %c0_71] : memref<256x128xf32, #tpu.memory_space<vmem>>, vector<1x128xf32>
    %c24_i32_72 = arith.constant 24 : i32
    %166 = arith.addi %3, %c24_i32_72 : i32
    %c2_i32_73 = arith.constant 2 : i32
    %167 = arith.addi %166, %c2_i32_73 : i32
    %168 = arith.index_cast %167 : i32 to index
    %169 = memref.load %arg1[%168] : memref<384xi32, #tpu.memory_space<smem>>
    %170 = arith.index_cast %169 : i32 to index
    %c0_74 = arith.constant 0 : index
    %171 = vector.load %arg2[%170, %c0_74] : memref<256x128xf32, #tpu.memory_space<vmem>>, vector<1x128xf32>
    %c24_i32_75 = arith.constant 24 : i32
    %172 = arith.addi %3, %c24_i32_75 : i32
    %c3_i32_76 = arith.constant 3 : i32
    %173 = arith.addi %172, %c3_i32_76 : i32
    %174 = arith.index_cast %173 : i32 to index
    %175 = memref.load %arg1[%174] : memref<384xi32, #tpu.memory_space<smem>>
    %176 = arith.index_cast %175 : i32 to index
    %c0_77 = arith.constant 0 : index
    %177 = vector.load %arg2[%176, %c0_77] : memref<256x128xf32, #tpu.memory_space<vmem>>, vector<1x128xf32>
    %c24_i32_78 = arith.constant 24 : i32
    %178 = arith.addi %3, %c24_i32_78 : i32
    %c4_i32_79 = arith.constant 4 : i32
    %179 = arith.addi %178, %c4_i32_79 : i32
    %180 = arith.index_cast %179 : i32 to index
    %181 = memref.load %arg1[%180] : memref<384xi32, #tpu.memory_space<smem>>
    %182 = arith.index_cast %181 : i32 to index
    %c0_80 = arith.constant 0 : index
    %183 = vector.load %arg2[%182, %c0_80] : memref<256x128xf32, #tpu.memory_space<vmem>>, vector<1x128xf32>
    %c24_i32_81 = arith.constant 24 : i32
    %184 = arith.addi %3, %c24_i32_81 : i32
    %c5_i32_82 = arith.constant 5 : i32
    %185 = arith.addi %184, %c5_i32_82 : i32
    %186 = arith.index_cast %185 : i32 to index
    %187 = memref.load %arg1[%186] : memref<384xi32, #tpu.memory_space<smem>>
    %188 = arith.index_cast %187 : i32 to index
    %c0_83 = arith.constant 0 : index
    %189 = vector.load %arg2[%188, %c0_83] : memref<256x128xf32, #tpu.memory_space<vmem>>, vector<1x128xf32>
    %c24_i32_84 = arith.constant 24 : i32
    %190 = arith.addi %3, %c24_i32_84 : i32
    %c6_i32_85 = arith.constant 6 : i32
    %191 = arith.addi %190, %c6_i32_85 : i32
    %192 = arith.index_cast %191 : i32 to index
    %193 = memref.load %arg1[%192] : memref<384xi32, #tpu.memory_space<smem>>
    %194 = arith.index_cast %193 : i32 to index
    %c0_86 = arith.constant 0 : index
    %195 = vector.load %arg2[%194, %c0_86] : memref<256x128xf32, #tpu.memory_space<vmem>>, vector<1x128xf32>
    %c24_i32_87 = arith.constant 24 : i32
    %196 = arith.addi %3, %c24_i32_87 : i32
    %c7_i32_88 = arith.constant 7 : i32
    %197 = arith.addi %196, %c7_i32_88 : i32
    %198 = arith.index_cast %197 : i32 to index
    %199 = memref.load %arg1[%198] : memref<384xi32, #tpu.memory_space<smem>>
    %200 = arith.index_cast %199 : i32 to index
    %c0_89 = arith.constant 0 : index
    %201 = vector.load %arg2[%200, %c0_89] : memref<256x128xf32, #tpu.memory_space<vmem>>, vector<1x128xf32>
    %202 = tpu.concatenate %159, %165, %171, %177, %183, %189, %195, %201 in 0 : vector<1x128xf32>, vector<1x128xf32>, vector<1x128xf32>, vector<1x128xf32>, vector<1x128xf32>, vector<1x128xf32>, vector<1x128xf32>, vector<1x128xf32> -> vector<8x128xf32>
    %c24 = arith.constant 24 : index
    %c0_90 = arith.constant 0 : index
    %203 = vector.load %arg11[%c24, %c0_90] : memref<128x128xf32, #tpu.memory_space<vmem>>, vector<8x128xf32>
    tpu.vector_store %arg11[%c24, %c0_90], %202 {strides = array<i32>} : memref<128x128xf32, #tpu.memory_space<vmem>>, vector<8x128xf32>,
    %c32_i32 = arith.constant 32 : i32
    %204 = arith.addi %3, %c32_i32 : i32
    %c0_i32_91 = arith.constant 0 : i32
    %205 = arith.addi %204, %c0_i32_91 : i32
    %206 = arith.index_cast %205 : i32 to index
    %207 = memref.load %arg1[%206] : memref<384xi32, #tpu.memory_space<smem>>
    %208 = arith.index_cast %207 : i32 to index
    %c0_92 = arith.constant 0 : index
    %209 = vector.load %arg2[%208, %c0_92] : memref<256x128xf32, #tpu.memory_space<vmem>>, vector<1x128xf32>
    %c32_i32_93 = arith.constant 32 : i32
    %210 = arith.addi %3, %c32_i32_93 : i32
    %c1_i32_94 = arith.constant 1 : i32
    %211 = arith.addi %210, %c1_i32_94 : i32
    %212 = arith.index_cast %211 : i32 to index
    %213 = memref.load %arg1[%212] : memref<384xi32, #tpu.memory_space<smem>>
    %214 = arith.index_cast %213 : i32 to index
    %c0_95 = arith.constant 0 : index
    %215 = vector.load %arg2[%214, %c0_95] : memref<256x128xf32, #tpu.memory_space<vmem>>, vector<1x128xf32>
    %c32_i32_96 = arith.constant 32 : i32
    %216 = arith.addi %3, %c32_i32_96 : i32
    %c2_i32_97 = arith.constant 2 : i32
    %217 = arith.addi %216, %c2_i32_97 : i32
    %218 = arith.index_cast %217 : i32 to index
    %219 = memref.load %arg1[%218] : memref<384xi32, #tpu.memory_space<smem>>
    %220 = arith.index_cast %219 : i32 to index
    %c0_98 = arith.constant 0 : index
    %221 = vector.load %arg2[%220, %c0_98] : memref<256x128xf32, #tpu.memory_space<vmem>>, vector<1x128xf32>
    %c32_i32_99 = arith.constant 32 : i32
    %222 = arith.addi %3, %c32_i32_99 : i32
    %c3_i32_100 = arith.constant 3 : i32
    %223 = arith.addi %222, %c3_i32_100 : i32
    %224 = arith.index_cast %223 : i32 to index
    %225 = memref.load %arg1[%224] : memref<384xi32, #tpu.memory_space<smem>>
    %226 = arith.index_cast %225 : i32 to index
    %c0_101 = arith.constant 0 : index
    %227 = vector.load %arg2[%226, %c0_101] : memref<256x128xf32, #tpu.memory_space<vmem>>, vector<1x128xf32>
    %c32_i32_102 = arith.constant 32 : i32
    %228 = arith.addi %3, %c32_i32_102 : i32
    %c4_i32_103 = arith.constant 4 : i32
    %229 = arith.addi %228, %c4_i32_103 : i32
    %230 = arith.index_cast %229 : i32 to index
    %231 = memref.load %arg1[%230] : memref<384xi32, #tpu.memory_space<smem>>
    %232 = arith.index_cast %231 : i32 to index
    %c0_104 = arith.constant 0 : index
    %233 = vector.load %arg2[%232, %c0_104] : memref<256x128xf32, #tpu.memory_space<vmem>>, vector<1x128xf32>
    %c32_i32_105 = arith.constant 32 : i32
    %234 = arith.addi %3, %c32_i32_105 : i32
    %c5_i32_106 = arith.constant 5 : i32
    %235 = arith.addi %234, %c5_i32_106 : i32
    %236 = arith.index_cast %235 : i32 to index
    %237 = memref.load %arg1[%236] : memref<384xi32, #tpu.memory_space<smem>>
    %238 = arith.index_cast %237 : i32 to index
    %c0_107 = arith.constant 0 : index
    %239 = vector.load %arg2[%238, %c0_107] : memref<256x128xf32, #tpu.memory_space<vmem>>, vector<1x128xf32>
    %c32_i32_108 = arith.constant 32 : i32
    %240 = arith.addi %3, %c32_i32_108 : i32
    %c6_i32_109 = arith.constant 6 : i32
    %241 = arith.addi %240, %c6_i32_109 : i32
    %242 = arith.index_cast %241 : i32 to index
    %243 = memref.load %arg1[%242] : memref<384xi32, #tpu.memory_space<smem>>
    %244 = arith.index_cast %243 : i32 to index
    %c0_110 = arith.constant 0 : index
    %245 = vector.load %arg2[%244, %c0_110] : memref<256x128xf32, #tpu.memory_space<vmem>>, vector<1x128xf32>
    %c32_i32_111 = arith.constant 32 : i32
    %246 = arith.addi %3, %c32_i32_111 : i32
    %c7_i32_112 = arith.constant 7 : i32
    %247 = arith.addi %246, %c7_i32_112 : i32
    %248 = arith.index_cast %247 : i32 to index
    %249 = memref.load %arg1[%248] : memref<384xi32, #tpu.memory_space<smem>>
    %250 = arith.index_cast %249 : i32 to index
    %c0_113 = arith.constant 0 : index
    %251 = vector.load %arg2[%250, %c0_113] : memref<256x128xf32, #tpu.memory_space<vmem>>, vector<1x128xf32>
    %252 = tpu.concatenate %209, %215, %221, %227, %233, %239, %245, %251 in 0 : vector<1x128xf32>, vector<1x128xf32>, vector<1x128xf32>, vector<1x128xf32>, vector<1x128xf32>, vector<1x128xf32>, vector<1x128xf32>, vector<1x128xf32> -> vector<8x128xf32>
    %c32 = arith.constant 32 : index
    %c0_114 = arith.constant 0 : index
    %253 = vector.load %arg11[%c32, %c0_114] : memref<128x128xf32, #tpu.memory_space<vmem>>, vector<8x128xf32>
    tpu.vector_store %arg11[%c32, %c0_114], %252 {strides = array<i32>} : memref<128x128xf32, #tpu.memory_space<vmem>>, vector<8x128xf32>,
    %c40_i32 = arith.constant 40 : i32
    %254 = arith.addi %3, %c40_i32 : i32
    %c0_i32_115 = arith.constant 0 : i32
    %255 = arith.addi %254, %c0_i32_115 : i32
    %256 = arith.index_cast %255 : i32 to index
    %257 = memref.load %arg1[%256] : memref<384xi32, #tpu.memory_space<smem>>
    %258 = arith.index_cast %257 : i32 to index
    %c0_116 = arith.constant 0 : index
    %259 = vector.load %arg2[%258, %c0_116] : memref<256x128xf32, #tpu.memory_space<vmem>>, vector<1x128xf32>
    %c40_i32_117 = arith.constant 40 : i32
    %260 = arith.addi %3, %c40_i32_117 : i32
    %c1_i32_118 = arith.constant 1 : i32
    %261 = arith.addi %260, %c1_i32_118 : i32
    %262 = arith.index_cast %261 : i32 to index
    %263 = memref.load %arg1[%262] : memref<384xi32, #tpu.memory_space<smem>>
    %264 = arith.index_cast %263 : i32 to index
    %c0_119 = arith.constant 0 : index
    %265 = vector.load %arg2[%264, %c0_119] : memref<256x128xf32, #tpu.memory_space<vmem>>, vector<1x128xf32>
    %c40_i32_120 = arith.constant 40 : i32
    %266 = arith.addi %3, %c40_i32_120 : i32
    %c2_i32_121 = arith.constant 2 : i32
    %267 = arith.addi %266, %c2_i32_121 : i32
    %268 = arith.index_cast %267 : i32 to index
    %269 = memref.load %arg1[%268] : memref<384xi32, #tpu.memory_space<smem>>
    %270 = arith.index_cast %269 : i32 to index
    %c0_122 = arith.constant 0 : index
    %271 = vector.load %arg2[%270, %c0_122] : memref<256x128xf32, #tpu.memory_space<vmem>>, vector<1x128xf32>
    %c40_i32_123 = arith.constant 40 : i32
    %272 = arith.addi %3, %c40_i32_123 : i32
    %c3_i32_124 = arith.constant 3 : i32
    %273 = arith.addi %272, %c3_i32_124 : i32
    %274 = arith.index_cast %273 : i32 to index
    %275 = memref.load %arg1[%274] : memref<384xi32, #tpu.memory_space<smem>>
    %276 = arith.index_cast %275 : i32 to index
    %c0_125 = arith.constant 0 : index
    %277 = vector.load %arg2[%276, %c0_125] : memref<256x128xf32, #tpu.memory_space<vmem>>, vector<1x128xf32>
    %c40_i32_126 = arith.constant 40 : i32
    %278 = arith.addi %3, %c40_i32_126 : i32
    %c4_i32_127 = arith.constant 4 : i32
    %279 = arith.addi %278, %c4_i32_127 : i32
    %280 = arith.index_cast %279 : i32 to index
    %281 = memref.load %arg1[%280] : memref<384xi32, #tpu.memory_space<smem>>
    %282 = arith.index_cast %281 : i32 to index
    %c0_128 = arith.constant 0 : index
    %283 = vector.load %arg2[%282, %c0_128] : memref<256x128xf32, #tpu.memory_space<vmem>>, vector<1x128xf32>
    %c40_i32_129 = arith.constant 40 : i32
    %284 = arith.addi %3, %c40_i32_129 : i32
    %c5_i32_130 = arith.constant 5 : i32
    %285 = arith.addi %284, %c5_i32_130 : i32
    %286 = arith.index_cast %285 : i32 to index
    %287 = memref.load %arg1[%286] : memref<384xi32, #tpu.memory_space<smem>>
    %288 = arith.index_cast %287 : i32 to index
    %c0_131 = arith.constant 0 : index
    %289 = vector.load %arg2[%288, %c0_131] : memref<256x128xf32, #tpu.memory_space<vmem>>, vector<1x128xf32>
    %c40_i32_132 = arith.constant 40 : i32
    %290 = arith.addi %3, %c40_i32_132 : i32
    %c6_i32_133 = arith.constant 6 : i32
    %291 = arith.addi %290, %c6_i32_133 : i32
    %292 = arith.index_cast %291 : i32 to index
    %293 = memref.load %arg1[%292] : memref<384xi32, #tpu.memory_space<smem>>
    %294 = arith.index_cast %293 : i32 to index
    %c0_134 = arith.constant 0 : index
    %295 = vector.load %arg2[%294, %c0_134] : memref<256x128xf32, #tpu.memory_space<vmem>>, vector<1x128xf32>
    %c40_i32_135 = arith.constant 40 : i32
    %296 = arith.addi %3, %c40_i32_135 : i32
    %c7_i32_136 = arith.constant 7 : i32
    %297 = arith.addi %296, %c7_i32_136 : i32
    %298 = arith.index_cast %297 : i32 to index
    %299 = memref.load %arg1[%298] : memref<384xi32, #tpu.memory_space<smem>>
    %300 = arith.index_cast %299 : i32 to index
    %c0_137 = arith.constant 0 : index
    %301 = vector.load %arg2[%300, %c0_137] : memref<256x128xf32, #tpu.memory_space<vmem>>, vector<1x128xf32>
    %302 = tpu.concatenate %259, %265, %271, %277, %283, %289, %295, %301 in 0 : vector<1x128xf32>, vector<1x128xf32>, vector<1x128xf32>, vector<1x128xf32>, vector<1x128xf32>, vector<1x128xf32>, vector<1x128xf32>, vector<1x128xf32> -> vector<8x128xf32>
    %c40 = arith.constant 40 : index
    %c0_138 = arith.constant 0 : index
    %303 = vector.load %arg11[%c40, %c0_138] : memref<128x128xf32, #tpu.memory_space<vmem>>, vector<8x128xf32>
    tpu.vector_store %arg11[%c40, %c0_138], %302 {strides = array<i32>} : memref<128x128xf32, #tpu.memory_space<vmem>>, vector<8x128xf32>,
    %c48_i32 = arith.constant 48 : i32
    %304 = arith.addi %3, %c48_i32 : i32
    %c0_i32_139 = arith.constant 0 : i32
    %305 = arith.addi %304, %c0_i32_139 : i32
    %306 = arith.index_cast %305 : i32 to index
    %307 = memref.load %arg1[%306] : memref<384xi32, #tpu.memory_space<smem>>
    %308 = arith.index_cast %307 : i32 to index
    %c0_140 = arith.constant 0 : index
    %309 = vector.load %arg2[%308, %c0_140] : memref<256x128xf32, #tpu.memory_space<vmem>>, vector<1x128xf32>
    %c48_i32_141 = arith.constant 48 : i32
    %310 = arith.addi %3, %c48_i32_141 : i32
    %c1_i32_142 = arith.constant 1 : i32
    %311 = arith.addi %310, %c1_i32_142 : i32
    %312 = arith.index_cast %311 : i32 to index
    %313 = memref.load %arg1[%312] : memref<384xi32, #tpu.memory_space<smem>>
    %314 = arith.index_cast %313 : i32 to index
    %c0_143 = arith.constant 0 : index
    %315 = vector.load %arg2[%314, %c0_143] : memref<256x128xf32, #tpu.memory_space<vmem>>, vector<1x128xf32>
    %c48_i32_144 = arith.constant 48 : i32
    %316 = arith.addi %3, %c48_i32_144 : i32
    %c2_i32_145 = arith.constant 2 : i32
    %317 = arith.addi %316, %c2_i32_145 : i32
    %318 = arith.index_cast %317 : i32 to index
    %319 = memref.load %arg1[%318] : memref<384xi32, #tpu.memory_space<smem>>
    %320 = arith.index_cast %319 : i32 to index
    %c0_146 = arith.constant 0 : index
    %321 = vector.load %arg2[%320, %c0_146] : memref<256x128xf32, #tpu.memory_space<vmem>>, vector<1x128xf32>
    %c48_i32_147 = arith.constant 48 : i32
    %322 = arith.addi %3, %c48_i32_147 : i32
    %c3_i32_148 = arith.constant 3 : i32
    %323 = arith.addi %322, %c3_i32_148 : i32
    %324 = arith.index_cast %323 : i32 to index
    %325 = memref.load %arg1[%324] : memref<384xi32, #tpu.memory_space<smem>>
    %326 = arith.index_cast %325 : i32 to index
    %c0_149 = arith.constant 0 : index
    %327 = vector.load %arg2[%326, %c0_149] : memref<256x128xf32, #tpu.memory_space<vmem>>, vector<1x128xf32>
    %c48_i32_150 = arith.constant 48 : i32
    %328 = arith.addi %3, %c48_i32_150 : i32
    %c4_i32_151 = arith.constant 4 : i32
    %329 = arith.addi %328, %c4_i32_151 : i32
    %330 = arith.index_cast %329 : i32 to index
    %331 = memref.load %arg1[%330] : memref<384xi32, #tpu.memory_space<smem>>
    %332 = arith.index_cast %331 : i32 to index
    %c0_152 = arith.constant 0 : index
    %333 = vector.load %arg2[%332, %c0_152] : memref<256x128xf32, #tpu.memory_space<vmem>>, vector<1x128xf32>
    %c48_i32_153 = arith.constant 48 : i32
    %334 = arith.addi %3, %c48_i32_153 : i32
    %c5_i32_154 = arith.constant 5 : i32
    %335 = arith.addi %334, %c5_i32_154 : i32
    %336 = arith.index_cast %335 : i32 to index
    %337 = memref.load %arg1[%336] : memref<384xi32, #tpu.memory_space<smem>>
    %338 = arith.index_cast %337 : i32 to index
    %c0_155 = arith.constant 0 : index
    %339 = vector.load %arg2[%338, %c0_155] : memref<256x128xf32, #tpu.memory_space<vmem>>, vector<1x128xf32>
    %c48_i32_156 = arith.constant 48 : i32
    %340 = arith.addi %3, %c48_i32_156 : i32
    %c6_i32_157 = arith.constant 6 : i32
    %341 = arith.addi %340, %c6_i32_157 : i32
    %342 = arith.index_cast %341 : i32 to index
    %343 = memref.load %arg1[%342] : memref<384xi32, #tpu.memory_space<smem>>
    %344 = arith.index_cast %343 : i32 to index
    %c0_158 = arith.constant 0 : index
    %345 = vector.load %arg2[%344, %c0_158] : memref<256x128xf32, #tpu.memory_space<vmem>>, vector<1x128xf32>
    %c48_i32_159 = arith.constant 48 : i32
    %346 = arith.addi %3, %c48_i32_159 : i32
    %c7_i32_160 = arith.constant 7 : i32
    %347 = arith.addi %346, %c7_i32_160 : i32
    %348 = arith.index_cast %347 : i32 to index
    %349 = memref.load %arg1[%348] : memref<384xi32, #tpu.memory_space<smem>>
    %350 = arith.index_cast %349 : i32 to index
    %c0_161 = arith.constant 0 : index
    %351 = vector.load %arg2[%350, %c0_161] : memref<256x128xf32, #tpu.memory_space<vmem>>, vector<1x128xf32>
    %352 = tpu.concatenate %309, %315, %321, %327, %333, %339, %345, %351 in 0 : vector<1x128xf32>, vector<1x128xf32>, vector<1x128xf32>, vector<1x128xf32>, vector<1x128xf32>, vector<1x128xf32>, vector<1x128xf32>, vector<1x128xf32> -> vector<8x128xf32>
    %c48 = arith.constant 48 : index
    %c0_162 = arith.constant 0 : index
    %353 = vector.load %arg11[%c48, %c0_162] : memref<128x128xf32, #tpu.memory_space<vmem>>, vector<8x128xf32>
    tpu.vector_store %arg11[%c48, %c0_162], %352 {strides = array<i32>} : memref<128x128xf32, #tpu.memory_space<vmem>>, vector<8x128xf32>,
    %c56_i32 = arith.constant 56 : i32
    %354 = arith.addi %3, %c56_i32 : i32
    %c0_i32_163 = arith.constant 0 : i32
    %355 = arith.addi %354, %c0_i32_163 : i32
    %356 = arith.index_cast %355 : i32 to index
    %357 = memref.load %arg1[%356] : memref<384xi32, #tpu.memory_space<smem>>
    %358 = arith.index_cast %357 : i32 to index
    %c0_164 = arith.constant 0 : index
    %359 = vector.load %arg2[%358, %c0_164] : memref<256x128xf32, #tpu.memory_space<vmem>>, vector<1x128xf32>
    %c56_i32_165 = arith.constant 56 : i32
    %360 = arith.addi %3, %c56_i32_165 : i32
    %c1_i32_166 = arith.constant 1 : i32
    %361 = arith.addi %360, %c1_i32_166 : i32
    %362 = arith.index_cast %361 : i32 to index
    %363 = memref.load %arg1[%362] : memref<384xi32, #tpu.memory_space<smem>>
    %364 = arith.index_cast %363 : i32 to index
    %c0_167 = arith.constant 0 : index
    %365 = vector.load %arg2[%364, %c0_167] : memref<256x128xf32, #tpu.memory_space<vmem>>, vector<1x128xf32>
    %c56_i32_168 = arith.constant 56 : i32
    %366 = arith.addi %3, %c56_i32_168 : i32
    %c2_i32_169 = arith.constant 2 : i32
    %367 = arith.addi %366, %c2_i32_169 : i32
    %368 = arith.index_cast %367 : i32 to index
    %369 = memref.load %arg1[%368] : memref<384xi32, #tpu.memory_space<smem>>
    %370 = arith.index_cast %369 : i32 to index
    %c0_170 = arith.constant 0 : index
    %371 = vector.load %arg2[%370, %c0_170] : memref<256x128xf32, #tpu.memory_space<vmem>>, vector<1x128xf32>
    %c56_i32_171 = arith.constant 56 : i32
    %372 = arith.addi %3, %c56_i32_171 : i32
    %c3_i32_172 = arith.constant 3 : i32
    %373 = arith.addi %372, %c3_i32_172 : i32
    %374 = arith.index_cast %373 : i32 to index
    %375 = memref.load %arg1[%374] : memref<384xi32, #tpu.memory_space<smem>>
    %376 = arith.index_cast %375 : i32 to index
    %c0_173 = arith.constant 0 : index
    %377 = vector.load %arg2[%376, %c0_173] : memref<256x128xf32, #tpu.memory_space<vmem>>, vector<1x128xf32>
    %c56_i32_174 = arith.constant 56 : i32
    %378 = arith.addi %3, %c56_i32_174 : i32
    %c4_i32_175 = arith.constant 4 : i32
    %379 = arith.addi %378, %c4_i32_175 : i32
    %380 = arith.index_cast %379 : i32 to index
    %381 = memref.load %arg1[%380] : memref<384xi32, #tpu.memory_space<smem>>
    %382 = arith.index_cast %381 : i32 to index
    %c0_176 = arith.constant 0 : index
    %383 = vector.load %arg2[%382, %c0_176] : memref<256x128xf32, #tpu.memory_space<vmem>>, vector<1x128xf32>
    %c56_i32_177 = arith.constant 56 : i32
    %384 = arith.addi %3, %c56_i32_177 : i32
    %c5_i32_178 = arith.constant 5 : i32
    %385 = arith.addi %384, %c5_i32_178 : i32
    %386 = arith.index_cast %385 : i32 to index
    %387 = memref.load %arg1[%386] : memref<384xi32, #tpu.memory_space<smem>>
    %388 = arith.index_cast %387 : i32 to index
    %c0_179 = arith.constant 0 : index
    %389 = vector.load %arg2[%388, %c0_179] : memref<256x128xf32, #tpu.memory_space<vmem>>, vector<1x128xf32>
    %c56_i32_180 = arith.constant 56 : i32
    %390 = arith.addi %3, %c56_i32_180 : i32
    %c6_i32_181 = arith.constant 6 : i32
    %391 = arith.addi %390, %c6_i32_181 : i32
    %392 = arith.index_cast %391 : i32 to index
    %393 = memref.load %arg1[%392] : memref<384xi32, #tpu.memory_space<smem>>
    %394 = arith.index_cast %393 : i32 to index
    %c0_182 = arith.constant 0 : index
    %395 = vector.load %arg2[%394, %c0_182] : memref<256x128xf32, #tpu.memory_space<vmem>>, vector<1x128xf32>
    %c56_i32_183 = arith.constant 56 : i32
    %396 = arith.addi %3, %c56_i32_183 : i32
    %c7_i32_184 = arith.constant 7 : i32
    %397 = arith.addi %396, %c7_i32_184 : i32
    %398 = arith.index_cast %397 : i32 to index
    %399 = memref.load %arg1[%398] : memref<384xi32, #tpu.memory_space<smem>>
    %400 = arith.index_cast %399 : i32 to index
    %c0_185 = arith.constant 0 : index
    %401 = vector.load %arg2[%400, %c0_185] : memref<256x128xf32, #tpu.memory_space<vmem>>, vector<1x128xf32>
    %402 = tpu.concatenate %359, %365, %371, %377, %383, %389, %395, %401 in 0 : vector<1x128xf32>, vector<1x128xf32>, vector<1x128xf32>, vector<1x128xf32>, vector<1x128xf32>, vector<1x128xf32>, vector<1x128xf32>, vector<1x128xf32> -> vector<8x128xf32>
    %c56 = arith.constant 56 : index
    %c0_186 = arith.constant 0 : index
    %403 = vector.load %arg11[%c56, %c0_186] : memref<128x128xf32, #tpu.memory_space<vmem>>, vector<8x128xf32>
    tpu.vector_store %arg11[%c56, %c0_186], %402 {strides = array<i32>} : memref<128x128xf32, #tpu.memory_space<vmem>>, vector<8x128xf32>,
    %c64_i32 = arith.constant 64 : i32
    %404 = arith.addi %3, %c64_i32 : i32
    %c0_i32_187 = arith.constant 0 : i32
    %405 = arith.addi %404, %c0_i32_187 : i32
    %406 = arith.index_cast %405 : i32 to index
    %407 = memref.load %arg1[%406] : memref<384xi32, #tpu.memory_space<smem>>
    %408 = arith.index_cast %407 : i32 to index
    %c0_188 = arith.constant 0 : index
    %409 = vector.load %arg2[%408, %c0_188] : memref<256x128xf32, #tpu.memory_space<vmem>>, vector<1x128xf32>
    %c64_i32_189 = arith.constant 64 : i32
    %410 = arith.addi %3, %c64_i32_189 : i32
    %c1_i32_190 = arith.constant 1 : i32
    %411 = arith.addi %410, %c1_i32_190 : i32
    %412 = arith.index_cast %411 : i32 to index
    %413 = memref.load %arg1[%412] : memref<384xi32, #tpu.memory_space<smem>>
    %414 = arith.index_cast %413 : i32 to index
    %c0_191 = arith.constant 0 : index
    %415 = vector.load %arg2[%414, %c0_191] : memref<256x128xf32, #tpu.memory_space<vmem>>, vector<1x128xf32>
    %c64_i32_192 = arith.constant 64 : i32
    %416 = arith.addi %3, %c64_i32_192 : i32
    %c2_i32_193 = arith.constant 2 : i32
    %417 = arith.addi %416, %c2_i32_193 : i32
    %418 = arith.index_cast %417 : i32 to index
    %419 = memref.load %arg1[%418] : memref<384xi32, #tpu.memory_space<smem>>
    %420 = arith.index_cast %419 : i32 to index
    %c0_194 = arith.constant 0 : index
    %421 = vector.load %arg2[%420, %c0_194] : memref<256x128xf32, #tpu.memory_space<vmem>>, vector<1x128xf32>
    %c64_i32_195 = arith.constant 64 : i32
    %422 = arith.addi %3, %c64_i32_195 : i32
    %c3_i32_196 = arith.constant 3 : i32
    %423 = arith.addi %422, %c3_i32_196 : i32
    %424 = arith.index_cast %423 : i32 to index
    %425 = memref.load %arg1[%424] : memref<384xi32, #tpu.memory_space<smem>>
    %426 = arith.index_cast %425 : i32 to index
    %c0_197 = arith.constant 0 : index
    %427 = vector.load %arg2[%426, %c0_197] : memref<256x128xf32, #tpu.memory_space<vmem>>, vector<1x128xf32>
    %c64_i32_198 = arith.constant 64 : i32
    %428 = arith.addi %3, %c64_i32_198 : i32
    %c4_i32_199 = arith.constant 4 : i32
    %429 = arith.addi %428, %c4_i32_199 : i32
    %430 = arith.index_cast %429 : i32 to index
    %431 = memref.load %arg1[%430] : memref<384xi32, #tpu.memory_space<smem>>
    %432 = arith.index_cast %431 : i32 to index
    %c0_200 = arith.constant 0 : index
    %433 = vector.load %arg2[%432, %c0_200] : memref<256x128xf32, #tpu.memory_space<vmem>>, vector<1x128xf32>
    %c64_i32_201 = arith.constant 64 : i32
    %434 = arith.addi %3, %c64_i32_201 : i32
    %c5_i32_202 = arith.constant 5 : i32
    %435 = arith.addi %434, %c5_i32_202 : i32
    %436 = arith.index_cast %435 : i32 to index
    %437 = memref.load %arg1[%436] : memref<384xi32, #tpu.memory_space<smem>>
    %438 = arith.index_cast %437 : i32 to index
    %c0_203 = arith.constant 0 : index
    %439 = vector.load %arg2[%438, %c0_203] : memref<256x128xf32, #tpu.memory_space<vmem>>, vector<1x128xf32>
    %c64_i32_204 = arith.constant 64 : i32
    %440 = arith.addi %3, %c64_i32_204 : i32
    %c6_i32_205 = arith.constant 6 : i32
    %441 = arith.addi %440, %c6_i32_205 : i32
    %442 = arith.index_cast %441 : i32 to index
    %443 = memref.load %arg1[%442] : memref<384xi32, #tpu.memory_space<smem>>
    %444 = arith.index_cast %443 : i32 to index
    %c0_206 = arith.constant 0 : index
    %445 = vector.load %arg2[%444, %c0_206] : memref<256x128xf32, #tpu.memory_space<vmem>>, vector<1x128xf32>
    %c64_i32_207 = arith.constant 64 : i32
    %446 = arith.addi %3, %c64_i32_207 : i32
    %c7_i32_208 = arith.constant 7 : i32
    %447 = arith.addi %446, %c7_i32_208 : i32
    %448 = arith.index_cast %447 : i32 to index
    %449 = memref.load %arg1[%448] : memref<384xi32, #tpu.memory_space<smem>>
    %450 = arith.index_cast %449 : i32 to index
    %c0_209 = arith.constant 0 : index
    %451 = vector.load %arg2[%450, %c0_209] : memref<256x128xf32, #tpu.memory_space<vmem>>, vector<1x128xf32>
    %452 = tpu.concatenate %409, %415, %421, %427, %433, %439, %445, %451 in 0 : vector<1x128xf32>, vector<1x128xf32>, vector<1x128xf32>, vector<1x128xf32>, vector<1x128xf32>, vector<1x128xf32>, vector<1x128xf32>, vector<1x128xf32> -> vector<8x128xf32>
    %c64 = arith.constant 64 : index
    %c0_210 = arith.constant 0 : index
    %453 = vector.load %arg11[%c64, %c0_210] : memref<128x128xf32, #tpu.memory_space<vmem>>, vector<8x128xf32>
    tpu.vector_store %arg11[%c64, %c0_210], %452 {strides = array<i32>} : memref<128x128xf32, #tpu.memory_space<vmem>>, vector<8x128xf32>,
    %c72_i32 = arith.constant 72 : i32
    %454 = arith.addi %3, %c72_i32 : i32
    %c0_i32_211 = arith.constant 0 : i32
    %455 = arith.addi %454, %c0_i32_211 : i32
    %456 = arith.index_cast %455 : i32 to index
    %457 = memref.load %arg1[%456] : memref<384xi32, #tpu.memory_space<smem>>
    %458 = arith.index_cast %457 : i32 to index
    %c0_212 = arith.constant 0 : index
    %459 = vector.load %arg2[%458, %c0_212] : memref<256x128xf32, #tpu.memory_space<vmem>>, vector<1x128xf32>
    %c72_i32_213 = arith.constant 72 : i32
    %460 = arith.addi %3, %c72_i32_213 : i32
    %c1_i32_214 = arith.constant 1 : i32
    %461 = arith.addi %460, %c1_i32_214 : i32
    %462 = arith.index_cast %461 : i32 to index
    %463 = memref.load %arg1[%462] : memref<384xi32, #tpu.memory_space<smem>>
    %464 = arith.index_cast %463 : i32 to index
    %c0_215 = arith.constant 0 : index
    %465 = vector.load %arg2[%464, %c0_215] : memref<256x128xf32, #tpu.memory_space<vmem>>, vector<1x128xf32>
    %c72_i32_216 = arith.constant 72 : i32
    %466 = arith.addi %3, %c72_i32_216 : i32
    %c2_i32_217 = arith.constant 2 : i32
    %467 = arith.addi %466, %c2_i32_217 : i32
    %468 = arith.index_cast %467 : i32 to index
    %469 = memref.load %arg1[%468] : memref<384xi32, #tpu.memory_space<smem>>
    %470 = arith.index_cast %469 : i32 to index
    %c0_218 = arith.constant 0 : index
    %471 = vector.load %arg2[%470, %c0_218] : memref<256x128xf32, #tpu.memory_space<vmem>>, vector<1x128xf32>
    %c72_i32_219 = arith.constant 72 : i32
    %472 = arith.addi %3, %c72_i32_219 : i32
    %c3_i32_220 = arith.constant 3 : i32
    %473 = arith.addi %472, %c3_i32_220 : i32
    %474 = arith.index_cast %473 : i32 to index
    %475 = memref.load %arg1[%474] : memref<384xi32, #tpu.memory_space<smem>>
    %476 = arith.index_cast %475 : i32 to index
    %c0_221 = arith.constant 0 : index
    %477 = vector.load %arg2[%476, %c0_221] : memref<256x128xf32, #tpu.memory_space<vmem>>, vector<1x128xf32>
    %c72_i32_222 = arith.constant 72 : i32
    %478 = arith.addi %3, %c72_i32_222 : i32
    %c4_i32_223 = arith.constant 4 : i32
    %479 = arith.addi %478, %c4_i32_223 : i32
    %480 = arith.index_cast %479 : i32 to index
    %481 = memref.load %arg1[%480] : memref<384xi32, #tpu.memory_space<smem>>
    %482 = arith.index_cast %481 : i32 to index
    %c0_224 = arith.constant 0 : index
    %483 = vector.load %arg2[%482, %c0_224] : memref<256x128xf32, #tpu.memory_space<vmem>>, vector<1x128xf32>
    %c72_i32_225 = arith.constant 72 : i32
    %484 = arith.addi %3, %c72_i32_225 : i32
    %c5_i32_226 = arith.constant 5 : i32
    %485 = arith.addi %484, %c5_i32_226 : i32
    %486 = arith.index_cast %485 : i32 to index
    %487 = memref.load %arg1[%486] : memref<384xi32, #tpu.memory_space<smem>>
    %488 = arith.index_cast %487 : i32 to index
    %c0_227 = arith.constant 0 : index
    %489 = vector.load %arg2[%488, %c0_227] : memref<256x128xf32, #tpu.memory_space<vmem>>, vector<1x128xf32>
    %c72_i32_228 = arith.constant 72 : i32
    %490 = arith.addi %3, %c72_i32_228 : i32
    %c6_i32_229 = arith.constant 6 : i32
    %491 = arith.addi %490, %c6_i32_229 : i32
    %492 = arith.index_cast %491 : i32 to index
    %493 = memref.load %arg1[%492] : memref<384xi32, #tpu.memory_space<smem>>
    %494 = arith.index_cast %493 : i32 to index
    %c0_230 = arith.constant 0 : index
    %495 = vector.load %arg2[%494, %c0_230] : memref<256x128xf32, #tpu.memory_space<vmem>>, vector<1x128xf32>
    %c72_i32_231 = arith.constant 72 : i32
    %496 = arith.addi %3, %c72_i32_231 : i32
    %c7_i32_232 = arith.constant 7 : i32
    %497 = arith.addi %496, %c7_i32_232 : i32
    %498 = arith.index_cast %497 : i32 to index
    %499 = memref.load %arg1[%498] : memref<384xi32, #tpu.memory_space<smem>>
    %500 = arith.index_cast %499 : i32 to index
    %c0_233 = arith.constant 0 : index
    %501 = vector.load %arg2[%500, %c0_233] : memref<256x128xf32, #tpu.memory_space<vmem>>, vector<1x128xf32>
    %502 = tpu.concatenate %459, %465, %471, %477, %483, %489, %495, %501 in 0 : vector<1x128xf32>, vector<1x128xf32>, vector<1x128xf32>, vector<1x128xf32>, vector<1x128xf32>, vector<1x128xf32>, vector<1x128xf32>, vector<1x128xf32> -> vector<8x128xf32>
    %c72 = arith.constant 72 : index
    %c0_234 = arith.constant 0 : index
    %503 = vector.load %arg11[%c72, %c0_234] : memref<128x128xf32, #tpu.memory_space<vmem>>, vector<8x128xf32>
    tpu.vector_store %arg11[%c72, %c0_234], %502 {strides = array<i32>} : memref<128x128xf32, #tpu.memory_space<vmem>>, vector<8x128xf32>,
    %c80_i32 = arith.constant 80 : i32
    %504 = arith.addi %3, %c80_i32 : i32
    %c0_i32_235 = arith.constant 0 : i32
    %505 = arith.addi %504, %c0_i32_235 : i32
    %506 = arith.index_cast %505 : i32 to index
    %507 = memref.load %arg1[%506] : memref<384xi32, #tpu.memory_space<smem>>
    %508 = arith.index_cast %507 : i32 to index
    %c0_236 = arith.constant 0 : index
    %509 = vector.load %arg2[%508, %c0_236] : memref<256x128xf32, #tpu.memory_space<vmem>>, vector<1x128xf32>
    %c80_i32_237 = arith.constant 80 : i32
    %510 = arith.addi %3, %c80_i32_237 : i32
    %c1_i32_238 = arith.constant 1 : i32
    %511 = arith.addi %510, %c1_i32_238 : i32
    %512 = arith.index_cast %511 : i32 to index
    %513 = memref.load %arg1[%512] : memref<384xi32, #tpu.memory_space<smem>>
    %514 = arith.index_cast %513 : i32 to index
    %c0_239 = arith.constant 0 : index
    %515 = vector.load %arg2[%514, %c0_239] : memref<256x128xf32, #tpu.memory_space<vmem>>, vector<1x128xf32>
    %c80_i32_240 = arith.constant 80 : i32
    %516 = arith.addi %3, %c80_i32_240 : i32
    %c2_i32_241 = arith.constant 2 : i32
    %517 = arith.addi %516, %c2_i32_241 : i32
    %518 = arith.index_cast %517 : i32 to index
    %519 = memref.load %arg1[%518] : memref<384xi32, #tpu.memory_space<smem>>
    %520 = arith.index_cast %519 : i32 to index
    %c0_242 = arith.constant 0 : index
    %521 = vector.load %arg2[%520, %c0_242] : memref<256x128xf32, #tpu.memory_space<vmem>>, vector<1x128xf32>
    %c80_i32_243 = arith.constant 80 : i32
    %522 = arith.addi %3, %c80_i32_243 : i32
    %c3_i32_244 = arith.constant 3 : i32
    %523 = arith.addi %522, %c3_i32_244 : i32
    %524 = arith.index_cast %523 : i32 to index
    %525 = memref.load %arg1[%524] : memref<384xi32, #tpu.memory_space<smem>>
    %526 = arith.index_cast %525 : i32 to index
    %c0_245 = arith.constant 0 : index
    %527 = vector.load %arg2[%526, %c0_245] : memref<256x128xf32, #tpu.memory_space<vmem>>, vector<1x128xf32>
    %c80_i32_246 = arith.constant 80 : i32
    %528 = arith.addi %3, %c80_i32_246 : i32
    %c4_i32_247 = arith.constant 4 : i32
    %529 = arith.addi %528, %c4_i32_247 : i32
    %530 = arith.index_cast %529 : i32 to index
    %531 = memref.load %arg1[%530] : memref<384xi32, #tpu.memory_space<smem>>
    %532 = arith.index_cast %531 : i32 to index
    %c0_248 = arith.constant 0 : index
    %533 = vector.load %arg2[%532, %c0_248] : memref<256x128xf32, #tpu.memory_space<vmem>>, vector<1x128xf32>
    %c80_i32_249 = arith.constant 80 : i32
    %534 = arith.addi %3, %c80_i32_249 : i32
    %c5_i32_250 = arith.constant 5 : i32
    %535 = arith.addi %534, %c5_i32_250 : i32
    %536 = arith.index_cast %535 : i32 to index
    %537 = memref.load %arg1[%536] : memref<384xi32, #tpu.memory_space<smem>>
    %538 = arith.index_cast %537 : i32 to index
    %c0_251 = arith.constant 0 : index
    %539 = vector.load %arg2[%538, %c0_251] : memref<256x128xf32, #tpu.memory_space<vmem>>, vector<1x128xf32>
    %c80_i32_252 = arith.constant 80 : i32
    %540 = arith.addi %3, %c80_i32_252 : i32
    %c6_i32_253 = arith.constant 6 : i32
    %541 = arith.addi %540, %c6_i32_253 : i32
    %542 = arith.index_cast %541 : i32 to index
    %543 = memref.load %arg1[%542] : memref<384xi32, #tpu.memory_space<smem>>
    %544 = arith.index_cast %543 : i32 to index
    %c0_254 = arith.constant 0 : index
    %545 = vector.load %arg2[%544, %c0_254] : memref<256x128xf32, #tpu.memory_space<vmem>>, vector<1x128xf32>
    %c80_i32_255 = arith.constant 80 : i32
    %546 = arith.addi %3, %c80_i32_255 : i32
    %c7_i32_256 = arith.constant 7 : i32
    %547 = arith.addi %546, %c7_i32_256 : i32
    %548 = arith.index_cast %547 : i32 to index
    %549 = memref.load %arg1[%548] : memref<384xi32, #tpu.memory_space<smem>>
    %550 = arith.index_cast %549 : i32 to index
    %c0_257 = arith.constant 0 : index
    %551 = vector.load %arg2[%550, %c0_257] : memref<256x128xf32, #tpu.memory_space<vmem>>, vector<1x128xf32>
    %552 = tpu.concatenate %509, %515, %521, %527, %533, %539, %545, %551 in 0 : vector<1x128xf32>, vector<1x128xf32>, vector<1x128xf32>, vector<1x128xf32>, vector<1x128xf32>, vector<1x128xf32>, vector<1x128xf32>, vector<1x128xf32> -> vector<8x128xf32>
    %c80 = arith.constant 80 : index
    %c0_258 = arith.constant 0 : index
    %553 = vector.load %arg11[%c80, %c0_258] : memref<128x128xf32, #tpu.memory_space<vmem>>, vector<8x128xf32>
    tpu.vector_store %arg11[%c80, %c0_258], %552 {strides = array<i32>} : memref<128x128xf32, #tpu.memory_space<vmem>>, vector<8x128xf32>,
    %c88_i32 = arith.constant 88 : i32
    %554 = arith.addi %3, %c88_i32 : i32
    %c0_i32_259 = arith.constant 0 : i32
    %555 = arith.addi %554, %c0_i32_259 : i32
    %556 = arith.index_cast %555 : i32 to index
    %557 = memref.load %arg1[%556] : memref<384xi32, #tpu.memory_space<smem>>
    %558 = arith.index_cast %557 : i32 to index
    %c0_260 = arith.constant 0 : index
    %559 = vector.load %arg2[%558, %c0_260] : memref<256x128xf32, #tpu.memory_space<vmem>>, vector<1x128xf32>
    %c88_i32_261 = arith.constant 88 : i32
    %560 = arith.addi %3, %c88_i32_261 : i32
    %c1_i32_262 = arith.constant 1 : i32
    %561 = arith.addi %560, %c1_i32_262 : i32
    %562 = arith.index_cast %561 : i32 to index
    %563 = memref.load %arg1[%562] : memref<384xi32, #tpu.memory_space<smem>>
    %564 = arith.index_cast %563 : i32 to index
    %c0_263 = arith.constant 0 : index
    %565 = vector.load %arg2[%564, %c0_263] : memref<256x128xf32, #tpu.memory_space<vmem>>, vector<1x128xf32>
    %c88_i32_264 = arith.constant 88 : i32
    %566 = arith.addi %3, %c88_i32_264 : i32
    %c2_i32_265 = arith.constant 2 : i32
    %567 = arith.addi %566, %c2_i32_265 : i32
    %568 = arith.index_cast %567 : i32 to index
    %569 = memref.load %arg1[%568] : memref<384xi32, #tpu.memory_space<smem>>
    %570 = arith.index_cast %569 : i32 to index
    %c0_266 = arith.constant 0 : index
    %571 = vector.load %arg2[%570, %c0_266] : memref<256x128xf32, #tpu.memory_space<vmem>>, vector<1x128xf32>
    %c88_i32_267 = arith.constant 88 : i32
    %572 = arith.addi %3, %c88_i32_267 : i32
    %c3_i32_268 = arith.constant 3 : i32
    %573 = arith.addi %572, %c3_i32_268 : i32
    %574 = arith.index_cast %573 : i32 to index
    %575 = memref.load %arg1[%574] : memref<384xi32, #tpu.memory_space<smem>>
    %576 = arith.index_cast %575 : i32 to index
    %c0_269 = arith.constant 0 : index
    %577 = vector.load %arg2[%576, %c0_269] : memref<256x128xf32, #tpu.memory_space<vmem>>, vector<1x128xf32>
    %c88_i32_270 = arith.constant 88 : i32
    %578 = arith.addi %3, %c88_i32_270 : i32
    %c4_i32_271 = arith.constant 4 : i32
    %579 = arith.addi %578, %c4_i32_271 : i32
    %580 = arith.index_cast %579 : i32 to index
    %581 = memref.load %arg1[%580] : memref<384xi32, #tpu.memory_space<smem>>
    %582 = arith.index_cast %581 : i32 to index
    %c0_272 = arith.constant 0 : index
    %583 = vector.load %arg2[%582, %c0_272] : memref<256x128xf32, #tpu.memory_space<vmem>>, vector<1x128xf32>
    %c88_i32_273 = arith.constant 88 : i32
    %584 = arith.addi %3, %c88_i32_273 : i32
    %c5_i32_274 = arith.constant 5 : i32
    %585 = arith.addi %584, %c5_i32_274 : i32
    %586 = arith.index_cast %585 : i32 to index
    %587 = memref.load %arg1[%586] : memref<384xi32, #tpu.memory_space<smem>>
    %588 = arith.index_cast %587 : i32 to index
    %c0_275 = arith.constant 0 : index
    %589 = vector.load %arg2[%588, %c0_275] : memref<256x128xf32, #tpu.memory_space<vmem>>, vector<1x128xf32>
    %c88_i32_276 = arith.constant 88 : i32
    %590 = arith.addi %3, %c88_i32_276 : i32
    %c6_i32_277 = arith.constant 6 : i32
    %591 = arith.addi %590, %c6_i32_277 : i32
    %592 = arith.index_cast %591 : i32 to index
    %593 = memref.load %arg1[%592] : memref<384xi32, #tpu.memory_space<smem>>
    %594 = arith.index_cast %593 : i32 to index
    %c0_278 = arith.constant 0 : index
    %595 = vector.load %arg2[%594, %c0_278] : memref<256x128xf32, #tpu.memory_space<vmem>>, vector<1x128xf32>
    %c88_i32_279 = arith.constant 88 : i32
    %596 = arith.addi %3, %c88_i32_279 : i32
    %c7_i32_280 = arith.constant 7 : i32
    %597 = arith.addi %596, %c7_i32_280 : i32
    %598 = arith.index_cast %597 : i32 to index
    %599 = memref.load %arg1[%598] : memref<384xi32, #tpu.memory_space<smem>>
    %600 = arith.index_cast %599 : i32 to index
    %c0_281 = arith.constant 0 : index
    %601 = vector.load %arg2[%600, %c0_281] : memref<256x128xf32, #tpu.memory_space<vmem>>, vector<1x128xf32>
    %602 = tpu.concatenate %559, %565, %571, %577, %583, %589, %595, %601 in 0 : vector<1x128xf32>, vector<1x128xf32>, vector<1x128xf32>, vector<1x128xf32>, vector<1x128xf32>, vector<1x128xf32>, vector<1x128xf32>, vector<1x128xf32> -> vector<8x128xf32>
    %c88 = arith.constant 88 : index
    %c0_282 = arith.constant 0 : index
    %603 = vector.load %arg11[%c88, %c0_282] : memref<128x128xf32, #tpu.memory_space<vmem>>, vector<8x128xf32>
    tpu.vector_store %arg11[%c88, %c0_282], %602 {strides = array<i32>} : memref<128x128xf32, #tpu.memory_space<vmem>>, vector<8x128xf32>,
    %c96_i32 = arith.constant 96 : i32
    %604 = arith.addi %3, %c96_i32 : i32
    %c0_i32_283 = arith.constant 0 : i32
    %605 = arith.addi %604, %c0_i32_283 : i32
    %606 = arith.index_cast %605 : i32 to index
    %607 = memref.load %arg1[%606] : memref<384xi32, #tpu.memory_space<smem>>
    %608 = arith.index_cast %607 : i32 to index
    %c0_284 = arith.constant 0 : index
    %609 = vector.load %arg2[%608, %c0_284] : memref<256x128xf32, #tpu.memory_space<vmem>>, vector<1x128xf32>
    %c96_i32_285 = arith.constant 96 : i32
    %610 = arith.addi %3, %c96_i32_285 : i32
    %c1_i32_286 = arith.constant 1 : i32
    %611 = arith.addi %610, %c1_i32_286 : i32
    %612 = arith.index_cast %611 : i32 to index
    %613 = memref.load %arg1[%612] : memref<384xi32, #tpu.memory_space<smem>>
    %614 = arith.index_cast %613 : i32 to index
    %c0_287 = arith.constant 0 : index
    %615 = vector.load %arg2[%614, %c0_287] : memref<256x128xf32, #tpu.memory_space<vmem>>, vector<1x128xf32>
    %c96_i32_288 = arith.constant 96 : i32
    %616 = arith.addi %3, %c96_i32_288 : i32
    %c2_i32_289 = arith.constant 2 : i32
    %617 = arith.addi %616, %c2_i32_289 : i32
    %618 = arith.index_cast %617 : i32 to index
    %619 = memref.load %arg1[%618] : memref<384xi32, #tpu.memory_space<smem>>
    %620 = arith.index_cast %619 : i32 to index
    %c0_290 = arith.constant 0 : index
    %621 = vector.load %arg2[%620, %c0_290] : memref<256x128xf32, #tpu.memory_space<vmem>>, vector<1x128xf32>
    %c96_i32_291 = arith.constant 96 : i32
    %622 = arith.addi %3, %c96_i32_291 : i32
    %c3_i32_292 = arith.constant 3 : i32
    %623 = arith.addi %622, %c3_i32_292 : i32
    %624 = arith.index_cast %623 : i32 to index
    %625 = memref.load %arg1[%624] : memref<384xi32, #tpu.memory_space<smem>>
    %626 = arith.index_cast %625 : i32 to index
    %c0_293 = arith.constant 0 : index
    %627 = vector.load %arg2[%626, %c0_293] : memref<256x128xf32, #tpu.memory_space<vmem>>, vector<1x128xf32>
    %c96_i32_294 = arith.constant 96 : i32
    %628 = arith.addi %3, %c96_i32_294 : i32
    %c4_i32_295 = arith.constant 4 : i32
    %629 = arith.addi %628, %c4_i32_295 : i32
    %630 = arith.index_cast %629 : i32 to index
    %631 = memref.load %arg1[%630] : memref<384xi32, #tpu.memory_space<smem>>
    %632 = arith.index_cast %631 : i32 to index
    %c0_296 = arith.constant 0 : index
    %633 = vector.load %arg2[%632, %c0_296] : memref<256x128xf32, #tpu.memory_space<vmem>>, vector<1x128xf32>
    %c96_i32_297 = arith.constant 96 : i32
    %634 = arith.addi %3, %c96_i32_297 : i32
    %c5_i32_298 = arith.constant 5 : i32
    %635 = arith.addi %634, %c5_i32_298 : i32
    %636 = arith.index_cast %635 : i32 to index
    %637 = memref.load %arg1[%636] : memref<384xi32, #tpu.memory_space<smem>>
    %638 = arith.index_cast %637 : i32 to index
    %c0_299 = arith.constant 0 : index
    %639 = vector.load %arg2[%638, %c0_299] : memref<256x128xf32, #tpu.memory_space<vmem>>, vector<1x128xf32>
    %c96_i32_300 = arith.constant 96 : i32
    %640 = arith.addi %3, %c96_i32_300 : i32
    %c6_i32_301 = arith.constant 6 : i32
    %641 = arith.addi %640, %c6_i32_301 : i32
    %642 = arith.index_cast %641 : i32 to index
    %643 = memref.load %arg1[%642] : memref<384xi32, #tpu.memory_space<smem>>
    %644 = arith.index_cast %643 : i32 to index
    %c0_302 = arith.constant 0 : index
    %645 = vector.load %arg2[%644, %c0_302] : memref<256x128xf32, #tpu.memory_space<vmem>>, vector<1x128xf32>
    %c96_i32_303 = arith.constant 96 : i32
    %646 = arith.addi %3, %c96_i32_303 : i32
    %c7_i32_304 = arith.constant 7 : i32
    %647 = arith.addi %646, %c7_i32_304 : i32
    %648 = arith.index_cast %647 : i32 to index
    %649 = memref.load %arg1[%648] : memref<384xi32, #tpu.memory_space<smem>>
    %650 = arith.index_cast %649 : i32 to index
    %c0_305 = arith.constant 0 : index
    %651 = vector.load %arg2[%650, %c0_305] : memref<256x128xf32, #tpu.memory_space<vmem>>, vector<1x128xf32>
    %652 = tpu.concatenate %609, %615, %621, %627, %633, %639, %645, %651 in 0 : vector<1x128xf32>, vector<1x128xf32>, vector<1x128xf32>, vector<1x128xf32>, vector<1x128xf32>, vector<1x128xf32>, vector<1x128xf32>, vector<1x128xf32> -> vector<8x128xf32>
    %c96 = arith.constant 96 : index
    %c0_306 = arith.constant 0 : index
    %653 = vector.load %arg11[%c96, %c0_306] : memref<128x128xf32, #tpu.memory_space<vmem>>, vector<8x128xf32>
    tpu.vector_store %arg11[%c96, %c0_306], %652 {strides = array<i32>} : memref<128x128xf32, #tpu.memory_space<vmem>>, vector<8x128xf32>,
    %c104_i32 = arith.constant 104 : i32
    %654 = arith.addi %3, %c104_i32 : i32
    %c0_i32_307 = arith.constant 0 : i32
    %655 = arith.addi %654, %c0_i32_307 : i32
    %656 = arith.index_cast %655 : i32 to index
    %657 = memref.load %arg1[%656] : memref<384xi32, #tpu.memory_space<smem>>
    %658 = arith.index_cast %657 : i32 to index
    %c0_308 = arith.constant 0 : index
    %659 = vector.load %arg2[%658, %c0_308] : memref<256x128xf32, #tpu.memory_space<vmem>>, vector<1x128xf32>
    %c104_i32_309 = arith.constant 104 : i32
    %660 = arith.addi %3, %c104_i32_309 : i32
    %c1_i32_310 = arith.constant 1 : i32
    %661 = arith.addi %660, %c1_i32_310 : i32
    %662 = arith.index_cast %661 : i32 to index
    %663 = memref.load %arg1[%662] : memref<384xi32, #tpu.memory_space<smem>>
    %664 = arith.index_cast %663 : i32 to index
    %c0_311 = arith.constant 0 : index
    %665 = vector.load %arg2[%664, %c0_311] : memref<256x128xf32, #tpu.memory_space<vmem>>, vector<1x128xf32>
    %c104_i32_312 = arith.constant 104 : i32
    %666 = arith.addi %3, %c104_i32_312 : i32
    %c2_i32_313 = arith.constant 2 : i32
    %667 = arith.addi %666, %c2_i32_313 : i32
    %668 = arith.index_cast %667 : i32 to index
    %669 = memref.load %arg1[%668] : memref<384xi32, #tpu.memory_space<smem>>
    %670 = arith.index_cast %669 : i32 to index
    %c0_314 = arith.constant 0 : index
    %671 = vector.load %arg2[%670, %c0_314] : memref<256x128xf32, #tpu.memory_space<vmem>>, vector<1x128xf32>
    %c104_i32_315 = arith.constant 104 : i32
    %672 = arith.addi %3, %c104_i32_315 : i32
    %c3_i32_316 = arith.constant 3 : i32
    %673 = arith.addi %672, %c3_i32_316 : i32
    %674 = arith.index_cast %673 : i32 to index
    %675 = memref.load %arg1[%674] : memref<384xi32, #tpu.memory_space<smem>>
    %676 = arith.index_cast %675 : i32 to index
    %c0_317 = arith.constant 0 : index
    %677 = vector.load %arg2[%676, %c0_317] : memref<256x128xf32, #tpu.memory_space<vmem>>, vector<1x128xf32>
    %c104_i32_318 = arith.constant 104 : i32
    %678 = arith.addi %3, %c104_i32_318 : i32
    %c4_i32_319 = arith.constant 4 : i32
    %679 = arith.addi %678, %c4_i32_319 : i32
    %680 = arith.index_cast %679 : i32 to index
    %681 = memref.load %arg1[%680] : memref<384xi32, #tpu.memory_space<smem>>
    %682 = arith.index_cast %681 : i32 to index
    %c0_320 = arith.constant 0 : index
    %683 = vector.load %arg2[%682, %c0_320] : memref<256x128xf32, #tpu.memory_space<vmem>>, vector<1x128xf32>
    %c104_i32_321 = arith.constant 104 : i32
    %684 = arith.addi %3, %c104_i32_321 : i32
    %c5_i32_322 = arith.constant 5 : i32
    %685 = arith.addi %684, %c5_i32_322 : i32
    %686 = arith.index_cast %685 : i32 to index
    %687 = memref.load %arg1[%686] : memref<384xi32, #tpu.memory_space<smem>>
    %688 = arith.index_cast %687 : i32 to index
    %c0_323 = arith.constant 0 : index
    %689 = vector.load %arg2[%688, %c0_323] : memref<256x128xf32, #tpu.memory_space<vmem>>, vector<1x128xf32>
    %c104_i32_324 = arith.constant 104 : i32
    %690 = arith.addi %3, %c104_i32_324 : i32
    %c6_i32_325 = arith.constant 6 : i32
    %691 = arith.addi %690, %c6_i32_325 : i32
    %692 = arith.index_cast %691 : i32 to index
    %693 = memref.load %arg1[%692] : memref<384xi32, #tpu.memory_space<smem>>
    %694 = arith.index_cast %693 : i32 to index
    %c0_326 = arith.constant 0 : index
    %695 = vector.load %arg2[%694, %c0_326] : memref<256x128xf32, #tpu.memory_space<vmem>>, vector<1x128xf32>
    %c104_i32_327 = arith.constant 104 : i32
    %696 = arith.addi %3, %c104_i32_327 : i32
    %c7_i32_328 = arith.constant 7 : i32
    %697 = arith.addi %696, %c7_i32_328 : i32
    %698 = arith.index_cast %697 : i32 to index
    %699 = memref.load %arg1[%698] : memref<384xi32, #tpu.memory_space<smem>>
    %700 = arith.index_cast %699 : i32 to index
    %c0_329 = arith.constant 0 : index
    %701 = vector.load %arg2[%700, %c0_329] : memref<256x128xf32, #tpu.memory_space<vmem>>, vector<1x128xf32>
    %702 = tpu.concatenate %659, %665, %671, %677, %683, %689, %695, %701 in 0 : vector<1x128xf32>, vector<1x128xf32>, vector<1x128xf32>, vector<1x128xf32>, vector<1x128xf32>, vector<1x128xf32>, vector<1x128xf32>, vector<1x128xf32> -> vector<8x128xf32>
    %c104 = arith.constant 104 : index
    %c0_330 = arith.constant 0 : index
    %703 = vector.load %arg11[%c104, %c0_330] : memref<128x128xf32, #tpu.memory_space<vmem>>, vector<8x128xf32>
    tpu.vector_store %arg11[%c104, %c0_330], %702 {strides = array<i32>} : memref<128x128xf32, #tpu.memory_space<vmem>>, vector<8x128xf32>,
    %c112_i32 = arith.constant 112 : i32
    %704 = arith.addi %3, %c112_i32 : i32
    %c0_i32_331 = arith.constant 0 : i32
    %705 = arith.addi %704, %c0_i32_331 : i32
    %706 = arith.index_cast %705 : i32 to index
    %707 = memref.load %arg1[%706] : memref<384xi32, #tpu.memory_space<smem>>
    %708 = arith.index_cast %707 : i32 to index
    %c0_332 = arith.constant 0 : index
    %709 = vector.load %arg2[%708, %c0_332] : memref<256x128xf32, #tpu.memory_space<vmem>>, vector<1x128xf32>
    %c112_i32_333 = arith.constant 112 : i32
    %710 = arith.addi %3, %c112_i32_333 : i32
    %c1_i32_334 = arith.constant 1 : i32
    %711 = arith.addi %710, %c1_i32_334 : i32
    %712 = arith.index_cast %711 : i32 to index
    %713 = memref.load %arg1[%712] : memref<384xi32, #tpu.memory_space<smem>>
    %714 = arith.index_cast %713 : i32 to index
    %c0_335 = arith.constant 0 : index
    %715 = vector.load %arg2[%714, %c0_335] : memref<256x128xf32, #tpu.memory_space<vmem>>, vector<1x128xf32>
    %c112_i32_336 = arith.constant 112 : i32
    %716 = arith.addi %3, %c112_i32_336 : i32
    %c2_i32_337 = arith.constant 2 : i32
    %717 = arith.addi %716, %c2_i32_337 : i32
    %718 = arith.index_cast %717 : i32 to index
    %719 = memref.load %arg1[%718] : memref<384xi32, #tpu.memory_space<smem>>
    %720 = arith.index_cast %719 : i32 to index
    %c0_338 = arith.constant 0 : index
    %721 = vector.load %arg2[%720, %c0_338] : memref<256x128xf32, #tpu.memory_space<vmem>>, vector<1x128xf32>
    %c112_i32_339 = arith.constant 112 : i32
    %722 = arith.addi %3, %c112_i32_339 : i32
    %c3_i32_340 = arith.constant 3 : i32
    %723 = arith.addi %722, %c3_i32_340 : i32
    %724 = arith.index_cast %723 : i32 to index
    %725 = memref.load %arg1[%724] : memref<384xi32, #tpu.memory_space<smem>>
    %726 = arith.index_cast %725 : i32 to index
    %c0_341 = arith.constant 0 : index
    %727 = vector.load %arg2[%726, %c0_341] : memref<256x128xf32, #tpu.memory_space<vmem>>, vector<1x128xf32>
    %c112_i32_342 = arith.constant 112 : i32
    %728 = arith.addi %3, %c112_i32_342 : i32
    %c4_i32_343 = arith.constant 4 : i32
    %729 = arith.addi %728, %c4_i32_343 : i32
    %730 = arith.index_cast %729 : i32 to index
    %731 = memref.load %arg1[%730] : memref<384xi32, #tpu.memory_space<smem>>
    %732 = arith.index_cast %731 : i32 to index
    %c0_344 = arith.constant 0 : index
    %733 = vector.load %arg2[%732, %c0_344] : memref<256x128xf32, #tpu.memory_space<vmem>>, vector<1x128xf32>
    %c112_i32_345 = arith.constant 112 : i32
    %734 = arith.addi %3, %c112_i32_345 : i32
    %c5_i32_346 = arith.constant 5 : i32
    %735 = arith.addi %734, %c5_i32_346 : i32
    %736 = arith.index_cast %735 : i32 to index
    %737 = memref.load %arg1[%736] : memref<384xi32, #tpu.memory_space<smem>>
    %738 = arith.index_cast %737 : i32 to index
    %c0_347 = arith.constant 0 : index
    %739 = vector.load %arg2[%738, %c0_347] : memref<256x128xf32, #tpu.memory_space<vmem>>, vector<1x128xf32>
    %c112_i32_348 = arith.constant 112 : i32
    %740 = arith.addi %3, %c112_i32_348 : i32
    %c6_i32_349 = arith.constant 6 : i32
    %741 = arith.addi %740, %c6_i32_349 : i32
    %742 = arith.index_cast %741 : i32 to index
    %743 = memref.load %arg1[%742] : memref<384xi32, #tpu.memory_space<smem>>
    %744 = arith.index_cast %743 : i32 to index
    %c0_350 = arith.constant 0 : index
    %745 = vector.load %arg2[%744, %c0_350] : memref<256x128xf32, #tpu.memory_space<vmem>>, vector<1x128xf32>
    %c112_i32_351 = arith.constant 112 : i32
    %746 = arith.addi %3, %c112_i32_351 : i32
    %c7_i32_352 = arith.constant 7 : i32
    %747 = arith.addi %746, %c7_i32_352 : i32
    %748 = arith.index_cast %747 : i32 to index
    %749 = memref.load %arg1[%748] : memref<384xi32, #tpu.memory_space<smem>>
    %750 = arith.index_cast %749 : i32 to index
    %c0_353 = arith.constant 0 : index
    %751 = vector.load %arg2[%750, %c0_353] : memref<256x128xf32, #tpu.memory_space<vmem>>, vector<1x128xf32>
    %752 = tpu.concatenate %709, %715, %721, %727, %733, %739, %745, %751 in 0 : vector<1x128xf32>, vector<1x128xf32>, vector<1x128xf32>, vector<1x128xf32>, vector<1x128xf32>, vector<1x128xf32>, vector<1x128xf32>, vector<1x128xf32> -> vector<8x128xf32>
    %c112 = arith.constant 112 : index
    %c0_354 = arith.constant 0 : index
    %753 = vector.load %arg11[%c112, %c0_354] : memref<128x128xf32, #tpu.memory_space<vmem>>, vector<8x128xf32>
    tpu.vector_store %arg11[%c112, %c0_354], %752 {strides = array<i32>} : memref<128x128xf32, #tpu.memory_space<vmem>>, vector<8x128xf32>,
    %c120_i32 = arith.constant 120 : i32
    %754 = arith.addi %3, %c120_i32 : i32
    %c0_i32_355 = arith.constant 0 : i32
    %755 = arith.addi %754, %c0_i32_355 : i32
    %756 = arith.index_cast %755 : i32 to index
    %757 = memref.load %arg1[%756] : memref<384xi32, #tpu.memory_space<smem>>
    %758 = arith.index_cast %757 : i32 to index
    %c0_356 = arith.constant 0 : index
    %759 = vector.load %arg2[%758, %c0_356] : memref<256x128xf32, #tpu.memory_space<vmem>>, vector<1x128xf32>
    %c120_i32_357 = arith.constant 120 : i32
    %760 = arith.addi %3, %c120_i32_357 : i32
    %c1_i32_358 = arith.constant 1 : i32
    %761 = arith.addi %760, %c1_i32_358 : i32
    %762 = arith.index_cast %761 : i32 to index
    %763 = memref.load %arg1[%762] : memref<384xi32, #tpu.memory_space<smem>>
    %764 = arith.index_cast %763 : i32 to index
    %c0_359 = arith.constant 0 : index
    %765 = vector.load %arg2[%764, %c0_359] : memref<256x128xf32, #tpu.memory_space<vmem>>, vector<1x128xf32>
    %c120_i32_360 = arith.constant 120 : i32
    %766 = arith.addi %3, %c120_i32_360 : i32
    %c2_i32_361 = arith.constant 2 : i32
    %767 = arith.addi %766, %c2_i32_361 : i32
    %768 = arith.index_cast %767 : i32 to index
    %769 = memref.load %arg1[%768] : memref<384xi32, #tpu.memory_space<smem>>
    %770 = arith.index_cast %769 : i32 to index
    %c0_362 = arith.constant 0 : index
    %771 = vector.load %arg2[%770, %c0_362] : memref<256x128xf32, #tpu.memory_space<vmem>>, vector<1x128xf32>
    %c120_i32_363 = arith.constant 120 : i32
    %772 = arith.addi %3, %c120_i32_363 : i32
    %c3_i32_364 = arith.constant 3 : i32
    %773 = arith.addi %772, %c3_i32_364 : i32
    %774 = arith.index_cast %773 : i32 to index
    %775 = memref.load %arg1[%774] : memref<384xi32, #tpu.memory_space<smem>>
    %776 = arith.index_cast %775 : i32 to index
    %c0_365 = arith.constant 0 : index
    %777 = vector.load %arg2[%776, %c0_365] : memref<256x128xf32, #tpu.memory_space<vmem>>, vector<1x128xf32>
    %c120_i32_366 = arith.constant 120 : i32
    %778 = arith.addi %3, %c120_i32_366 : i32
    %c4_i32_367 = arith.constant 4 : i32
    %779 = arith.addi %778, %c4_i32_367 : i32
    %780 = arith.index_cast %779 : i32 to index
    %781 = memref.load %arg1[%780] : memref<384xi32, #tpu.memory_space<smem>>
    %782 = arith.index_cast %781 : i32 to index
    %c0_368 = arith.constant 0 : index
    %783 = vector.load %arg2[%782, %c0_368] : memref<256x128xf32, #tpu.memory_space<vmem>>, vector<1x128xf32>
    %c120_i32_369 = arith.constant 120 : i32
    %784 = arith.addi %3, %c120_i32_369 : i32
    %c5_i32_370 = arith.constant 5 : i32
    %785 = arith.addi %784, %c5_i32_370 : i32
    %786 = arith.index_cast %785 : i32 to index
    %787 = memref.load %arg1[%786] : memref<384xi32, #tpu.memory_space<smem>>
    %788 = arith.index_cast %787 : i32 to index
    %c0_371 = arith.constant 0 : index
    %789 = vector.load %arg2[%788, %c0_371] : memref<256x128xf32, #tpu.memory_space<vmem>>, vector<1x128xf32>
    %c120_i32_372 = arith.constant 120 : i32
    %790 = arith.addi %3, %c120_i32_372 : i32
    %c6_i32_373 = arith.constant 6 : i32
    %791 = arith.addi %790, %c6_i32_373 : i32
    %792 = arith.index_cast %791 : i32 to index
    %793 = memref.load %arg1[%792] : memref<384xi32, #tpu.memory_space<smem>>
    %794 = arith.index_cast %793 : i32 to index
    %c0_374 = arith.constant 0 : index
    %795 = vector.load %arg2[%794, %c0_374] : memref<256x128xf32, #tpu.memory_space<vmem>>, vector<1x128xf32>
    %c120_i32_375 = arith.constant 120 : i32
    %796 = arith.addi %3, %c120_i32_375 : i32
    %c7_i32_376 = arith.constant 7 : i32
    %797 = arith.addi %796, %c7_i32_376 : i32
    %798 = arith.index_cast %797 : i32 to index
    %799 = memref.load %arg1[%798] : memref<384xi32, #tpu.memory_space<smem>>
    %800 = arith.index_cast %799 : i32 to index
    %c0_377 = arith.constant 0 : index
    %801 = vector.load %arg2[%800, %c0_377] : memref<256x128xf32, #tpu.memory_space<vmem>>, vector<1x128xf32>
    %802 = tpu.concatenate %759, %765, %771, %777, %783, %789, %795, %801 in 0 : vector<1x128xf32>, vector<1x128xf32>, vector<1x128xf32>, vector<1x128xf32>, vector<1x128xf32>, vector<1x128xf32>, vector<1x128xf32>, vector<1x128xf32> -> vector<8x128xf32>
    %c120 = arith.constant 120 : index
    %c0_378 = arith.constant 0 : index
    %803 = vector.load %arg11[%c120, %c0_378] : memref<128x128xf32, #tpu.memory_space<vmem>>, vector<8x128xf32>
    tpu.vector_store %arg11[%c120, %c0_378], %802 {strides = array<i32>} : memref<128x128xf32, #tpu.memory_space<vmem>>, vector<8x128xf32>,
    %c0_379 = arith.constant 0 : index
    %c0_380 = arith.constant 0 : index
    %804 = vector.load %arg3[%c0_379, %c0_380] : memref<128x32xf32, #tpu.memory_space<vmem>>, vector<128x32xf32>
    %c0_381 = arith.constant 0 : index
    %c0_382 = arith.constant 0 : index
    %805 = vector.load %arg6[%c0_381, %c0_382] : memref<32x128xf32, #tpu.memory_space<vmem>>, vector<32x128xf32>
    %cst = arith.constant dense<0.000000e+00> : vector<128x128xf32>
    %806 = tpu.matmul %804, %805, %cst {dimension_numbers = #tpu.dot_dimension_numbers<[1], [0], [0], [1], [0, 0, 1, 1], [], []>} : vector<128x32xf32>, vector<32x128xf32>, vector<128x128xf32> -> vector<128x128xf32>
    %c0_383 = arith.constant 0 : index
    %c0_384 = arith.constant 0 : index
    %807 = vector.load %arg7[%c0_383, %c0_384] : memref<1x128xf32, #tpu.memory_space<vmem>>, vector<1x128xf32>
    %808 = vector.broadcast %807 : vector<1x128xf32> to vector<128x128xf32>
    %809 = arith.addf %806, %808 : vector<128x128xf32>
    %cst_385 = arith.constant 0.000000e+00 : f32
    %810 = vector.broadcast %cst_385 : f32 to vector<128x128xf32>
    %811 = arith.maximumf %809, %810 : vector<128x128xf32>
    %812 = math.absf %809 : vector<128x128xf32>
    %cst_386 = arith.constant 0.000000e+00 : f32
    %813 = vector.broadcast %cst_386 : f32 to vector<128x128xf32>
    %814 = arith.subf %813, %812 : vector<128x128xf32>
    %815 = math.exp %814 : vector<128x128xf32>
    %816 = math.log1p %815 : vector<128x128xf32>
    %817 = arith.addf %811, %816 : vector<128x128xf32>
    %cst_387 = arith.constant 0.693147182 : f32
    %818 = vector.broadcast %cst_387 : f32 to vector<128x128xf32>
    %819 = arith.subf %817, %818 : vector<128x128xf32>
    %c0_388 = arith.constant 0 : index
    %c0_389 = arith.constant 0 : index
    %820 = vector.load %arg4[%c0_388, %c0_389] : memref<128x1xf32, #tpu.memory_space<vmem>>, vector<128x1xf32>
    %821 = vector.broadcast %820 : vector<128x1xf32> to vector<128x128xf32>
    %822 = arith.mulf %819, %821 : vector<128x128xf32>
    %c0_390 = arith.constant 0 : index
    %c0_391 = arith.constant 0 : index
    %823 = vector.load %arg11[%c0_390, %c0_391] : memref<128x128xf32, #tpu.memory_space<vmem>>, vector<128x128xf32>
    %824 = arith.mulf %823, %822 : vector<128x128xf32>
    %c0_392 = arith.constant 0 : index
    %c0_393 = arith.constant 0 : index
    %825 = vector.load %arg5[%c0_392, %c0_393] : memref<1x128xi32, #tpu.memory_space<vmem>>, vector<1x128xi32>
    %826 = tpu.iota {dimensions = array<i32: 0>} : vector<128x128xi32>
    %c0_i32_394 = arith.constant 0 : i32
    %827 = vector.broadcast %c0_i32_394 : i32 to vector<128x128xi32>
    %828 = arith.addi %826, %827 : vector<128x128xi32>
    %829 = vector.broadcast %825 : vector<1x128xi32> to vector<128x128xi32>
    %830 = arith.cmpi eq, %829, %828 : vector<128x128xi32>
    %831 = arith.extui %830 : vector<128x128xi1> to vector<128x128xi32>
    %832 = arith.sitofp %831 : vector<128x128xi32> to vector<128x128xf32>
    %c0_395 = arith.constant 0 : index
    %c0_396 = arith.constant 0 : index
    %833 = vector.load %arg12[%c0_395, %c0_396] : memref<256x128xf32, #tpu.memory_space<vmem>>, vector<128x128xf32>
    %cst_397 = arith.constant dense<0.000000e+00> : vector<128x128xf32>
    %834 = tpu.matmul %832, %824, %cst_397 {dimension_numbers = #tpu.dot_dimension_numbers<[1], [0], [0], [1], [0, 0, 1, 1], [], []>} : vector<128x128xf32>, vector<128x128xf32>, vector<128x128xf32> -> vector<128x128xf32>
    %835 = arith.addf %833, %834 : vector<128x128xf32>
    %c0_398 = arith.constant 0 : index
    %c0_399 = arith.constant 0 : index
    %836 = vector.load %arg12[%c0_398, %c0_399] : memref<256x128xf32, #tpu.memory_space<vmem>>, vector<128x128xf32>
    tpu.vector_store %arg12[%c0_398, %c0_399], %835 {strides = array<i32>} : memref<256x128xf32, #tpu.memory_space<vmem>>, vector<128x128xf32>,
    %c128_i32_400 = arith.constant 128 : i32
    %837 = vector.broadcast %c128_i32_400 : i32 to vector<128x128xi32>
    %838 = arith.addi %826, %837 : vector<128x128xi32>
    %839 = vector.broadcast %825 : vector<1x128xi32> to vector<128x128xi32>
    %840 = arith.cmpi eq, %839, %838 : vector<128x128xi32>
    %841 = arith.extui %840 : vector<128x128xi1> to vector<128x128xi32>
    %842 = arith.sitofp %841 : vector<128x128xi32> to vector<128x128xf32>
    %c128 = arith.constant 128 : index
    %c0_401 = arith.constant 0 : index
    %843 = vector.load %arg12[%c128, %c0_401] : memref<256x128xf32, #tpu.memory_space<vmem>>, vector<128x128xf32>
    %cst_402 = arith.constant dense<0.000000e+00> : vector<128x128xf32>
    %844 = tpu.matmul %842, %824, %cst_402 {dimension_numbers = #tpu.dot_dimension_numbers<[1], [0], [0], [1], [0, 0, 1, 1], [], []>} : vector<128x128xf32>, vector<128x128xf32>, vector<128x128xf32> -> vector<128x128xf32>
    %845 = arith.addf %843, %844 : vector<128x128xf32>
    %c128_403 = arith.constant 128 : index
    %c0_404 = arith.constant 0 : index
    %846 = vector.load %arg12[%c128_403, %c0_404] : memref<256x128xf32, #tpu.memory_space<vmem>>, vector<128x128xf32>
    tpu.vector_store %arg12[%c128_403, %c0_404], %845 {strides = array<i32>} : memref<256x128xf32, #tpu.memory_space<vmem>>, vector<128x128xf32>,
    %c2_i32_405 = arith.constant 2 : i32
    %847 = arith.cmpi eq, %arg0, %c2_i32_405 : i32
    %848 = arith.extui %847 : i1 to i32
    %c0_i32_406 = arith.constant 0 : i32
    %849 = arith.cmpi ne, %848, %c0_i32_406 : i32
    scf.if %849 {
      %c0_407 = arith.constant 0 : index
      %c0_408 = arith.constant 0 : index
      %850 = vector.load %arg12[%c0_407, %c0_408] : memref<256x128xf32, #tpu.memory_space<vmem>>, vector<128x128xf32>
      %c0_409 = arith.constant 0 : index
      %c0_410 = arith.constant 0 : index
      %851 = vector.load %arg8[%c0_409, %c0_410] : memref<128x128xf32, #tpu.memory_space<vmem>>, vector<128x128xf32>
      %cst_411 = arith.constant dense<0.000000e+00> : vector<128x128xf32>
      %852 = tpu.matmul %850, %851, %cst_411 {dimension_numbers = #tpu.dot_dimension_numbers<[1], [0], [0], [1], [0, 0, 1, 1], [], []>} : vector<128x128xf32>, vector<128x128xf32>, vector<128x128xf32> -> vector<128x128xf32>
      %c0_412 = arith.constant 0 : index
      %c0_413 = arith.constant 0 : index
      %853 = vector.load %arg9[%c0_412, %c0_413] : memref<1x128xf32, #tpu.memory_space<vmem>>, vector<1x128xf32>
      %854 = vector.broadcast %853 : vector<1x128xf32> to vector<128x128xf32>
      %855 = arith.addf %852, %854 : vector<128x128xf32>
      %cst_414 = arith.constant 0.000000e+00 : f32
      %856 = vector.broadcast %cst_414 : f32 to vector<128x128xf32>
      %857 = arith.maximumf %855, %856 : vector<128x128xf32>
      %858 = math.absf %855 : vector<128x128xf32>
      %cst_415 = arith.constant 0.000000e+00 : f32
      %859 = vector.broadcast %cst_415 : f32 to vector<128x128xf32>
      %860 = arith.subf %859, %858 : vector<128x128xf32>
      %861 = math.exp %860 : vector<128x128xf32>
      %862 = math.log1p %861 : vector<128x128xf32>
      %863 = arith.addf %857, %862 : vector<128x128xf32>
      %cst_416 = arith.constant 0.693147182 : f32
      %864 = vector.broadcast %cst_416 : f32 to vector<128x128xf32>
      %865 = arith.subf %863, %864 : vector<128x128xf32>
      %c0_417 = arith.constant 0 : index
      %c0_418 = arith.constant 0 : index
      %866 = vector.load %arg10[%c0_417, %c0_418] : memref<256x128xf32, #tpu.memory_space<vmem>>, vector<128x128xf32>
      tpu.vector_store %arg10[%c0_417, %c0_418], %865 {strides = array<i32>} : memref<256x128xf32, #tpu.memory_space<vmem>>, vector<128x128xf32>,
      %c128_419 = arith.constant 128 : index
      %c0_420 = arith.constant 0 : index
      %867 = vector.load %arg12[%c128_419, %c0_420] : memref<256x128xf32, #tpu.memory_space<vmem>>, vector<128x128xf32>
      %c0_421 = arith.constant 0 : index
      %c0_422 = arith.constant 0 : index
      %868 = vector.load %arg8[%c0_421, %c0_422] : memref<128x128xf32, #tpu.memory_space<vmem>>, vector<128x128xf32>
      %cst_423 = arith.constant dense<0.000000e+00> : vector<128x128xf32>
      %869 = tpu.matmul %867, %868, %cst_423 {dimension_numbers = #tpu.dot_dimension_numbers<[1], [0], [0], [1], [0, 0, 1, 1], [], []>} : vector<128x128xf32>, vector<128x128xf32>, vector<128x128xf32> -> vector<128x128xf32>
      %c0_424 = arith.constant 0 : index
      %c0_425 = arith.constant 0 : index
      %870 = vector.load %arg9[%c0_424, %c0_425] : memref<1x128xf32, #tpu.memory_space<vmem>>, vector<1x128xf32>
      %871 = vector.broadcast %870 : vector<1x128xf32> to vector<128x128xf32>
      %872 = arith.addf %869, %871 : vector<128x128xf32>
      %cst_426 = arith.constant 0.000000e+00 : f32
      %873 = vector.broadcast %cst_426 : f32 to vector<128x128xf32>
      %874 = arith.maximumf %872, %873 : vector<128x128xf32>
      %875 = math.absf %872 : vector<128x128xf32>
      %cst_427 = arith.constant 0.000000e+00 : f32
      %876 = vector.broadcast %cst_427 : f32 to vector<128x128xf32>
      %877 = arith.subf %876, %875 : vector<128x128xf32>
      %878 = math.exp %877 : vector<128x128xf32>
      %879 = math.log1p %878 : vector<128x128xf32>
      %880 = arith.addf %874, %879 : vector<128x128xf32>
      %cst_428 = arith.constant 0.693147182 : f32
      %881 = vector.broadcast %cst_428 : f32 to vector<128x128xf32>
      %882 = arith.subf %880, %881 : vector<128x128xf32>
      %c128_429 = arith.constant 128 : index
      %c0_430 = arith.constant 0 : index
      %883 = vector.load %arg10[%c128_429, %c0_430] : memref<256x128xf32, #tpu.memory_space<vmem>>, vector<128x128xf32>
      tpu.vector_store %arg10[%c128_429, %c0_430], %882 {strides = array<i32>} : memref<256x128xf32, #tpu.memory_space<vmem>>, vector<128x128xf32>,
    } else {
    }
    return
  }
  func.func @transform_0(%arg0: i32, %arg1: memref<384xi32, #tpu.memory_space<smem>>) -> (i32, i32) {
    %c0_i32 = arith.constant 0 : i32
    %c0_i32_0 = arith.constant 0 : i32
    %c0_i32_1 = arith.constant 0 : i32
    return %c0_i32, %c0_i32_0 : i32, i32
  }
  func.func @transform_1(%arg0: i32, %arg1: memref<384xi32, #tpu.memory_space<smem>>) -> (i32, i32) {
    %c0_i32 = arith.constant 0 : i32
    %c0_i32_0 = arith.constant 0 : i32
    return %arg0, %c0_i32 : i32, i32
  }
  func.func @transform_2(%arg0: i32, %arg1: memref<384xi32, #tpu.memory_space<smem>>) -> (i32, i32) {
    %c0_i32 = arith.constant 0 : i32
    %c0_i32_0 = arith.constant 0 : i32
    return %arg0, %c0_i32 : i32, i32
  }
  func.func @transform_3(%arg0: i32, %arg1: memref<384xi32, #tpu.memory_space<smem>>) -> (i32, i32) {
    %c0_i32 = arith.constant 0 : i32
    %c0_i32_0 = arith.constant 0 : i32
    return %c0_i32, %arg0 : i32, i32
  }
  func.func @transform_4(%arg0: i32, %arg1: memref<384xi32, #tpu.memory_space<smem>>) -> (i32, i32) {
    %c0_i32 = arith.constant 0 : i32
    %c0_i32_0 = arith.constant 0 : i32
    %c0_i32_1 = arith.constant 0 : i32
    return %c0_i32, %c0_i32_0 : i32, i32
  }
  func.func @transform_5(%arg0: i32, %arg1: memref<384xi32, #tpu.memory_space<smem>>) -> (i32, i32) {
    %c0_i32 = arith.constant 0 : i32
    %c0_i32_0 = arith.constant 0 : i32
    %c0_i32_1 = arith.constant 0 : i32
    return %c0_i32, %c0_i32_0 : i32, i32
  }
  func.func @transform_6(%arg0: i32, %arg1: memref<384xi32, #tpu.memory_space<smem>>) -> (i32, i32) {
    %c0_i32 = arith.constant 0 : i32
    %c0_i32_0 = arith.constant 0 : i32
    %c0_i32_1 = arith.constant 0 : i32
    return %c0_i32, %c0_i32_0 : i32, i32
  }
  func.func @transform_7(%arg0: i32, %arg1: memref<384xi32, #tpu.memory_space<smem>>) -> (i32, i32) {
    %c0_i32 = arith.constant 0 : i32
    %c0_i32_0 = arith.constant 0 : i32
    %c0_i32_1 = arith.constant 0 : i32
    return %c0_i32, %c0_i32_0 : i32, i32
  }
  func.func @transform_8(%arg0: i32, %arg1: memref<384xi32, #tpu.memory_space<smem>>) -> (i32, i32) {
    %c0_i32 = arith.constant 0 : i32
    %c0_i32_0 = arith.constant 0 : i32
    %c0_i32_1 = arith.constant 0 : i32
    return %c0_i32, %c0_i32_0 : i32, i32
  }
}

</mosaic_0001>

<bundles_post_ra>
// kernel: tpu_custom_call.1
= control target key start
LH: loop header
LB: loop body
LE: loop exit
PB: predicated region body
PF: predicated region fallthrough
CT: control target
= control target key end

     0   :  { %s7476_s0 = inlined_call_operand.vmem [shape: s32[384], index: 0, kind: input, shape index: {}]   ;;  %s7477_s1 = inlined_call_operand.vmem [shape: f32[256,128], index: 1, kind: input, shape index: {}]   ;;  %s7478_s2 = inlined_call_operand.vmem [shape: f32[384,32], index: 2, kind: input, shape index: {}]   ;;  %s7479_s3 = inlined_call_operand.vmem [shape: f32[384,1], index: 3, kind: input, shape index: {}]   ;;  %s7480_s4 = inlined_call_operand.vmem [shape: s32[1,384], index: 4, kind: input, shape index: {}]   ;;  %s7481_s5 = inlined_call_operand.vmem [shape: f32[32,128], index: 5, kind: input, shape index: {}]   ;;  %s7482_s6 = inlined_call_operand.vmem [shape: f32[1,128], index: 6, kind: input, shape index: {}]   ;;  %s7483_s7 = inlined_call_operand.vmem [shape: f32[128,128], index: 7, kind: input, shape index: {}]   ;;  %s7484_s8 = inlined_call_operand.vmem [shape: f32[1,128], index: 8, kind: input, shape index: {}]   ;;  %s7485_s9 = inlined_call_operand.hbm [shape: f32[256,128], index: 9, kind: output, shape index: {}]  }
   0x1   :  { %7546 = sst [smem:[#allocation63_spill]] %s7478_s2  ;;  %s14_s11 = sshll.u32 %s7476_s0, 4  ;;  %s15_s11 = int_to_ptr.vmem [resolvable:$true] %s14_s11 }
   0x2   :  { %7547 = sst [smem:[#allocation64_spill]] %s7479_s3  ;;  %s4530_s12 = scalar_lea.vmem %s15_s11, 48 }
   0x3   :  { %7548 = sst [smem:[#allocation65_spill]] %s7480_s4  ;;  %p4531_p0 = scmp.ne.s32.totalorder %s15_s11, %s4530_s12 }
   0x4   :  { %7549 = sst [smem:[#allocation66_spill]] %s7481_s5  ;;  %s4534_s13 = scalar_lea.vmem %s15_s11, 64 }
   0x5   :  { %7550 = sst [smem:[#allocation67_spill]] %s7482_s6  ;;  %p4535_p1 = scmp.lt.s32.totalorder %s15_s11, %s15_s11 }
   0x6   :  { %7551 = sst [smem:[#allocation68_spill]] %s7483_s7  ;;  %p4536_p2 = scmp.lt.s32.totalorder %s4534_s13, %s4530_s12 }
   0x7   :  { %7552 = sst [smem:[#allocation69_spill]] %s7484_s8 }
   0x8   :  { %7553 = sst [smem:[#allocation70_spill]] %s7485_s9  ;;  %p4537_p3 = por %p4536_p2, %p4535_p1 }
   0xa   :  { %p4538_p4 = pnand %p4537_p3, %p4531_p0 }
   0xc   :  { %4541 = shalt.err (!%p4538_p4)  }
   0xd   :  { %s4582_s14 = smov [#allocation5]  }
   0xe   :  { %17 = dma.vmem_to_smem %s15_s11, 48, %s4582_s14, [#allocation4] }
   0xf   :  { %4572 = dma.done.wait [#allocation4], 48 }
  0x10   :  { %4573 = vsyncadd [#allocation4], 4294967248 }
  0x11   :  { %19 = sfence }
  0x12   :  { %20 = vsyncpa [#allocation7], 0  ;;  %s4642_s15 = smov 0  }
  0x13 LB: > { %7554 = sst [smem:[#allocation10_spill]] %s4580_s15  ;;  %s4648_s0 = sadd.s32 4294967295, %s4580_s15   ;;  %s4580_s15 = sphi %s4642_s15, %s26_s15  }
  0x14   : > { %7555 = sst [smem:[#allocation11_spill]] %s4648_s0  ;;  %p3613_p5 = scmp.ge.s32.totalorder %s4580_s15, 1 }
  0x15   : > { %p285_p6 = scmp.lt.s32.totalorder %s4580_s15, 4 }
  0x17   : > { %p286_p7 = pnand %p3613_p5, %p285_p6 }
  0x19   : > { %289 = sbr.rel (%p286_p7) target bundleno = 1102 (0x44e), region = 52 }
  0x20   : > { %s3614_s16 = sshll.u32 %s4648_s0, 4  ;;  %p334_p8 = scmp.lt.s32.totalorder %s4648_s0, 2 }
  0x21   : > { %p323_p9 = scmp.lt.s32.totalorder %s3614_s16, 47  ;;  %s7556_s4 = sld [smem:[#allocation65_spill]] }
  0x22   : > { %s335_s17 = scalar_select %p334_p8, %s4648_s0, 2 }
  0x23   : > { %s7853_s16 = smov (!%p323_p9, %s3614_s16), 47  ;;  %s7558_s2 = sld [smem:[#allocation63_spill]] }
  0x24   : > { %s3615_s21 = sshll.u32 %s7853_s16, 3  ;;  %s7559_s3 = sld [smem:[#allocation64_spill]] }
  0x25   : > { %p3618_p10 = scmp.ne.s32.totalorder %s4648_s0, 0 }
  0x26   : > { %v4583_v0 = vmov (!%p3618_p10), 0.0  }
  0x27   : > { %s4658_s20 = scalar_lea.vmem %s7556_s4, %s335_s17  ;;  %340 = sbr.rel (%p3618_p10) target bundleno = 55 (0x37), region = 56  ;;  %341 = vst [vmem:[#allocation3] sm:$0xff] (!%p3618_p10), %v4583_v0  ;;  %342 = vst [vmem:[#allocation3 + $0x8] sm:$0xff] (!%p3618_p10), %v4583_v0 }
  0x28   : > { %7557 = sst [smem:[#allocation12_spill]] %s4658_s20  ;;  %343 = vst [vmem:[#allocation3 + $0x10] sm:$0xff] (!%p3618_p10), %v4583_v0  ;;  %344 = vst [vmem:[#allocation3 + $0x18] sm:$0xff] (!%p3618_p10), %v4583_v0 }
  0x29   : > { %s4663_s24 = scalar_lea.vmem %s7558_s2, %s3615_s21  ;;  %345 = vst [vmem:[#allocation3 + $0x20] sm:$0xff] (!%p3618_p10), %v4583_v0  ;;  %346 = vst [vmem:[#allocation3 + $0x28] sm:$0xff] (!%p3618_p10), %v4583_v0 }
  0x2a   : > { %s4668_s27 = scalar_lea.vmem %s7559_s3, %s3615_s21  ;;  %347 = vst [vmem:[#allocation3 + $0x30] sm:$0xff] (!%p3618_p10), %v4583_v0  ;;  %348 = vst [vmem:[#allocation3 + $0x38] sm:$0xff] (!%p3618_p10), %v4583_v0 }
  0x2b   : > { %349 = vst [vmem:[#allocation3 + $0x40] sm:$0xff] (!%p3618_p10), %v4583_v0  ;;  %350 = vst [vmem:[#allocation3 + $0x48] sm:$0xff] (!%p3618_p10), %v4583_v0 }
  0x2c   : > { %351 = vst [vmem:[#allocation3 + $0x50] sm:$0xff] (!%p3618_p10), %v4583_v0  ;;  %352 = vst [vmem:[#allocation3 + $0x58] sm:$0xff] (!%p3618_p10), %v4583_v0 }
  0x2d   : > { %353 = vst [vmem:[#allocation3 + $0x60] sm:$0xff] (!%p3618_p10), %v4583_v0  ;;  %354 = vst [vmem:[#allocation3 + $0x68] sm:$0xff] (!%p3618_p10), %v4583_v0 }
  0x2e   : > { %355 = vst [vmem:[#allocation3 + $0x70] sm:$0xff] %v4583_v0  ;;  %356 = vst [vmem:[#allocation3 + $0x78] sm:$0xff] %v4583_v0 }
  0x2f   : > { %357 = vst [vmem:[#allocation3 + $0x80] sm:$0xff] %v4583_v0  ;;  %358 = vst [vmem:[#allocation3 + $0x88] sm:$0xff] %v4583_v0 }
  0x30   : > { %359 = vst [vmem:[#allocation3 + $0x90] sm:$0xff] %v4583_v0  ;;  %360 = vst [vmem:[#allocation3 + $0x98] sm:$0xff] %v4583_v0 }
  0x31   : > { %361 = vst [vmem:[#allocation3 + $0xa0] sm:$0xff] %v4583_v0  ;;  %362 = vst [vmem:[#allocation3 + $0xa8] sm:$0xff] %v4583_v0 }
  0x32   : > { %363 = vst [vmem:[#allocation3 + $0xb0] sm:$0xff] %v4583_v0  ;;  %364 = vst [vmem:[#allocation3 + $0xb8] sm:$0xff] %v4583_v0 }
  0x33   : > { %365 = vst [vmem:[#allocation3 + $0xc0] sm:$0xff] %v4583_v0  ;;  %366 = vst [vmem:[#allocation3 + $0xc8] sm:$0xff] %v4583_v0 }
  0x34   : > { %367 = vst [vmem:[#allocation3 + $0xd0] sm:$0xff] %v4583_v0  ;;  %368 = vst [vmem:[#allocation3 + $0xd8] sm:$0xff] %v4583_v0 }
  0x35   : > { %369 = vst [vmem:[#allocation3 + $0xe0] sm:$0xff] %v4583_v0  ;;  %370 = vst [vmem:[#allocation3 + $0xe8] sm:$0xff] %v4583_v0 }
  0x36   : > { %371 = vst [vmem:[#allocation3 + $0xf0] sm:$0xff] %v4583_v0  ;;  %372 = vst [vmem:[#allocation3 + $0xf8] sm:$0xff] %v4583_v0 }
  0x37 PF: > { %s7560_s5 = sld [smem:[#allocation66_spill]]  ;;  %vm1383_vm0 = vcmask 261120   ;;  %v1356_v6 = vld [vmem:[%s4663_s24] sm:$0xff]  ;;  %v4584_v7 = vmov 0   ;;  %v1835_v10 = vld [vmem:[%s4668_s27 + $0x10] sm:$0xff]  ;;  %v1357_v11 = vld [vmem:[%s4663_s24 + $0x8] sm:$0xff] }
  0x38   : > { %4334 = vset.pattern.permute.xlu0 %v4584_v7  ;;  %4335 = vset.pattern.permute.xlu1 %v4584_v7  ;;  %v1833_v9 = vld [vmem:[%s4668_s27] sm:$0xff]  ;;  %v1834_v12 = vld [vmem:[%s4668_s27 + $0x8] sm:$0xff]  ;;  %v1358_v13 = vld [vmem:[%s4663_s24 + $0x10] sm:$0xff]  ;;  %s4732_s16 = sshll.u32 %s4648_s0, 7  ;;  %vm426_vm1 = vcmask 1040384   ;;  %vm428_vm2 = vcmask 1041408  }
  0x39   : > { %3913 = vmatprep.mubr.msk.f32.mxu0 %vm1383_vm0, %v1356_v6  ;;  %1851 = vperm.xlu0 %4334, %v1833_v9   ;;  %v1836_v14 = vld [vmem:[%s4668_s27 + $0x18] sm:$0xff]  ;;  %v1837_v16 = vld [vmem:[%s4668_s27 + $0x20] sm:$0xff]  ;;  %v1838_v18 = vld [vmem:[%s4668_s27 + $0x28] sm:$0xff]  ;;  %s377_s17 = sadd.s32 1, %s4732_s16  ;;  %s4736_s18 = sld [smem:[#allocation5 + %s4732_s16]]  ;;  %vm430_vm3 = vcmask 1042432  }
  0x3a   : > { %1861 = vperm.xlu1 %4335, %v1835_v10   ;;  %v1359_v15 = vld [vmem:[%s4663_s24 + $0x18] sm:$0xff]  ;;  %v1360_v17 = vld [vmem:[%s4663_s24 + $0x20] sm:$0xff]  ;;  %v1361_v19 = vld [vmem:[%s4663_s24 + $0x28] sm:$0xff]  ;;  %s381_s19 = sadd.s32 2, %s4732_s16  ;;  %s4739_s21 = sld [smem:[#allocation5 + %s377_s17]]  ;;  %vm432_vm4 = vcmask 1043456  }
  0x3b   : > { %v1839_v20 = vld [vmem:[%s4668_s27 + $0x30] sm:$0xff]  ;;  %v1840_v22 = vld [vmem:[%s4668_s27 + $0x38] sm:$0xff]  ;;  %v1841_v24 = vld [vmem:[%s4668_s27 + $0x40] sm:$0xff]  ;;  %s385_s22 = sadd.s32 3, %s4732_s16  ;;  %s4742_s23 = sld [smem:[#allocation5 + %s381_s19]]  ;;  %vm434_vm5 = vcmask 1044480  }
  0x3c   : > { %v1362_v21 = vld [vmem:[%s4663_s24 + $0x30] sm:$0xff]  ;;  %v1363_v23 = vld [vmem:[%s4663_s24 + $0x38] sm:$0xff]  ;;  %v1364_v25 = vld [vmem:[%s4663_s24 + $0x40] sm:$0xff]  ;;  %s4745_s25 = sld [smem:[#allocation5 + %s385_s22]]  ;;  %s393_s26 = sadd.s32 5, %s4732_s16  ;;  %vm436_vm6 = vcmask 1045504  }
  0x3d   : > { %v1372_v1 = vld [vmem:[%s7560_s5] sm:$0xff]  ;;  %v1373_v2 = vld [vmem:[%s7560_s5 + $0x8] sm:$0xff]  ;;  %v1374_v3 = vld [vmem:[%s7560_s5 + $0x10] sm:$0xff]  ;;  %1856 = vperm.xlu0 %4334, %v1834_v12   ;;  %s4750_s28 = sld [smem:[#allocation5 + %s393_s26]]  ;;  %s397_s29 = sadd.s32 6, %s4732_s16  ;;  %vm438_vm7 = vcmask 1046528  }
  0x3e   : > { %v4161_v4 = vpack.c.bf16 %v1373_v2, %v1372_v1  ;;  %v1375_v5 = vld [vmem:[%s7560_s5 + $0x18] sm:$0xff]  ;;  %1866 = vperm.xlu1 %4335, %v1836_v14   ;;  %v1842_v26 = vld [vmem:[%s4668_s27 + $0x48] sm:$0xff]  ;;  %v1843_v28 = vld [vmem:[%s4668_s27 + $0x50] sm:$0xff]  ;;  %s401_s12 = sadd.s32 7, %s4732_s16  ;;  %s4758_s13 = sld [smem:[#allocation5 + %s397_s29]] }
  0x3f   : > { %v4165_v8 = vpack.c.bf16 %v1375_v5, %v1374_v3  ;;  %v1365_v27 = vld [vmem:[%s4663_s24 + $0x48] sm:$0xff]  ;;  %v1366_v29 = vld [vmem:[%s4663_s24 + $0x50] sm:$0xff]  ;;  %v1844_v30 = vld [vmem:[%s4668_s27 + $0x58] sm:$0xff]  ;;  %7561 = sst [smem:[#allocation13_spill]] %s4736_s18  ;;  %s445_s14 = sadd.s32 9, %s4732_s16 }
  0x40   : > { %4162 = vmatprep.subr.bf16.mxu0 %v4161_v4  ;;  %v1367_v31 = vld [vmem:[%s4663_s24 + $0x58] sm:$0xff]  ;;  %v1845_v32 = vld [vmem:[%s4668_s27 + $0x60] sm:$0xff]  ;;  %v1846_v34 = vld [vmem:[%s4668_s27 + $0x68] sm:$0xff]  ;;  %s4773_s30 = sld [smem:[#allocation5 + %s401_s12]]  ;;  %s506_s26 = sadd.s32 17, %s4732_s16 }
  0x41   : > { %4164 = vmatpush3.bf16.msra.mxu0 %v4161_v4  ;;  %1871 = vperm.xlu0 %4334, %v1837_v16   ;;  %v1368_v33 = vld [vmem:[%s4663_s24 + $0x60] sm:$0xff]  ;;  %v1369_v35 = vld [vmem:[%s4663_s24 + $0x68] sm:$0xff]  ;;  %v1847_v36 = vld [vmem:[%s4668_s27 + $0x70] sm:$0xff]  ;;  %s4779_s15 = sld [smem:[#allocation5 + %s445_s14]]  ;;  %s510_s3 = sadd.s32 18, %s4732_s16 }
  0x42   : > { %4166 = vmatprep.subr.bf16.mxu0 %v4165_v8  ;;  %1876 = vperm.xlu1 %4335, %v1838_v18   ;;  %v1370_v37 = vld [vmem:[%s4663_s24 + $0x70] sm:$0xff]  ;;  %v1848_v38 = vld [vmem:[%s4668_s27 + $0x78] sm:$0xff]  ;;  %s441_s4 = sadd.s32 8, %s4732_s16  ;;  %s502_s12 = sadd.s32 16, %s4732_s16 }
  0x43   : > { %v1371_v39 = vld [vmem:[%s4663_s24 + $0x78] sm:$0xff]  ;;  %s389_s24 = sadd.s32 4, %s4732_s16  ;;  %7563 = sst [smem:[#allocation15_spill]] %s4750_s28 }
  0x44   : > { %s4748_s27 = sld [smem:[#allocation5 + %s389_s24]]  ;;  %s514_s14 = sadd.s32 19, %s4732_s16 }
  0x45   : > { %4168 = vmatpush3.bf16.msra.mxu0 %v4165_v8  ;;  %1881 = vperm.xlu0 %4334, %v1839_v20   ;;  %7564 = sst [smem:[#allocation16_spill]] %s4758_s13  ;;  %s518_s17 = sadd.s32 20, %s4732_s16 }
  0x46   : > { %1886 = vperm.xlu1 %4335, %v1840_v22   ;;  %s4789_s5 = sld [smem:[#allocation5 + %s506_s26]]  ;;  %s449_s9 = sadd.s32 10, %s4732_s16 }
  0x47   : > { %7565 = sst [smem:[#allocation17_spill]] %s4779_s15  ;;  %s453_s8 = sadd.s32 11, %s4732_s16 }
  0x48   : > { %3914 = vmatmul.mubr.msk.f32.vlgmr.msra.gmra.mrb[0].mxu0 %vm1383_vm0, %v1357_v11  ;;  %s4791_s10 = sld [smem:[#allocation5 + %s510_s3]]  ;;  %s522_s3 = sadd.s32 21, %s4732_s16 }
  0x49   : > { %3916 = vmatprep.mubr.msk.f32.mxu0 %vm1383_vm0, %v1358_v13  ;;  %1891 = vperm.xlu0 %4334, %v1841_v24   ;;  %s4794_s29 = sld [smem:[#allocation5 + %s502_s12]]  ;;  %s526_s12 = sadd.s32 22, %s4732_s16 }
  0x4a   : > { %1896 = vperm.xlu1 %4335, %v1842_v26   ;;  %7562 = sst [smem:[#allocation14_spill]] %s4748_s27  ;;  %s530_s0 = sadd.s32 23, %s4732_s16 }
  0x4b   : > { %s4797_s19 = sld [smem:[#allocation5 + %s514_s14]]  ;;  %s457_s27 = sadd.s32 12, %s4732_s16 }
  0x4c   : > { %3917 = vmatmul.mubr.msk.f32.gmra.mrb[2].mxu0 %vm1383_vm0, %v1359_v15  ;;  %7566 = sst [smem:[#allocation18_spill]] %s4789_s5  ;;  %s469_s2 = sadd.s32 15, %s4732_s16 }
  0x4d   : > { %3919 = vmatprep.mubr.msk.f32.mxu0 %vm1383_vm0, %v1360_v17  ;;  %1901 = vperm.xlu0 %4334, %v1843_v28   ;;  %s4799_s24 = sld [smem:[#allocation5 + %s441_s4]]  ;;  %s465_s4 = sadd.s32 14, %s4732_s16 }
  0x4e   : > { %1906 = vperm.xlu1 %4335, %v1844_v30   ;;  %7567 = sst [smem:[#allocation19_spill]] %s4791_s10  ;;  %s575_s5 = sadd.s32 27, %s4732_s16 }
  0x4f   : > { %7568 = sst [smem:[#allocation20_spill]] %s4794_s29  ;;  %s636_s10 = sadd.s32 35, %s4732_s16 }
  0x50   : > { %3920 = vmatmul.mubr.msk.f32.gmra.mrb[4].mxu0 %vm1383_vm0, %v1361_v19  ;;  %s4805_s22 = sld [smem:[#allocation5 + %s518_s17]]  ;;  %s571_s17 = sadd.s32 26, %s4732_s16 }
  0x51   : > { %3922 = vmatprep.mubr.msk.f32.mxu0 %vm1383_vm0, %v1362_v21  ;;  %1911 = vperm.xlu0 %4334, %v1845_v32   ;;  %7569 = sst [smem:[#allocation21_spill]] %s4797_s19  ;;  %s640_s20 = sadd.s32 36, %s4732_s16 }
  0x52   : > { %1916 = vperm.xlu1 %4335, %v1846_v34   ;;  %s4820_s11 = sld [smem:[#allocation5 + %s522_s3]]  ;;  %s628_s3 = sadd.s32 33, %s4732_s16 }
  0x53   : > { %7570 = sst [smem:[#allocation22_spill]] %s4799_s24 }
  0x54   : > { %3923 = vmatmul.mubr.msk.f32.gmra.mrb[6].mxu0 %vm1383_vm0, %v1363_v23  ;;  %s4826_s13 = sld [smem:[#allocation5 + %s526_s12]] }
  0x55   : > { %3925 = vmatprep.mubr.msk.f32.mxu0 %vm1383_vm0, %v1364_v25  ;;  %1921 = vperm.xlu0 %4334, %v1847_v36   ;;  %s4832_s14 = sld [smem:[#allocation5 + %s530_s0]]  ;;  %s461_s0 = sadd.s32 13, %s4732_s16 }
  0x56   : > { %1926 = vperm.xlu1 %4335, %v1848_v38   ;;  %7571 = sst [smem:[#allocation23_spill]] %s4805_s22  ;;  %s632_s22 = sadd.s32 34, %s4732_s16 }
  0x57   : > { %s4847_s28 = sld [smem:[#allocation5 + %s449_s9]] }
  0x58   : > { %3926 = vmatmul.mubr.msk.f32.gmra.mrb[8].mxu0 %vm1383_vm0, %v1365_v27  ;;  %7572 = sst [smem:[#allocation24_spill]] %s4820_s11  ;;  %s685_s11 = sadd.s32 40, %s4732_s16 }
  0x59   : > { %3928 = vmatprep.mubr.msk.f32.mxu0 %vm1383_vm0, %v1366_v29  ;;  %s4850_s7 = sld [smem:[#allocation5 + %s453_s8]]  ;;  %s563_s8 = sadd.s32 24, %s4732_s16 }
  0x5a   : > { %7573 = sst [smem:[#allocation25_spill]] %s4826_s13  ;;  %s652_s13 = sadd.s32 39, %s4732_s16 }
  0x5b   : > { %7574 = sst [smem:[#allocation26_spill]] %s4832_s14 }
  0x5c   : > { %3929 = vmatmul.mubr.msk.f32.gmra.mrb[10].mxu0 %vm1383_vm0, %v1367_v31  ;;  %s4853_s6 = sld [smem:[#allocation5 + %s457_s27]]  ;;  %s567_s27 = sadd.s32 25, %s4732_s16 }
  0x5d   : > { %3931 = vmatprep.mubr.msk.f32.mxu0 %vm1383_vm0, %v1368_v33  ;;  %7575 = sst [smem:[#allocation27_spill]] %s4847_s28  ;;  %s754_s28 = sadd.s32 50, %s4732_s16 }
  0x5e   : > { %s4860_s12 = sld [smem:[#allocation5 + %s461_s0]]  ;;  %s624_s0 = sadd.s32 32, %s4732_s16 }
  0x5f   : > { %7576 = sst [smem:[#allocation28_spill]] %s4850_s7  ;;  %s591_s7 = sadd.s32 31, %s4732_s16 }
  0x60   : > { %3932 = vmatmul.mubr.msk.f32.gmra.mrb[12].mxu0 %vm1383_vm0, %v1369_v35  ;;  %s4862_s9 = sld [smem:[#allocation5 + %s465_s4]] }
  0x61   : > { %3934 = vmatprep.mubr.msk.f32.mxu0 %vm1383_vm0, %v1370_v37  ;;  %s4865_s18 = sld [smem:[#allocation5 + %s469_s2]] }
  0x62   : > { %7577 = sst [smem:[#allocation29_spill]] %s4853_s6 }
  0x63   : > { %s4872_s26 = sld [smem:[#allocation5 + %s563_s8]]  ;;  %s579_s8 = sadd.s32 28, %s4732_s16 }
  0x64   : > { %3935 = vmatmul.mubr.msk.f32.gmra.mrb[14].mxu0 %vm1383_vm0, %v1371_v39  ;;  %7578 = sst [smem:[#allocation30_spill]] %s4860_s12  ;;  %s587_s12 = sadd.s32 30, %s4732_s16 }
  0x65   : > { %s4883_s19 = sld [smem:[#allocation5 + %s567_s27]] }
  0x66   : > { %7579 = sst [smem:[#allocation31_spill]] %s4862_s9 }
  0x67   : > { %7580 = sst [smem:[#allocation32_spill]] %s4865_s18 }
  0x68   : > { %s4897_s15 = sld [smem:[#allocation5 + %s571_s17]]  ;;  %s583_s17 = sadd.s32 29, %s4732_s16 }
  0x69   : > { %7581 = sst [smem:[#allocation33_spill]] %s4872_s26 }
  0x6a   : > { %s4918_s27 = sld [smem:[#allocation5 + %s575_s5]] }
  0x6b   : > { %7582 = sst [smem:[#allocation34_spill]] %s4883_s19  ;;  %s689_s19 = sadd.s32 41, %s4732_s16 }
  0x6c   : > { %s4920_s2 = sld [smem:[#allocation5 + %s579_s8]] }
  0x6d   : > { %s4927_s9 = sld [smem:[#allocation5 + %s583_s17]] }
  0x6e   : > { %7583 = sst [smem:[#allocation35_spill]] %s4897_s15  ;;  %s713_s15 = sadd.s32 47, %s4732_s16 }
  0x6f   : > { %s4935_s8 = sld [smem:[#allocation5 + %s587_s12]] }
  0x70   : > { %7584 = sst [smem:[#allocation36_spill]] %s4918_s27 }
  0x71   : > { %s4939_s24 = sld [smem:[#allocation5 + %s591_s7]]  ;;  %s644_s7 = sadd.s32 37, %s4732_s16 }
  0x72   : > { %7585 = sst [smem:[#allocation37_spill]] %s4920_s2 }
  0x73   : > { %7586 = sst [smem:[#allocation38_spill]] %s4927_s9  ;;  %s7616_s9 = sld [smem:[#allocation18_spill]] }
  0x74   : > { %s4941_s17 = sld [smem:[#allocation5 + %s624_s0]]  ;;  %s648_s0 = sadd.s32 38, %s4732_s16 }
  0x75   : > { %7587 = sst [smem:[#allocation39_spill]] %s4935_s8  ;;  %s705_s8 = sadd.s32 45, %s4732_s16 }
  0x76   : > { %s4945_s26 = sld [smem:[#allocation5 + %s628_s3]]  ;;  %s697_s3 = sadd.s32 43, %s4732_s16 }
  0x77   : > { %7588 = sst [smem:[#allocation40_spill]] %s4939_s24  ;;  %s7604_s24 = sld [smem:[#allocation15_spill]] }
  0x78   : > { %s4947_s4 = sld [smem:[#allocation5 + %s632_s22]] }
  0x79   : > { %s4949_s12 = sld [smem:[#allocation5 + %s636_s10]] }
  0x7a   : > { %7589 = sst [smem:[#allocation41_spill]] %s4941_s17  ;;  %s7601_s22 = sld [smem:[#allocation14_spill]] }
  0x7b   : > { %s4951_s29 = sld [smem:[#allocation5 + %s640_s20]]  ;;  %s7609_s17 = scalar_lea.vmem %s7477_s1, %s4739_s21 }
  0x7c   : > { %7590 = sst [smem:[#allocation42_spill]] %s4945_s26  ;;  %v5052_v40 = vld [vmem:[%s7609_s17] sm:$0x1]  ;;  %s766_s21 = sadd.s32 53, %s4732_s16 }
  0x7d   : > { %s4967_s20 = sld [smem:[#allocation5 + %s644_s7]]  ;;  %v406_v46 = vrot.slane %v5052_v40, 7 }
  0x7e   : > { %7591 = sst [smem:[#allocation43_spill]] %s4947_s4  ;;  %s762_s4 = sadd.s32 52, %s4732_s16 }
  0x7f   : > { %7592 = sst [smem:[#allocation44_spill]] %s4949_s12 }
  0x80   : > { %s4969_s14 = sld [smem:[#allocation5 + %s648_s0]]  ;;  %s693_s0 = sadd.s32 42, %s4732_s16 }
  0x81   : > { %7593 = sst [smem:[#allocation45_spill]] %s4951_s29  ;;  %s7613_s17 = scalar_lea.vmem %s7477_s1, %s7601_s22 }
  0x82   : > { %s4984_s7 = sld [smem:[#allocation5 + %s652_s13]]  ;;  %v5077_v43 = vld [vmem:[%s7613_s17] sm:$0x1] }
  0x83   : > { %7594 = sst [smem:[#allocation46_spill]] %s4967_s20  ;;  %s7605_s20 = sld [smem:[#allocation16_spill]]  ;;  %v415_v49 = vrot.slane %v5077_v43, 4 }
  0x84   : > { %s5004_s10 = sld [smem:[#allocation5 + %s685_s11]]  ;;  %s701_s11 = sadd.s32 44, %s4732_s16 }
  0x85   : > { %s5011_s18 = sld [smem:[#allocation5 + %s689_s19]]  ;;  %s709_s19 = sadd.s32 46, %s4732_s16 }
  0x86   : > { %7595 = sst [smem:[#allocation47_spill]] %s4969_s14  ;;  %s746_s14 = sadd.s32 48, %s4732_s16 }
  0x87   : > { %s5018_s13 = sld [smem:[#allocation5 + %s693_s0]] }
  0x88   : > { %7596 = sst [smem:[#allocation48_spill]] %s4984_s7  ;;  %s7627_s7 = sld [smem:[#allocation26_spill]] }
  0x89   : > { %s5026_s5 = sld [smem:[#allocation5 + %s697_s3]]  ;;  %s750_s3 = sadd.s32 49, %s4732_s16 }
  0x8a   : > { %7597 = sst [smem:[#allocation49_spill]] %s5004_s10  ;;  %s7622_s22 = sld [smem:[#allocation24_spill]] }
  0x8b   : > { %7598 = sst [smem:[#allocation50_spill]] %s5011_s18  ;;  %s7652_s18 = sld [smem:[#allocation35_spill]] }
  0x8c   : > { %s5029_s2 = sld [smem:[#allocation5 + %s701_s11]] }
  0x8d   : > { %7599 = sst [smem:[#allocation51_spill]] %s5018_s13  ;;  %s7623_s11 = sld [smem:[#allocation17_spill]] }
  0x8e   : > { %s5032_s0 = sld [smem:[#allocation5 + %s705_s8]] }
  0x8f   : > { %7600 = sst [smem:[#allocation52_spill]] %s5026_s5  ;;  %s7617_s8 = sld [smem:[#allocation19_spill]] }
  0x90   : > { %s5035_s29 = sld [smem:[#allocation5 + %s709_s19]]  ;;  %s7628_s5 = scalar_lea.vmem %s7477_s1, %s7616_s9 }
  0x91   : > { %s5037_s6 = sld [smem:[#allocation5 + %s713_s15]]  ;;  %s7610_s15 = scalar_lea.vmem %s7477_s1, %s4742_s23  ;;  %v5130_v53 = vld [vmem:[%s7628_s5] sm:$0x1] }
  0x92   : > { %7602 = sst [smem:[#allocation14_spill]] %s5029_s2  ;;  %v5059_v41 = vld [vmem:[%s7610_s15] sm:$0x1]  ;;  %s758_s23 = sadd.s32 51, %s4732_s16  ;;  %v535_v63 = vrot.slane %v5130_v53, 7 }
  0x93   : > { %s5045_s12 = sld [smem:[#allocation5 + %s746_s14]]  ;;  %s7612_s14 = scalar_lea.vmem %s7477_s1, %s4745_s25  ;;  %v409_v47 = vrot.slane %v5059_v41, 6 }
  0x94   : > { %7603 = sst [smem:[#allocation53_spill]] %s5032_s0  ;;  %v5070_v42 = vld [vmem:[%s7612_s14] sm:$0x1]  ;;  %s7615_s15 = scalar_lea.vmem %s7477_s1, %s7605_s20 }
  0x95   : > { %s5061_s26 = sld [smem:[#allocation5 + %s750_s3]]  ;;  %v5093_v45 = vld [vmem:[%s7615_s15] sm:$0x1]  ;;  %v412_v48 = vrot.slane %v5070_v42, 5  ;;  %s7625_s3 = scalar_lea.vmem %s7477_s1, %s4773_s30 }
  0x96   : > { %7606 = sst [smem:[#allocation15_spill]] %s5035_s29  ;;  %s7618_s19 = sld [smem:[#allocation21_spill]]  ;;  %v5121_v50 = vld [vmem:[%s7625_s3] sm:$0x1]  ;;  %v421_v52 = vrot.slane %v5093_v45, 2 }
  0x97   : > { %7607 = sst [smem:[#allocation16_spill]] %s5037_s6  ;;  %s7620_s25 = sld [smem:[#allocation23_spill]]  ;;  %v424_v62 = vrot.slane %v5121_v50, 1 }
  0x98   : > { %s5063_s6 = sld [smem:[#allocation5 + %s754_s28]]  ;;  %s7614_s28 = scalar_lea.vmem %s7477_s1, %s7604_s24 }
  0x99   : > { %7608 = sst [smem:[#allocation54_spill]] %s5045_s12  ;;  %v5086_v44 = vld [vmem:[%s7614_s28] sm:$0x1]  ;;  %s7626_s28 = sld [smem:[#allocation25_spill]] }
  0x9a   : > { %s5107_s20 = sld [smem:[#allocation5 + %s758_s23]]  ;;  %v418_v51 = vrot.slane %v5086_v44, 3  ;;  %s7634_s14 = scalar_lea.vmem %s7477_s1, %s7622_s22 }
  0x9b   : > { %s5113_s27 = sld [smem:[#allocation5 + %s762_s4]]  ;;  %v5174_v57 = vld [vmem:[%s7634_s14] sm:$0x1]  ;;  %s7636_s13 = scalar_lea.vmem %s7477_s1, %s7623_s11 }
  0x9c   : > { %s7629_s4 = sld [smem:[#allocation27_spill]]  ;;  %s7631_s5 = scalar_lea.vmem %s7477_s1, %s7618_s19  ;;  %v5181_v58 = vld [vmem:[%s7636_s13] sm:$0x1]  ;;  %v547_v5 = vrot.slane %v5174_v57, 3 }
  0x9d   : > { %v5152_v55 = vld [vmem:[%s7631_s5] sm:$0x1]  ;;  %s7632_s17 = scalar_lea.vmem %s7477_s1, %s7620_s25  ;;  %s7633_s3 = sld [smem:[#allocation28_spill]]  ;;  %v474_v6 = vrot.slane %v5181_v58, 7 }
  0x9e   : > { %7611 = sst [smem:[#allocation55_spill]] %s5063_s6  ;;  %v5159_v56 = vld [vmem:[%s7632_s17] sm:$0x1]  ;;  %s7635_s5 = sld [smem:[#allocation13_spill]]  ;;  %v541_v3 = vrot.slane %v5152_v55, 5 }
  0x9f   : > { %s5183_s17 = sld [smem:[#allocation5 + %s766_s21]]  ;;  %s770_s24 = sadd.s32 54, %s4732_s16  ;;  %v544_v4 = vrot.slane %v5159_v56, 4 }
  0xa0   : > { %7619 = sst [smem:[#allocation18_spill]] %s5107_s20  ;;  %s7630_s20 = scalar_lea.vmem %s7477_s1, %s7617_s8 }
  0xa1   : > { %7624 = sst [smem:[#allocation19_spill]] %s5113_s27  ;;  %v5145_v54 = vld [vmem:[%s7630_s20] sm:$0x1]  ;;  %s7638_s20 = scalar_lea.vmem %s7477_s1, %s7626_s28 }
  0xa2   : > { %v5191_v59 = vld [vmem:[%s7638_s20] sm:$0x1]  ;;  %s7639_s9 = scalar_lea.vmem %s7477_s1, %s7627_s7  ;;  %s7640_s11 = scalar_lea.vmem %s7477_s1, %s7629_s4  ;;  %v538_v0 = vrot.slane %v5145_v54, 6 }
  0xa3   : > { %v5198_v60 = vld [vmem:[%s7639_s9] sm:$0x1]  ;;  %s7641_s7 = sld [smem:[#allocation29_spill]]  ;;  %s7642_s19 = scalar_lea.vmem %s7477_s1, %s7633_s3  ;;  %v550_v7 = vrot.slane %v5191_v59, 2 }
  0xa4   : > { %v5205_v61 = vld [vmem:[%s7640_s11] sm:$0x1]  ;;  %s7644_s11 = sld [smem:[#allocation20_spill]]  ;;  %s774_s21 = sadd.s32 55, %s4732_s16  ;;  %v553_v8 = vrot.slane %v5198_v60, 1 }
  0xa5   : > { %7637 = sst [smem:[#allocation21_spill]] %s5183_s17  ;;  %v5223_v1 = vld [vmem:[%s7642_s19] sm:$0x1]  ;;  %s7645_s23 = scalar_lea.vmem %s7477_s1, %s7635_s5  ;;  %v477_v10 = vrot.slane %v5205_v61, 6 }
  0xa6   : > { %v376_v2 = vld [vmem:[%s7645_s23] sm:$0x1]  ;;  %s7646_s27 = sld [smem:[#allocation34_spill]]  ;;  %s7648_s20 = sld [smem:[#allocation19_spill]]  ;;  %v480_v12 = vrot.slane %v5223_v1, 5 }
  0xa7   : > { %s7647_s3 = sld [smem:[#allocation42_spill]]  ;;  %s7649_s4 = sld [smem:[#allocation22_spill]]  ;;  %v427_v21 = vsel %vm426_vm1, %v376_v2, %v406_v46 }
  0xa8   : > { %s5239_s19 = sld [smem:[#allocation5 + %s770_s24]]  ;;  %s807_s14 = sadd.s32 56, %s4732_s16  ;;  %v429_v32 = vsel %vm428_vm2, %v427_v21, %v409_v47 }
  0xa9   : > { %s7651_s9 = sld [smem:[#allocation30_spill]]  ;;  %s7653_s28 = scalar_lea.vmem %s7477_s1, %s7641_s7 }
  0xaa   : > { %v5249_v9 = vld [vmem:[%s7653_s28] sm:$0x1]  ;;  %s7654_s23 = sld [smem:[#allocation31_spill]]  ;;  %s7655_s25 = sld [smem:[#allocation32_spill]] }
  0xab   : > { %s7656_s8 = sld [smem:[#allocation33_spill]]  ;;  %s811_s15 = sadd.s32 57, %s4732_s16  ;;  %v483_v22 = vrot.slane %v5249_v9, 4 }
  0xac   : > { %s7657_s12 = scalar_lea.vmem %s7477_s1, %s7644_s11  ;;  %s7658_s10 = scalar_lea.vmem %s7477_s1, %s7646_s27 }
  0xad   : > { %v505_v11 = vld [vmem:[%s7657_s12] sm:$0x1]  ;;  %s7659_s13 = scalar_lea.vmem %s7477_s1, %s7647_s3  ;;  %s7660_s29 = sld [smem:[#allocation43_spill]] }
  0xae   : > { %7650 = sst [smem:[#allocation23_spill]] %s5239_s19  ;;  %v570_v13 = vld [vmem:[%s7658_s10] sm:$0x1]  ;;  %s7662_s2 = scalar_lea.vmem %s7477_s1, %s7649_s4  ;;  %v555_v29 = vsel %vm426_vm1, %v505_v11, %v535_v63 }
  0xaf   : > { %v631_v14 = vld [vmem:[%s7659_s13] sm:$0x1]  ;;  %s5277_s0 = sld [smem:[#allocation5 + %s774_s21]]  ;;  %s7663_s5 = scalar_lea.vmem %s7477_s1, %s7651_s9  ;;  %v596_v23 = vrot.slane %v570_v13, 7  ;;  %v556_v46 = vsel %vm428_vm2, %v555_v29, %v538_v0 }
  0xb0   : > { %v444_v15 = vld [vmem:[%s7662_s2] sm:$0x1]  ;;  %s7664_s30 = scalar_lea.vmem %s7477_s1, %s7652_s18  ;;  %s5296_s21 = sld [smem:[#allocation5 + %s807_s14]]  ;;  %v657_v25 = vrot.slane %v631_v14, 7 }
  0xb1   : > { %v5289_v16 = vld [vmem:[%s7663_s5] sm:$0x1]  ;;  %s815_s10 = sadd.s32 58, %s4732_s16  ;;  %s7665_s28 = sld [smem:[#allocation41_spill]]  ;;  %v494_v33 = vsel %vm426_vm1, %v444_v15, %v474_v6  ;;  %v431_v6 = vsel %vm430_vm3, %v429_v32, %v412_v48  ;;  %v557_v48 = vsel %vm430_vm3, %v556_v46, %v541_v3 }
  0xb2   : > { %v574_v17 = vld [vmem:[%s7664_s30] sm:$0x1]  ;;  %s7666_s13 = scalar_lea.vmem %s7477_s1, %s7654_s23  ;;  %s7667_s12 = scalar_lea.vmem %s7477_s1, %s7655_s25  ;;  %v486_v26 = vrot.slane %v5289_v16, 3  ;;  %v495_v61 = vsel %vm428_vm2, %v494_v33, %v477_v10  ;;  %v433_v1 = vsel %vm432_vm4, %v431_v6, %v415_v49  ;;  %v558_v49 = vsel %vm432_vm4, %v557_v48, %v544_v4 }
  0xb3   : > { %v5304_v18 = vld [vmem:[%s7666_s13] sm:$0x1]  ;;  %s7668_s11 = scalar_lea.vmem %s7477_s1, %s7656_s8  ;;  %s7669_s7 = sld [smem:[#allocation36_spill]]  ;;  %v599_v27 = vrot.slane %v574_v17, 6  ;;  %v496_v55 = vsel %vm430_vm3, %v495_v61, %v480_v12  ;;  %v559_v44 = vsel %vm434_vm5, %v558_v49, %v547_v5 }
  0xb4   : > { %v5311_v19 = vld [vmem:[%s7667_s12] sm:$0x1]  ;;  %s5318_s27 = sld [smem:[#allocation5 + %s811_s15]]  ;;  %s819_s23 = sadd.s32 59, %s4732_s16  ;;  %v489_v37 = vrot.slane %v5304_v18, 2  ;;  %v497_v56 = vsel %vm432_vm4, %v496_v55, %v483_v22  ;;  %v560_v55 = vsel %vm436_vm6, %v559_v44, %v550_v7 }
  0xb5   : > { %7661 = sst [smem:[#allocation24_spill]] %s5277_s0  ;;  %v566_v20 = vld [vmem:[%s7668_s11] sm:$0x1]  ;;  %s7670_s5 = sld [smem:[#allocation50_spill]]  ;;  %v492_v38 = vrot.slane %v5311_v19, 1 }
  0xb6   : > { %s7671_s3 = scalar_lea.vmem %s7477_s1, %s7660_s29  ;;  %s7672_s15 = sld [smem:[#allocation37_spill]]  ;;  %v616_v39 = vsel %vm426_vm1, %v566_v20, %v596_v23 }
  0xb7   : > { %v635_v24 = vld [vmem:[%s7671_s3] sm:$0x1]  ;;  %s7673_s2 = sld [smem:[#allocation44_spill]]  ;;  %s823_s13 = sadd.s32 60, %s4732_s16  ;;  %v617_v13 = vsel %vm428_vm2, %v616_v39, %v599_v27 }
  0xb8   : > { %s7674_s12 = scalar_lea.vmem %s7477_s1, %s7665_s28  ;;  %s827_s18 = sadd.s32 61, %s4732_s16  ;;  %v660_v36 = vrot.slane %v635_v24, 6 }
  0xb9   : > { %v627_v28 = vld [vmem:[%s7674_s12] sm:$0x1]  ;;  %s831_s29 = sadd.s32 62, %s4732_s16  ;;  %s7675_s25 = scalar_lea.vmem %s7477_s1, %s7669_s7 }
  0xba   : > { %v578_v30 = vld [vmem:[%s7675_s25] sm:$0x1]  ;;  %s7677_s30 = sld [smem:[#allocation51_spill]]  ;;  %s7678_s28 = sld [smem:[#allocation38_spill]]  ;;  %v677_v40 = vsel %vm426_vm1, %v627_v28, %v657_v25 }
  0xbb   : > { %s7676_s8 = scalar_lea.vmem %s7477_s1, %s7670_s5  ;;  %s5354_s4 = sld [smem:[#allocation5 + %s815_s10]]  ;;  %v602_v53 = vrot.slane %v578_v30, 5  ;;  %v678_v42 = vsel %vm428_vm2, %v677_v40, %v660_v36 }
  0xbc   : > { %v692_v31 = vld [vmem:[%s7676_s8] sm:$0x1]  ;;  %s5356_s9 = sld [smem:[#allocation5 + %s819_s23]]  ;;  %s7679_s12 = scalar_lea.vmem %s7477_s1, %s7672_s15 }
  0xbd   : > { %v5367_v34 = vld [vmem:[%s7679_s12] sm:$0x1]  ;;  %s7680_s10 = scalar_lea.vmem %s7477_s1, %s7673_s2  ;;  %s5378_s6 = sld [smem:[#allocation5 + %s823_s13]]  ;;  %v718_v58 = vrot.slane %v692_v31, 7  ;;  %v618_v12 = vsel %vm430_vm3, %v617_v13, %v602_v53 }
  0xbe   : > { %v639_v35 = vld [vmem:[%s7680_s10] sm:$0x1]  ;;  %s7681_s15 = sld [smem:[#allocation45_spill]]  ;;  %s7682_s3 = sld [smem:[#allocation49_spill]]  ;;  %v605_v54 = vrot.slane %v5367_v34, 4 }
  0xbf   : > { %s5389_s24 = sld [smem:[#allocation5 + %s827_s18]]  ;;  %s868_s18 = sadd.s32 64, %s4732_s16  ;;  %v663_v0 = vrot.slane %v639_v35, 5 }
  0xc0   : > { %s7683_s7 = scalar_lea.vmem %s7477_s1, %s7677_s30  ;;  %s5391_s13 = sld [smem:[#allocation5 + %s831_s29]]  ;;  %v619_v9 = vsel %vm432_vm4, %v618_v12, %v605_v54 }
  0xc1   : > { %v696_v41 = vld [vmem:[%s7683_s7] sm:$0x1]  ;;  %s7684_s12 = sld [smem:[#allocation39_spill]]  ;;  %s7685_s10 = scalar_lea.vmem %s7477_s1, %s7678_s28  ;;  %v679_v27 = vsel %vm430_vm3, %v678_v42, %v663_v0 }
  0xc2   : > { %s7686_s23 = sld [smem:[#allocation40_spill]]  ;;  %v5401_v47 = vld [vmem:[%s7685_s10] sm:$0x1]  ;;  %s835_s30 = sadd.s32 63, %s4732_s16  ;;  %v721_v14 = vrot.slane %v696_v41, 6  ;;  %v435_v41 = vsel %vm434_vm5, %v433_v1, %v418_v51  ;;  %v498_v51 = vsel %vm434_vm5, %v497_v56, %v486_v26 }
  0xc3   : > { %s7687_s29 = sld [smem:[#allocation52_spill]]  ;;  %s7693_s14 = sld [smem:[#allocation47_spill]]  ;;  %v608_v3 = vrot.slane %v5401_v47, 3  ;;  %v437_v6 = vsel %vm436_vm6, %v435_v41, %v421_v52 }
  0xc4   : > { %s7688_s8 = scalar_lea.vmem %s7477_s1, %s7681_s15  ;;  %s7689_s5 = scalar_lea.vmem %s7477_s1, %s7682_s3 }
  0xc5   : > { %v643_v63 = vld [vmem:[%s7688_s8] sm:$0x1]  ;;  %s7690_s15 = sld [smem:[#allocation46_spill]]  ;;  %s7694_s10 = sld [smem:[#allocation48_spill]]  ;;  %v620_v5 = vsel %vm434_vm5, %v619_v9, %v608_v3  ;;  %v499_v3 = vsel %vm436_vm6, %v498_v51, %v489_v37  ;;  %v7544_v9 = vmov 1.0  }
  0xc6   : > { %v688_v2 = vld [vmem:[%s7689_s5] sm:$0x1]  ;;  %s7696_s28 = scalar_lea.vmem %s7477_s1, %s5061_s26  ;;  %s5462_s22 = sld [smem:[#allocation5 + %s835_s30]]  ;;  %v666_v21 = vrot.slane %v643_v63, 4 }
  0xc7   : > { %s7691_s8 = scalar_lea.vmem %s7477_s1, %s7684_s12  ;;  %s872_s12 = sadd.s32 65, %s4732_s16  ;;  %v753_v17 = vld [vmem:[%s7696_s28] sm:$0x1]  ;;  %v738_v23 = vsel %vm426_vm1, %v688_v2, %v718_v58 }
  0xc8   : > { %v5433_v10 = vld [vmem:[%s7691_s8] sm:$0x1]  ;;  %s7692_s7 = scalar_lea.vmem %s7477_s1, %s7686_s23  ;;  %s5464_s19 = sld [smem:[#allocation5 + %s868_s18]]  ;;  %v779_v31 = vrot.slane %v753_v17, 7  ;;  %v739_v33 = vsel %vm428_vm2, %v738_v23, %v721_v14  ;;  %v680_v36 = vsel %vm432_vm4, %v679_v27, %v666_v21  ;;  %v1978_v17 = vlaneseq }
  0xc9   : > { %v5440_v11 = vld [vmem:[%s7692_s7] sm:$0x1]  ;;  %s7695_s2 = scalar_lea.vmem %s7477_s1, %s7687_s29  ;;  %s7697_s7 = sld [smem:[#allocation14_spill]]  ;;  %v611_v28 = vrot.slane %v5433_v10, 2 }
  0xca   : > { %v700_v15 = vld [vmem:[%s7695_s2] sm:$0x1]  ;;  %s7699_s26 = sld [smem:[#allocation55_spill]]  ;;  %s876_s18 = sadd.s32 66, %s4732_s16  ;;  %v614_v4 = vrot.slane %v5440_v11, 1  ;;  %v5684_v1 = vshrl.u32 %v1978_v17, 7 }
  0xcb   : > { %s7698_s11 = scalar_lea.vmem %s7477_s1, %s7690_s15  ;;  %s5476_s30 = sld [smem:[#allocation5 + %s872_s12]]  ;;  %v724_v29 = vrot.slane %v700_v15, 5 }
  0xcc   : > { %v647_v20 = vld [vmem:[%s7698_s11] sm:$0x1]  ;;  %s7700_s15 = scalar_lea.vmem %s7477_s1, %s7693_s14  ;;  %s7701_s29 = scalar_lea.vmem %s7477_s1, %s7694_s10 }
  0xcd   : > { %v5488_v24 = vld [vmem:[%s7700_s15] sm:$0x1]  ;;  %s7702_s12 = sld [smem:[#allocation54_spill]]  ;;  %v669_v32 = vrot.slane %v647_v20, 3  ;;  %s884_s10 = sadd.s32 68, %s4732_s16  ;;  %v740_v61 = vsel %vm430_vm3, %v739_v33, %v724_v29  ;;  %v621_v20 = vsel %vm436_vm6, %v620_v5, %v611_v28 }
  0xce   : > { %v5495_v25 = vld [vmem:[%s7701_s29] sm:$0x1]  ;;  %s880_s29 = sadd.s32 67, %s4732_s16  ;;  %s5535_s8 = sld [smem:[#allocation5 + %s876_s18]]  ;;  %v672_v22 = vrot.slane %v5488_v24, 2 }
  0xcf   : > { %s7703_s25 = scalar_lea.vmem %s7477_s1, %s7697_s7  ;;  %s7705_s7 = sld [smem:[#allocation53_spill]]  ;;  %v675_v35 = vrot.slane %v5495_v25, 1  ;;  %v681_v16 = vsel %vm434_vm5, %v680_v36, %v669_v32  ;;  %v5731_v36 = vsel %vm438_vm7, %v560_v55, %v553_v8 }
  0xd0   : > { %v704_v43 = vld [vmem:[%s7703_s25] sm:$0x1]  ;;  %s7704_s25 = scalar_lea.vmem %s7477_s1, %s7699_s26  ;;  %s7706_s26 = sld [smem:[#allocation18_spill]]  ;;  %v682_v21 = vsel %vm436_vm6, %v681_v16, %v672_v22  ;;  %v5726_v22 = vsel %vm438_vm7, %v437_v6, %v424_v62  ;;  %v5754_v62 = vsel %vm438_vm7, %v621_v20, %v614_v4 }
  0xd1   : > { %v757_v30 = vld [vmem:[%s7704_s25] sm:$0x1]  ;;  %s7708_s3 = sld [smem:[#allocation15_spill]]  ;;  %s7710_s23 = scalar_lea.vmem %s7477_s1, %s5318_s27  ;;  %v727_v46 = vrot.slane %v704_v43, 4  ;;  %v5759_v8 = vsel %vm438_vm7, %v682_v21, %v675_v35 }
  0xd2   : > { %v814_v40 = vld [vmem:[%s7710_s23] sm:$0x1]  ;;  %s829_s28 = scalar_lea.vmem %s7477_s1, %s5389_s24  ;;  %v782_v53 = vrot.slane %v757_v30, 6  ;;  %s888_s18 = sadd.s32 69, %s4732_s16 }
  0xd3   : > { %s7707_s2 = scalar_lea.vmem %s7477_s1, %s7702_s12  ;;  %s7714_s12 = sld [smem:[#allocation21_spill]]  ;;  %v840_v2 = vrot.slane %v814_v40, 7  ;;  %v741_v52 = vsel %vm432_vm4, %v740_v61, %v727_v46  ;;  %v830_v40 = vld [vmem:[%s829_s28] sm:$0x1] }
  0xd4   : > { %v749_v34 = vld [vmem:[%s7707_s2] sm:$0x1]  ;;  %s7716_s2 = scalar_lea.vmem %s7477_s1, %s5354_s4  ;;  %s5591_s25 = sld [smem:[#allocation5 + %s884_s10]] }
  0xd5   : > { %s7709_s5 = scalar_lea.vmem %s7477_s1, %s7705_s7  ;;  %s7711_s7 = sld [smem:[#allocation16_spill]]  ;;  %v799_v54 = vsel %vm426_vm1, %v749_v34, %v779_v31  ;;  %v818_v57 = vld [vmem:[%s7716_s2] sm:$0x1] }
  0xd6   : > { %v708_v39 = vld [vmem:[%s7709_s5] sm:$0x1]  ;;  %s7712_s27 = scalar_lea.vmem %s7477_s1, %s7706_s26  ;;  %s5568_s5 = sld [smem:[#allocation5 + %s880_s29]]  ;;  %v800_v14 = vsel %vm428_vm2, %v799_v54, %v782_v53  ;;  %v843_v15 = vrot.slane %v818_v57, 6  ;;  %v2240_v53 = vadd.s32 128, %v5684_v1 }
  0xd7   : > { %v761_v47 = vld [vmem:[%s7712_s27] sm:$0x1]  ;;  %s7713_s26 = scalar_lea.vmem %s7477_s1, %s7708_s3  ;;  %s7715_s29 = sld [smem:[#allocation23_spill]]  ;;  %v730_v63 = vrot.slane %v708_v39, 3  ;;  %v5736_v39 = vsel %vm438_vm7, %v499_v3, %v492_v38 }
  0xd8   : > { %v5582_v58 = vld [vmem:[%s7713_s26] sm:$0x1]  ;;  %s892_s17 = sadd.s32 70, %s4732_s16  ;;  %s7718_s26 = scalar_lea.vmem %s7477_s1, %s7648_s20  ;;  %v785_v42 = vrot.slane %v761_v47, 5 }
  0xd9   : > { %v5608_v0 = vld [vmem:[%s7718_s26] sm:$0x1]  ;;  %s837_s11 = scalar_lea.vmem %s7477_s1, %s5462_s22  ;;  %s7719_s20 = scalar_lea.vmem %s7477_s1, %s7714_s12  ;;  %v733_v7 = vrot.slane %v5582_v58, 2  ;;  %v742_v27 = vsel %vm434_vm5, %v741_v52, %v730_v63  ;;  %v852_v58 = vrot.slane %v830_v40, 3 }
  0xda   : > { %v5626_v10 = vld [vmem:[%s7719_s20] sm:$0x1]  ;;  %s7721_s10 = scalar_lea.vmem %s7477_s1, %s5296_s21  ;;  %s874_s12 = scalar_lea.vmem %s7477_s1, %s5476_s30  ;;  %v788_v43 = vrot.slane %v5608_v0, 4  ;;  %v801_v49 = vsel %vm430_vm3, %v800_v14, %v785_v42 }
  0xdb   : > { %s7717_s14 = scalar_lea.vmem %s7477_s1, %s7711_s7  ;;  %s870_s7 = scalar_lea.vmem %s7477_s1, %s5464_s19  ;;  %v810_v45 = vld [vmem:[%s7721_s10] sm:$0x1]  ;;  %v791_v28 = vrot.slane %v5626_v10, 3  ;;  %v743_v19 = vsel %vm436_vm6, %v742_v27, %v733_v7 }
  0xdc   : > { %v5601_v26 = vld [vmem:[%s7717_s14] sm:$0x1]  ;;  %s7722_s3 = sld [smem:[#allocation12_spill]]  ;;  %s7723_s14 = scalar_lea.vmem %s7477_s1, %s5356_s9  ;;  %v860_v18 = vsel %vm426_vm1, %v810_v45, %v840_v2  ;;  %v802_v38 = vsel %vm432_vm4, %v801_v49, %v788_v43 }
  0xdd   : > { %s7720_s4 = scalar_lea.vmem %s7477_s1, %s7715_s29  ;;  %s5644_s27 = sld [smem:[#allocation5 + %s888_s18]]  ;;  %v822_v48 = vld [vmem:[%s7723_s14] sm:$0x1]  ;;  %v736_v24 = vrot.slane %v5601_v26, 1  ;;  %v861_v32 = vsel %vm428_vm2, %v860_v18, %v843_v15  ;;  %v803_v5 = vsel %vm434_vm5, %v802_v38, %v791_v28 }
  0xde   : > { %v5633_v13 = vld [vmem:[%s7720_s4] sm:$0x1]  ;;  %s5653_s21 = sld [smem:[#allocation5 + %s892_s17]]  ;;  %s896_s15 = sadd.s32 71, %s4732_s16  ;;  %v846_v30 = vrot.slane %v822_v48, 5 }
  0xdf   : > { %s7724_s18 = scalar_lea.vmem %s7477_s1, %s5378_s6  ;;  %s933_s17 = sadd.s32 73, %s4732_s16  ;;  %v875_v37 = vld [vmem:[%s874_s12] sm:$0x1]  ;;  %v794_v29 = vrot.slane %v5633_v13, 2  ;;  %v5840_v20 = vsel %vm438_vm7, %v743_v19, %v736_v24 }
  0xe0   : > { %v5669_v23 = vld [vmem:[%s7724_s18] sm:$0x1]  ;;  %s937_s4 = sadd.s32 74, %s4732_s16  ;;  %s878_s10 = scalar_lea.vmem %s7477_s1, %s5535_s8  ;;  %v901_v34 = vrot.slane %v875_v37, 7  ;;  %v862_v35 = vsel %vm430_vm3, %v861_v32, %v846_v30 }
  0xe1   : > { %s7725_s23 = sld [smem:[#allocation24_spill]]  ;;  %s7726_s20 = sld [smem:[#allocation67_spill]]  ;;  %v849_v56 = vrot.slane %v5669_v23, 4  ;;  %v879_v33 = vld [vmem:[%s878_s10] sm:$0x1]  ;;  %v804_v18 = vsel %vm436_vm6, %v803_v5, %v794_v29 }
  0xe2   : > { %v5674_v59 = vld [vmem:[%s7722_s3] ss:$0 sm:$0xff]  ;;  %s5682_s2 = sld [smem:[#allocation5 + %s933_s17]]  ;;  %s929_s12 = sadd.s32 72, %s4732_s16  ;;  %v904_v47 = vrot.slane %v879_v33, 6 }
  0xe3   : > { %s5695_s8 = sld [smem:[#allocation5 + %s896_s15]]  ;;  %s941_s9 = sadd.s32 75, %s4732_s16  ;;  %vm1999_vm8 = vcmp.eq.s32.totalorder %v5674_v59, %v5684_v1  ;;  %v871_v50 = vld [vmem:[%s870_s7] sm:$0x1]  ;;  %vm2256_vm9 = vcmp.eq.s32.totalorder %v5674_v59, %v2240_v53  ;;  %v863_v10 = vsel %vm432_vm4, %v862_v35, %v849_v56 }
  0xe4   : > { %s5700_s14 = sld [smem:[#allocation5 + %s937_s4]]  ;;  %s882_s0 = scalar_lea.vmem %s7477_s1, %s5568_s5  ;;  %3969 = vmatprep.mubr.msk.f32.mxu1 %vm1999_vm8, %v7544_v9  ;;  %v5775_v11 = vld [vmem:[%s837_s11] sm:$0x1]  ;;  %v921_v54 = vsel %vm426_vm1, %v871_v50, %v901_v34  ;;  %4025 = vmatprep.mubr.msk.f32.mxu0 %vm2256_vm9, %v7544_v9  ;;  %v864_v37 = vsel %vm434_vm5, %v863_v10, %v852_v58 }
  0xe5   : > { %s886_s29 = scalar_lea.vmem %s7477_s1, %s5591_s25  ;;  %s945_s30 = sadd.s32 76, %s4732_s16  ;;  %v883_v46 = vld [vmem:[%s882_s0] sm:$0x1]  ;;  %v858_v6 = vrot.slane %v5775_v11, 1  ;;  %v922_v17 = vsel %vm428_vm2, %v921_v54, %v904_v47 }
  0xe6   : > { %s7728_s28 = scalar_lea.vmem %s7477_s1, %s5391_s13  ;;  %s890_s15 = scalar_lea.vmem %s7477_s1, %s5644_s27  ;;  %v5793_v61 = vld [vmem:[%s886_s29] sm:$0x1]  ;;  %v907_v42 = vrot.slane %v883_v46, 5 }
  0xe7   : > { %v5689_v12 = vld [vmem:[%s7726_s20] ss:$0 sm:$0xff]  ;;  %s7727_s17 = scalar_lea.vmem %s7477_s1, %s7725_s23  ;;  %s5748_s20 = sld [smem:[#allocation5 + %s929_s12]]  ;;  %v910_v15 = vrot.slane %v5793_v61, 4 }
  0xe8   : > { %v5710_v31 = vld [vmem:[%s7727_s17] sm:$0x1]  ;;  %s5781_s4 = sld [smem:[#allocation5 + %s941_s9]]  ;;  %s949_s13 = sadd.s32 77, %s4732_s16  ;;  %v923_v28 = vsel %vm430_vm3, %v922_v17, %v907_v42 }
  0xe9   : > { %v5768_v41 = vld [vmem:[%s7728_s28] sm:$0x1]  ;;  %v797_v51 = vrot.slane %v5710_v31, 1  ;;  %s894_s27 = scalar_lea.vmem %s7477_s1, %s5653_s21  ;;  %s5800_s9 = sld [smem:[#allocation5 + %s945_s30]]  ;;  %v924_v47 = vsel %vm432_vm4, %v923_v28, %v910_v15 }
  0xea   : > { %v855_v16 = vrot.slane %v5768_v41, 2  ;;  %v5805_v63 = vld [vmem:[%s890_s15] sm:$0x1]  ;;  %s935_s6 = scalar_lea.vmem %s7477_s1, %s5682_s2  ;;  %s953_s29 = sadd.s32 78, %s4732_s16 }
  0xeb   : > { %s898_s25 = scalar_lea.vmem %s7477_s1, %s5695_s8  ;;  %s5820_s10 = sld [smem:[#allocation5 + %s949_s13]]  ;;  %v5826_v48 = vld [vmem:[%s894_s27] sm:$0x1]  ;;  %v913_v21 = vrot.slane %v5805_v63, 3  ;;  %v5875_v19 = vsel %vm438_vm7, %v804_v18, %v797_v51 }
  0xec   : > { %s939_s23 = scalar_lea.vmem %s7477_s1, %s5700_s14  ;;  %v936_v23 = vld [vmem:[%s935_s6] sm:$0x1]  ;;  %s5843_s30 = sld [smem:[#allocation5 + %s953_s29]]  ;;  %v916_v49 = vrot.slane %v5826_v48, 2  ;;  %v865_v38 = vsel %vm436_vm6, %v864_v37, %v855_v16 }
  0xed   : > { %s957_s24 = sadd.s32 79, %s4732_s16  ;;  %v5851_v26 = vld [vmem:[%s898_s25] sm:$0x1]  ;;  %s931_s28 = scalar_lea.vmem %s7477_s1, %s5748_s20  ;;  %v962_v56 = vrot.slane %v936_v23, 7  ;;  %v5903_v10 = vsel %vm438_vm7, %v865_v38, %v858_v6  ;;  %v925_v42 = vsel %vm434_vm5, %v924_v47, %v913_v21 }
  0xee   : > { %s943_s18 = scalar_lea.vmem %s7477_s1, %s5781_s4  ;;  %v940_v31 = vld [vmem:[%s939_s23] sm:$0x1]  ;;  %s5867_s20 = sld [smem:[#allocation5 + %s957_s24]] }
  0xef   : > { %v932_v40 = vld [vmem:[%s931_s28] sm:$0x1]  ;;  %s947_s4 = scalar_lea.vmem %s7477_s1, %s5800_s9  ;;  %v965_v53 = vrot.slane %v940_v31, 6  ;;  %s990_s21 = sadd.s32 80, %s4732_s16 }
  0xf0   : > { %v944_v41 = vld [vmem:[%s943_s18] sm:$0x1]  ;;  %v982_v54 = vsel %vm426_vm1, %v932_v40, %v962_v56  ;;  %v5929_v40 = vsel %vm436_vm6, %v925_v42, %v916_v49  ;;  %s994_s5 = sadd.s32 81, %s4732_s16  ;;  %s5976_s25 = sld [smem:[#allocation5 + %s990_s21]] }
  0xf1   : > { %s951_s11 = scalar_lea.vmem %s7477_s1, %s5820_s10  ;;  %v948_v16 = vld [vmem:[%s947_s4] sm:$0x1]  ;;  %v968_v63 = vrot.slane %v944_v41, 5  ;;  %v983_v23 = vsel %vm428_vm2, %v982_v54, %v965_v53  ;;  %s5978_s10 = sld [smem:[#allocation5 + %s994_s5]] }
  0xf2   : > { %s955_s0 = scalar_lea.vmem %s7477_s1, %s5843_s30  ;;  %s998_s2 = sadd.s32 82, %s4732_s16 }
  0xf3   : > { %v5916_v21 = vld [vmem:[%s955_s0] sm:$0x1]  ;;  %s1002_s8 = sadd.s32 83, %s4732_s16  ;;  %s1006_s23 = sadd.s32 84, %s4732_s16 }
  0xf4   : > { %s959_s29 = scalar_lea.vmem %s7477_s1, %s5867_s20  ;;  %s6005_s30 = sld [smem:[#allocation5 + %s998_s2]] }
  0xf5   : > { %s1010_s24 = sadd.s32 85, %s4732_s16  ;;  %s6014_s14 = sld [smem:[#allocation5 + %s1002_s8]] }
  0xf6   : > { %s6016_s19 = sld [smem:[#allocation5 + %s1006_s23]]  ;;  %s1014_s28 = sadd.s32 86, %s4732_s16 }
  0xf7   : > { %s1018_s7 = sadd.s32 87, %s4732_s16  ;;  %s6035_s12 = sld [smem:[#allocation5 + %s1010_s24]] }
  0xf8   : > { %s1051_s18 = sadd.s32 88, %s4732_s16  ;;  %s996_s15 = scalar_lea.vmem %s7477_s1, %s5978_s10 }
  0xf9   : > { %s6050_s4 = sld [smem:[#allocation5 + %s1014_s28]]  ;;  %s1059_s27 = sadd.s32 90, %s4732_s16 }
  0xfa   : > { %s6052_s13 = sld [smem:[#allocation5 + %s1018_s7]]  ;;  %s1063_s9 = sadd.s32 91, %s4732_s16 }
  0xfb   : > { %s6058_s22 = sld [smem:[#allocation5 + %s1051_s18]]  ;;  %s992_s6 = scalar_lea.vmem %s7477_s1, %s5976_s25 }
  0xfc   : > { %s1000_s5 = scalar_lea.vmem %s7477_s1, %s6005_s30  ;;  %s1067_s2 = sadd.s32 92, %s4732_s16 }
  0xfd   : > { %s6092_s8 = sld [smem:[#allocation5 + %s1059_s27]]  ;;  %s1071_s23 = sadd.s32 93, %s4732_s16 }
  0xfe   : > { %s1004_s7 = scalar_lea.vmem %s7477_s1, %s6014_s14  ;;  %s6104_s18 = sld [smem:[#allocation5 + %s1063_s9]] }
  0xff   : > { %s6108_s20 = sld [smem:[#allocation5 + %s1067_s2]]  ;;  %s1075_s17 = sadd.s32 94, %s4732_s16 }
 0x100   : > { %s6117_s9 = sld [smem:[#allocation5 + %s1071_s23]]  ;;  %s1079_s28 = sadd.s32 95, %s4732_s16 }
 0x101   : > { %s6135_s24 = sld [smem:[#allocation5 + %s1075_s17]]  ;;  %s1112_s26 = sadd.s32 96, %s4732_s16 }
 0x102   : > { %s6173_s23 = sld [smem:[#allocation5 + %s1079_s28]]  ;;  %s1116_s17 = sadd.s32 97, %s4732_s16 }
 0x103   : > { %s6185_s28 = sld [smem:[#allocation5 + %s1112_s26]]  ;;  %s1120_s27 = sadd.s32 98, %s4732_s16 }
 0x104   : > { %s1124_s25 = sadd.s32 99, %s4732_s16  ;;  %s1128_s30 = sadd.s32 100, %s4732_s16 }
 0x105   : > { %s6246_s0 = sld [smem:[#allocation5 + %s1116_s17]]  ;;  %s7749_s17 = scalar_lea.vmem %s7477_s1, %s6016_s19 }
 0x106   : > { %s6252_s2 = sld [smem:[#allocation5 + %s1120_s27]]  ;;  %s1173_s26 = sadd.s32 104, %s4732_s16 }
 0x107   : > { %s6267_s27 = sld [smem:[#allocation5 + %s1128_s30]]  ;;  %s1140_s30 = sadd.s32 103, %s4732_s16 }
 0x108   : > { %s6316_s21 = sld [smem:[#allocation5 + %s1173_s26]]  ;;  %s7755_s14 = scalar_lea.vmem %s7477_s1, %s6035_s12 }
 0x109   : > { %s1181_s26 = sadd.s32 106, %s4732_s16  ;;  %s7762_s12 = scalar_lea.vmem %s7477_s1, %s6135_s24 }
 0x10a   : > { %s1197_s24 = sadd.s32 110, %s4732_s16 }
 0x11b   : > { %v3915_v60 = vpop.f32.mrb[0].mxu0 }
 0x11c   : > { %v5784_v25 = vadd.f32 %v3915_v60, %v5689_v12  ;;  %v1498_v4 = vpop.f32.mrb[1].mxu0 }
 0x11d   : > { %v5790_v44 = vadd.f32 %v5689_v12, %v1498_v4 }
 0x11e   : > { %v1594_v57 = vand.u32 2147483647, %v5784_v25 }
 0x11f   : > { %v1593_v0 = vand.u32 2147483647, %v5790_v44  ;;  %v3918_v2 = vpop.f32.mrb[2].mxu0 }
 0x120   : > { %v1610_v45 = vsub.f32 0.0, %v1594_v57  ;;  %v5824_v52 = vadd.f32 %v3918_v2, %v5689_v12  ;;  %v1508_v14 = vpop.f32.mrb[3].mxu0 }
 0x121   : > { %v1609_v55 = vsub.f32 0.0, %v1593_v0  ;;  %v5835_v3 = vadd.f32 %v5689_v12, %v1508_v14  ;;  %v1578_v14 = vmax.f32 %v5784_v25, 0.0 }
 0x122   : > { %v1627_v59 = vmul.f32 1.442695, %v1610_v45  ;;  %v1596_v7 = vand.u32 2147483647, %v5824_v52  ;;  %v5906_v45 = vld [vmem:[%s951_s11] sm:$0x1] }
 0x123   : > { %v1625_v24 = vmul.f32 1.442695, %v1609_v55  ;;  %v1595_v27 = vand.u32 2147483647, %v5835_v3  ;;  %v3921_v43 = vpop.f32.mrb[4].mxu0  ;;  %v1579_v18 = vmax.f32 %v5835_v3, 0.0 }
 0x124   : > { %4336 = vpow2.f32 %v1627_v59  ;;  %v1612_v13 = vsub.f32 0.0, %v1596_v7  ;;  %v5865_v29 = vadd.f32 %v3921_v43, %v5689_v12  ;;  %v1518_v30 = vpop.f32.mrb[5].mxu0  ;;  %v1577_v59 = vmax.f32 %v5790_v44, 0.0  ;;  %s1055_s11 = sadd.s32 89, %s4732_s16 }
 0x125   : > { %4338 = vpow2.f32 %v1625_v24  ;;  %v1611_v32 = vsub.f32 0.0, %v1595_v27  ;;  %v5870_v33 = vadd.f32 %v5689_v12, %v1518_v30  ;;  %v1580_v7 = vmax.f32 %v5824_v52, 0.0  ;;  %s6083_s10 = sld [smem:[#allocation5 + %s1055_s11]]  ;;  %s1177_s11 = sadd.s32 105, %s4732_s16 }
 0x126   : > { %v1631_v50 = vmul.f32 1.442695, %v1612_v13  ;;  %v1598_v60 = vand.u32 2147483647, %v5865_v29  ;;  %v971_v24 = vrot.slane %v948_v16, 4  ;;  %v1582_v43 = vmax.f32 %v5865_v29, 0.0 }
 0x127   : > { %v1629_v4 = vmul.f32 1.442695, %v1611_v32  ;;  %v1597_v35 = vand.u32 2147483647, %v5870_v33  ;;  %v3924_v46 = vpop.f32.mrb[6].mxu0  ;;  %v984_v30 = vsel %vm430_vm3, %v983_v23, %v968_v63 }
 0x128   : > { %4340 = vpow2.f32 %v1631_v50  ;;  %v1614_v51 = vsub.f32 0.0, %v1598_v60  ;;  %v5889_v58 = vadd.f32 %v3924_v46, %v5689_v12  ;;  %v1528_v61 = vpop.f32.mrb[7].mxu0  ;;  %v5931_v50 = vld [vmem:[%s959_s29] sm:$0x1]  ;;  %v5939_v48 = vsel %vm432_vm4, %v984_v30, %v971_v24  ;;  %s6295_s29 = sld [smem:[#allocation5 + %s1140_s30]]  ;;  %s7754_s30 = scalar_lea.vmem %s7477_s1, %s6092_s8 }
 0x129   : > { %4342 = vpow2.f32 %v1629_v4  ;;  %v1613_v57 = vsub.f32 0.0, %v1597_v35  ;;  %v5893_v5 = vadd.f32 %v5689_v12, %v1528_v61  ;;  %s6329_s8 = sld [smem:[#allocation5 + %s1177_s11]]  ;;  %s7759_s11 = scalar_lea.vmem %s7477_s1, %s6050_s4 }
 0x12a   : > { %v1635_v0 = vmul.f32 1.442695, %v1614_v51  ;;  %v1600_v2 = vand.u32 2147483647, %v5889_v58 }
 0x12b   : > { %v1633_v15 = vmul.f32 1.442695, %v1613_v57  ;;  %v1599_v17 = vand.u32 2147483647, %v5893_v5  ;;  %v3927_v55 = vpop.f32.mrb[8].mxu0 }
 0x12c   : > { %4344 = vpow2.f32 %v1635_v0  ;;  %v5914_v11 = vadd.f32 %v3927_v55, %v5689_v12  ;;  %v1538_v6 = vpop.f32.mrb[9].mxu0  ;;  %v1616_v28 = vsub.f32 0.0, %v1600_v2 }
 0x12d   : > { %4346 = vpow2.f32 %v1633_v15  ;;  %v1615_v37 = vsub.f32 0.0, %v1599_v17  ;;  %v5942_v54 = vadd.f32 %v5689_v12, %v1538_v6 }
 0x12e   : > { %v4337_v27 = vpop.eup %4336  ;;  %v1602_v35 = vand.u32 2147483647, %v5914_v11  ;;  %v1639_v61 = vmul.f32 1.442695, %v1616_v28  ;;  %s1142_s4 = scalar_lea.vmem %s7477_s1, %s6295_s29 }
 0x12f   : > { %v4339_v31 = vpop.eup %4338  ;;  %v1666_v56 = vadd.f32 1.0, %v4337_v27  ;;  %v1637_v32 = vmul.f32 1.442695, %v1615_v37  ;;  %v1669_v4 = vmul.f32 -0.5, %v4337_v27  ;;  %v5936_v46 = vpop.f32.mrb[10].mxu0 }
 0x130   : > { %v1657_v38 = vadd.f32 1.0, %v4339_v31  ;;  %v1660_v47 = vmul.f32 -0.5, %v4339_v31  ;;  %v1672_v53 = vand.u32 2147483647, %v4337_v27  ;;  %v1548_v51 = vpop.f32.mrb[11].mxu0  ;;  %v1618_v23 = vsub.f32 0.0, %v1602_v35 }
 0x131   : > { %4348 = vlog2.f32 %v1666_v56  ;;  %v1663_v63 = vand.u32 2147483647, %v4339_v31  ;;  %v1670_v17 = vadd.f32 1.0, %v1669_v4 }
 0x132   : > { %v4341_v49 = vpop.eup %4340  ;;  %4350 = vlog2.f32 %v1657_v38  ;;  %v1661_v37 = vadd.f32 1.0, %v1660_v47  ;;  %vm5953_vm10 = vcmp.lt.f32.partialorder %v1672_v53, 0.0004427343  ;;  %v1601_v38 = vand.u32 2147483647, %v5942_v54 }
 0x133   : > { %v5945_v16 = vpop.eup %4342  ;;  %4352 = vpow2.f32 %v1637_v32  ;;  %v1684_v0 = vadd.f32 1.0, %v4341_v49  ;;  %v1687_v2 = vmul.f32 -0.5, %v4341_v49  ;;  %v5947_v42 = vpop.f32.mrb[12].mxu0  ;;  %vm5967_vm11 = vcmp.lt.f32.partialorder %v1663_v63, 0.0004427343 }
 0x134   : > { %v1675_v15 = vadd.f32 1.0, %v5945_v16  ;;  %v5951_v6 = vpop.f32.mrb[13].mxu0  ;;  %v1678_v56 = vmul.f32 -0.5, %v5945_v16  ;;  %v1681_v32 = vand.u32 2147483647, %v5945_v16  ;;  %v1662_v60 = vmul.f32 %v4339_v31, %v1661_v37 }
 0x135   : > { %4354 = vlog2.f32 %v1684_v0  ;;  %v1688_v47 = vadd.f32 1.0, %v1687_v2  ;;  %v1690_v9 = vand.u32 2147483647, %v4341_v49  ;;  %v1643_v55 = vmul.f32 1.442695, %v1618_v23 }
 0x136   : > { %v5959_v30 = vpop.eup %4344  ;;  %4356 = vlog2.f32 %v1675_v15  ;;  %v1671_v15 = vmul.f32 %v4337_v27, %v1670_v17  ;;  %v1617_v63 = vsub.f32 0.0, %v1601_v38  ;;  %vm5980_vm12 = vcmp.lt.f32.partialorder %v1681_v32, 0.0004427343  ;;  %v1852_v32 = vpop.permute.xlu0 %1851 }
 0x137   : > { %v5965_v4 = vpop.eup %4346  ;;  %4358 = vpow2.f32 %v1639_v61  ;;  %v1702_v53 = vadd.f32 1.0, %v5959_v30  ;;  %v5972_v0 = vpop.f32.mrb[14].mxu0  ;;  %v1679_v61 = vadd.f32 1.0, %v1678_v56  ;;  %v1705_v27 = vmul.f32 -0.5, %v5959_v30 }
 0x138   : > { %v1693_v57 = vadd.f32 1.0, %v5965_v4  ;;  %v1696_v34 = vmul.f32 -0.5, %v5965_v4  ;;  %v5986_v31 = vpop.f32.mrb[15].mxu0  ;;  %v1689_v23 = vmul.f32 %v4341_v49, %v1688_v47  ;;  %v1699_v37 = vand.u32 2147483647, %v5965_v4 }
 0x139   : > { %4360 = vlog2.f32 %v1702_v53  ;;  %v1641_v38 = vmul.f32 1.442695, %v1617_v63  ;;  %v5990_v53 = vadd.f32 %v5689_v12, %v1548_v51  ;;  %vm5994_vm13 = vcmp.lt.f32.partialorder %v1690_v9, 0.0004427343  ;;  %v6008_v9 = vpop.permute.xlu1 %1861 }
 0x13a   : > { %4362 = vlog2.f32 %v1693_v57  ;;  %v1708_v28 = vand.u32 2147483647, %v5959_v30  ;;  %v1697_v63 = vadd.f32 1.0, %v1696_v34  ;;  %v6003_v51 = vadd.f32 %v5936_v46, %v5689_v12 }
 0x13b   : > { %v4349_v17 = vpop.eup %4348  ;;  %4364 = vpow2.f32 %v1643_v55  ;;  %v1680_v55 = vmul.f32 %v5945_v16, %v1679_v61  ;;  %v1706_v41 = vadd.f32 1.0, %v1705_v27  ;;  %vm6022_vm14 = vcmp.lt.f32.partialorder %v1699_v37, 0.0004427343 }
 0x13c   : > { %v4351_v56 = vpop.eup %4350  ;;  %v1668_v13 = vmul.f32 0.6931472, %v4349_v17  ;;  %4366 = vpow2.f32 %v1641_v38  ;;  %vm6031_vm15 = vcmp.lt.f32.partialorder %v1708_v28, 0.0004427343  ;;  %v1698_v27 = vmul.f32 %v5965_v4, %v1697_v63 }
 0x13d   : > { %v5999_v49 = vpop.eup %4352  ;;  %v1659_v47 = vmul.f32 0.6931472, %v4351_v56  ;;  %v1604_v37 = vand.u32 2147483647, %v6003_v51 }
 0x13e   : > { %v1674_v17 = vsel %vm5953_vm10, %v1671_v15, %v1668_v13  ;;  %v1711_v34 = vadd.f32 1.0, %v5999_v49  ;;  %v1603_v13 = vand.u32 2147483647, %v5990_v53  ;;  %v1717_v2 = vand.u32 2147483647, %v5999_v49 }
 0x13f   : > { %v4355_v46 = vpop.eup %4354  ;;  %v1665_v38 = vsel %vm5967_vm11, %v1662_v60, %v1659_v47  ;;  %v1802_v56 = vadd.f32 %v1674_v17, %v1578_v14  ;;  %v1707_v47 = vmul.f32 %v5959_v30, %v1706_v41  ;;  %v1714_v17 = vmul.f32 -0.5, %v5999_v49 }
 0x140   : > { %v4357_v24 = vpop.eup %4356  ;;  %v1801_v15 = vadd.f32 %v1665_v38, %v1577_v59  ;;  %v1686_v61 = vmul.f32 0.6931472, %v4355_v46  ;;  %4368 = vlog2.f32 %v1711_v34  ;;  %v1857_v59 = vpop.permute.xlu0 %1856  ;;  %v1619_v57 = vsub.f32 0.0, %v1603_v13 }
 0x141   : > { %v6038_v25 = vpop.eup %4358  ;;  %v1677_v14 = vmul.f32 0.6931472, %v4357_v24  ;;  %v3638_v60 = vadd.f32 -0.6931472, %v1802_v56  ;;  %v1867_v38 = vpop.permute.xlu1 %1866  ;;  %vm1718_vm0 = vcmp.lt.f32.partialorder %v1717_v2, 0.0004427343 }
 0x142   : > { %v3637_v44 = vadd.f32 -0.6931472, %v1801_v15  ;;  %v1692_v28 = vsel %vm5994_vm13, %v1689_v23, %v1686_v61  ;;  %v1645_v24 = vmul.f32 1.442695, %v1619_v57  ;;  %v1720_v15 = vadd.f32 1.0, %v6038_v25 }
 0x143   : > { %v4361_v4 = vpop.eup %4360  ;;  %v1683_v63 = vsel %vm5980_vm12, %v1680_v55, %v1677_v14  ;;  %v1930_v34 = vmul.f32 %v3638_v60, %v1857_v59  ;;  %v1804_v46 = vadd.f32 %v1692_v28, %v1580_v7  ;;  %v6064_v55 = vld [vmem:[%s996_s15] sm:$0x1]  ;;  %v7741_v28 = vmax.f32 %v5870_v33, 0.0  ;;  %s1132_s15 = sadd.s32 101, %s4732_s16 }
 0x144   : > { %v4363_v41 = vpop.eup %4362  ;;  %v1929_v30 = vmul.f32 %v3637_v44, %v1852_v32  ;;  %v1803_v23 = vadd.f32 %v1683_v63, %v1579_v18  ;;  %v1704_v56 = vmul.f32 0.6931472, %v4361_v4  ;;  %v1715_v44 = vadd.f32 1.0, %v1714_v17  ;;  %s6277_s19 = sld [smem:[#allocation5 + %s1132_s15]]  ;;  %s7756_s15 = scalar_lea.vmem %s7477_s1, %s6104_s18 }
 0x145   : > { %v1962_v52 = vmul.f32 %v1930_v34, %v5736_v39  ;;  %v3640_v7 = vadd.f32 -0.6931472, %v1804_v46  ;;  %v1695_v13 = vmul.f32 0.6931472, %v4363_v41  ;;  %v6077_v3 = vpop.eup %4364  ;;  %4370 = vlog2.f32 %v1720_v15  ;;  %v1877_v17 = vpop.permute.xlu1 %1876  ;;  %s7757_s18 = scalar_lea.vmem %s7477_s1, %s6058_s22 }
 0x146   : > { %v1961_v18 = vmul.f32 %v1929_v30, %v5726_v22  ;;  %v3639_v32 = vadd.f32 -0.6931472, %v1803_v23  ;;  %v1710_v39 = vsel %vm6031_vm15, %v1707_v47, %v1704_v56  ;;  %v6086_v61 = vpop.eup %4366  ;;  %4372 = vpow2.f32 %v1645_v24 }
 0x147   : > { %v1932_v14 = vmul.f32 %v3640_v7, %v1867_v38  ;;  %v1701_v60 = vsel %vm6022_vm14, %v1698_v27, %v1695_v13  ;;  %v1806_v22 = vadd.f32 %v1710_v39, %v1582_v43  ;;  %v1023_v16 = vrot.slane %v6064_v55, 7 }
 0x148   : > { %v1931_v35 = vmul.f32 %v3639_v32, %v6008_v9  ;;  %v6096_v59 = vpack.c.bf16 %v1962_v52, %v1961_v18  ;;  %v1805_v47 = vadd.f32 %v1701_v60, %v7741_v28  ;;  %v1620_v4 = vsub.f32 0.0, %v1604_v37 }
 0x149   : > { %v1964_v29 = vmul.f32 %v1932_v14, %v5754_v62  ;;  %v3642_v43 = vadd.f32 -0.6931472, %v1806_v22  ;;  %v1729_v63 = vadd.f32 1.0, %v6086_v61  ;;  %v1872_v62 = vpop.permute.xlu0 %1871  ;;  %v1723_v37 = vmul.f32 -0.5, %v6038_v25  ;;  %v1887_v55 = vpop.permute.xlu1 %1886 }
 0x14a   : > { %v4369_v33 = vpop.eup %4368  ;;  %v1963_v9 = vmul.f32 %v1931_v35, %v5731_v36  ;;  %v3641_v27 = vadd.f32 -0.6931472, %v1805_v47  ;;  %4170 = vmatprep.subr.bf16.mxu1 %v6096_v59  ;;  %4202 = vmatprep.subr.bf16.mxu0 %v6096_v59  ;;  %v1716_v36 = vmul.f32 %v5999_v49, %v1715_v44  ;;  %v1586_v41 = vmax.f32 %v5914_v11, 0.0  ;;  %v993_v47 = vld [vmem:[%s992_s6] sm:$0x1]  ;;  %s6265_s6 = sld [smem:[#allocation5 + %s1124_s25]]  ;;  %s1134_s22 = scalar_lea.vmem %s7477_s1, %s6277_s19 }
 0x14b   : > { %v1934_v34 = vmul.f32 %v3642_v43, %v1877_v17  ;;  %v1713_v46 = vmul.f32 0.6931472, %v4369_v33  ;;  %4172 = vmatpush3.bf16.msra.mxu1 %v6096_v59  ;;  %4204 = vmatpush3.bf16.msra.mxu0 %v6096_v59  ;;  %4374 = vlog2.f32 %v1729_v63  ;;  %v6142_v38 = vadd.f32 %v5947_v42, %v5689_v12 }
 0x14c   : > { %v6133_v57 = vpack.c.bf16 %v1964_v29, %v1963_v9  ;;  %v1933_v49 = vmul.f32 %v3641_v27, %v1872_v62  ;;  %v1585_v2 = vmax.f32 %v5942_v54, 0.0  ;;  %v7742_v52 = vmax.f32 %v5893_v5, 0.0  ;;  %v1001_v29 = vld [vmem:[%s1000_s5] sm:$0x1]  ;;  %s1136_s5 = sadd.s32 102, %s4732_s16 }
 0x14d   : > { %v1966_v30 = vmul.f32 %v1934_v34, %v5840_v20  ;;  %v1719_v23 = vsel %vm1718_vm0, %v1716_v36, %v1713_v46  ;;  %v1732_v20 = vmul.f32 -0.5, %v6086_v61  ;;  %v1724_v42 = vadd.f32 1.0, %v1723_v37  ;;  %v1882_v17 = vpop.permute.xlu0 %1881  ;;  %s6285_s25 = sld [smem:[#allocation5 + %s1136_s5]] }
 0x14e   : > { %v1965_v56 = vmul.f32 %v1933_v49, %v5759_v8  ;;  %v1807_v7 = vadd.f32 %v1719_v23, %v7742_v52  ;;  %4174 = vmatprep.subr.bf16.mxu1 %v6133_v57  ;;  %4206 = vmatprep.subr.bf16.mxu0 %v6133_v57  ;;  %v1647_v8 = vmul.f32 1.442695, %v1620_v4  ;;  %v6166_v5 = vadd.f32 %v5689_v12, %v5951_v6  ;;  %v6262_v23 = vld [vmem:[%s7749_s17] sm:$0x1]  ;;  %s6337_s5 = sld [smem:[#allocation5 + %s1181_s26]]  ;;  %s1179_s17 = scalar_lea.vmem %s7477_s1, %s6329_s8 }
 0x14f   : > { %v1738_v13 = vadd.f32 1.0, %v6077_v3  ;;  %4176 = vmatpush3.bf16.msra.mxu1 %v6133_v57  ;;  %4208 = vmatpush3.bf16.msra.mxu0 %v6133_v57  ;;  %v1726_v18 = vand.u32 2147483647, %v6038_v25  ;;  %v1735_v6 = vand.u32 2147483647, %v6086_v61  ;;  %v7743_v32 = vrot.slane %v5906_v45, 3  ;;  %v4371_v45 = vpop.eup %4370  ;;  %s7767_s26 = scalar_lea.vmem %s7477_s1, %s6173_s23 }
 0x150   : > { %v6177_v24 = vpack.c.bf16 %v1966_v30, %v1965_v56  ;;  %v3643_v15 = vadd.f32 -0.6931472, %v1807_v7  ;;  %v1606_v14 = vand.u32 2147483647, %v6142_v38  ;;  %v1605_v60 = vand.u32 2147483647, %v6166_v5 }
 0x151   : > { %v986_v39 = vsel %vm434_vm5, %v5939_v48, %v7743_v32  ;;  %4376 = vlog2.f32 %v1738_v13  ;;  %v1588_v48 = vmax.f32 %v6003_v51, 0.0  ;;  %v7744_v22 = vrot.slane %v5851_v26, 1  ;;  %v6223_v26 = vpop.eup %4372  ;;  %s1250_s8 = sadd.s32 116, %s4732_s16  ;;  %s1311_s23 = sadd.s32 124, %s4732_s16 }
 0x152   : > { %v1733_v35 = vadd.f32 1.0, %v1732_v20  ;;  %v1741_v28 = vmul.f32 -0.5, %v6077_v3  ;;  %4178 = vmatprep.subr.bf16.mxu1 %v6177_v24  ;;  %4210 = vmatprep.subr.bf16.mxu0 %v6177_v24  ;;  %v1725_v43 = vmul.f32 %v6038_v25, %v1724_v42  ;;  %v7745_v33 = vrot.slane %v5916_v21, 2  ;;  %v1005_v21 = vld [vmem:[%s1004_s7] sm:$0x1]  ;;  %s7753_s7 = scalar_lea.vmem %s7477_s1, %s6083_s10 }
 0x153   : > { %v6203_v44 = vsel %vm438_vm7, %v5929_v40, %v7744_v22  ;;  %v1722_v40 = vmul.f32 0.6931472, %v4371_v45  ;;  %v1744_v27 = vand.u32 2147483647, %v6077_v3  ;;  %4180 = vmatpush3.bf16.msra.mxu1 %v6177_v24  ;;  %4212 = vmatpush3.bf16.msra.mxu0 %v6177_v24  ;;  %4378 = vpow2.f32 %v1647_v8  ;;  %v6307_v45 = vld [vmem:[%s7753_s7] sm:$0x1] }
 0x154   : > { %v987_v9 = vsel %vm436_vm6, %v986_v39, %v7745_v33  ;;  %v1587_v4 = vmax.f32 %v5990_v53, 0.0  ;;  %vm1727_vm8 = vcmp.lt.f32.partialorder %v1726_v18, 0.0004427343  ;;  %v1621_v25 = vsub.f32 0.0, %v1605_v60  ;;  %s1185_s7 = sadd.s32 107, %s4732_s16 }
 0x155   : > { %v1935_v63 = vmul.f32 %v3643_v15, %v1882_v17  ;;  %v1728_v62 = vsel %vm1727_vm8, %v1725_v43, %v1722_v40  ;;  %vm6248_vm9 = vcmp.lt.f32.partialorder %v1735_v6, 0.0004427343  ;;  %v1622_v46 = vsub.f32 0.0, %v1606_v14  ;;  %v4375_v36 = vpop.eup %4374  ;;  %v1892_v40 = vpop.permute.xlu0 %1891  ;;  %s6371_s10 = sld [smem:[#allocation5 + %s1185_s7]]  ;;  %s1138_s7 = scalar_lea.vmem %s7477_s1, %s6285_s25 }
 0x156   : > { %v7748_v37 = vmax.f32 %v5889_v58, 0.0  ;;  %v1742_v30 = vadd.f32 1.0, %v1741_v28  ;;  %v1026_v56 = vrot.slane %v1001_v29, 6  ;;  %v1747_v52 = vadd.f32 1.0, %v6223_v26 }
 0x157   : > { %v1731_v7 = vmul.f32 0.6931472, %v4375_v36  ;;  %v1734_v20 = vmul.f32 %v6086_v61, %v1733_v35  ;;  %vm6270_vm10 = vcmp.lt.f32.partialorder %v1744_v27, 0.0004427343  ;;  %v1043_v8 = vsel %vm426_vm1, %v993_v47, %v1023_v16  ;;  %v6326_v35 = vld [vmem:[%s7755_s14] sm:$0x1]  ;;  %s7758_s14 = scalar_lea.vmem %s7477_s1, %s6108_s20  ;;  %s7769_s20 = scalar_lea.vmem %s7477_s1, %s6267_s27 }
 0x158   : > { %v1808_v49 = vadd.f32 %v1728_v62, %v7748_v37  ;;  %v1649_v13 = vmul.f32 1.442695, %v1621_v25  ;;  %v7752_v18 = vrot.slane %v5931_v50, 1  ;;  %4380 = vlog2.f32 %v1747_v52  ;;  %v1066_v27 = vld [vmem:[%s7756_s15] sm:$0x1]  ;;  %s1118_s15 = scalar_lea.vmem %s7477_s1, %s6246_s0  ;;  %s1201_s0 = sadd.s32 111, %s4732_s16 }
 0x159   : > { %v1737_v61 = vsel %vm6248_vm9, %v1734_v20, %v1731_v7  ;;  %v1029_v16 = vrot.slane %v1005_v21, 5  ;;  %v1750_v32 = vmul.f32 -0.5, %v6223_v26  ;;  %v6293_v50 = vadd.f32 %v5972_v0, %v5689_v12  ;;  %v6314_v0 = vld [vmem:[%s7754_s30] sm:$0x1]  ;;  %s6511_s30 = sld [smem:[#allocation5 + %s1197_s24]]  ;;  %s1234_s24 = sadd.s32 112, %s4732_s16 }
 0x15a   : > { %v3644_v42 = vadd.f32 -0.6931472, %v1808_v49  ;;  %v6283_v6 = vsel %vm438_vm7, %v987_v9, %v7752_v18  ;;  %v1967_v39 = vmul.f32 %v1935_v63, %v5875_v19  ;;  %v1809_v14 = vadd.f32 %v1737_v61, %v1585_v2  ;;  %v6382_v36 = vld [vmem:[%s7758_s14] sm:$0x1]  ;;  %s1189_s14 = sadd.s32 108, %s4732_s16  ;;  %s1242_s27 = sadd.s32 114, %s4732_s16 }
 0x15b   : > { %v1044_v60 = vsel %vm428_vm2, %v1043_v8, %v1026_v56  ;;  %v4377_v19 = vpop.eup %4376  ;;  %v1590_v54 = vmax.f32 %v6142_v38, 0.0  ;;  %v1651_v2 = vmul.f32 1.442695, %v1622_v46  ;;  %v1743_v22 = vmul.f32 %v6077_v3, %v1742_v30 }
 0x15c   : > { %v1936_v15 = vmul.f32 %v3644_v42, %v1887_v55  ;;  %v1032_v28 = vrot.slane %v6262_v23, 4  ;;  %v3645_v29 = vadd.f32 -0.6931472, %v1809_v14  ;;  %4382 = vpow2.f32 %v1649_v13  ;;  %v6407_v23 = vld [vmem:[%s7759_s11] sm:$0x1]  ;;  %s7761_s11 = scalar_lea.vmem %s7477_s1, %s6117_s9  ;;  %s6466_s9 = sld [smem:[#allocation5 + %s1189_s14]] }
 0x15d   : > { %v1740_v3 = vmul.f32 0.6931472, %v4377_v19  ;;  %v1045_v43 = vsel %vm430_vm3, %v1044_v60, %v1029_v16  ;;  %v1751_v33 = vadd.f32 1.0, %v1750_v32  ;;  %v1608_v9 = vand.u32 2147483647, %v6293_v50  ;;  %v6355_v17 = vpop.eup %4378  ;;  %s1183_s14 = scalar_lea.vmem %s7477_s1, %s6337_s5 }
 0x15e   : > { %v1968_v47 = vmul.f32 %v1936_v15, %v5903_v10  ;;  %v6343_v10 = vadd.f32 %v5689_v12, %v5986_v31  ;;  %v1937_v21 = vmul.f32 %v3645_v29, %v1892_v40  ;;  %v1054_v31 = vld [vmem:[%s7757_s18] sm:$0x1]  ;;  %v1084_v63 = vrot.slane %v6307_v45, 7  ;;  %s7760_s18 = scalar_lea.vmem %s7477_s1, %s6052_s13 }
 0x15f   : > { %v1746_v12 = vsel %vm6270_vm10, %v1743_v22, %v1740_v3  ;;  %v1589_v62 = vmax.f32 %v6166_v5, 0.0  ;;  %v1087_v37 = vrot.slane %v6314_v0, 6  ;;  %4384 = vpow2.f32 %v1651_v2  ;;  %v6427_v8 = vld [vmem:[%s7760_s18] sm:$0x1]  ;;  %s1175_s18 = scalar_lea.vmem %s7477_s1, %s6316_s21 }
 0x160   : > { %v6357_v25 = vpack.c.bf16 %v1968_v47, %v1967_v39  ;;  %v1810_v34 = vadd.f32 %v1746_v12, %v1586_v41  ;;  %v1607_v46 = vand.u32 2147483647, %v6343_v10  ;;  %v1035_v11 = vrot.slane %v6326_v35, 3  ;;  %v6434_v13 = vld [vmem:[%s7761_s11] sm:$0x1]  ;;  %s1193_s11 = sadd.s32 109, %s4732_s16 }
 0x161   : > { %v1753_v41 = vand.u32 2147483647, %v6223_v26  ;;  %v1090_v49 = vrot.slane %v1066_v27, 5  ;;  %v1046_v56 = vsel %vm432_vm4, %v1045_v43, %v1032_v28  ;;  %v1752_v52 = vmul.f32 %v6223_v26, %v1751_v33  ;;  %v1897_v26 = vpop.permute.xlu1 %1896  ;;  %v6451_v16 = vld [vmem:[%s7762_s12] sm:$0x1]  ;;  %s6493_s13 = sld [smem:[#allocation5 + %s1193_s11]] }
 0x162   : > { %4182 = vmatprep.subr.bf16.mxu1 %v6357_v25  ;;  %4214 = vmatprep.subr.bf16.mxu0 %v6357_v25  ;;  %v3646_v30 = vadd.f32 -0.6931472, %v1810_v34  ;;  %v1623_v7 = vsub.f32 0.0, %v1607_v46  ;;  %v4381_v20 = vpop.eup %4380  ;;  %v1969_v58 = vmul.f32 %v1937_v21, %v6203_v44  ;;  %v1624_v42 = vsub.f32 0.0, %v1608_v9  ;;  %v1119_v15 = vld [vmem:[%s1118_s15] sm:$0x1]  ;;  %s7765_s15 = scalar_lea.vmem %s7477_s1, %s6185_s28  ;;  %s7766_s28 = scalar_lea.vmem %s7477_s1, %s6252_s2 }
 0x163   : > { %4184 = vmatpush3.bf16.msra.mxu1 %v6357_v25  ;;  %4216 = vmatpush3.bf16.msra.mxu0 %v6357_v25  ;;  %v1104_v18 = vsel %vm426_vm1, %v1054_v31, %v1084_v63  ;;  %v1756_v44 = vadd.f32 1.0, %v6355_v17  ;;  %v1749_v61 = vmul.f32 0.6931472, %v4381_v20  ;;  %v1093_v32 = vrot.slane %v6382_v36, 4  ;;  %v1115_v0 = vld [vmem:[%s7765_s15] sm:$0x1]  ;;  %s1191_s15 = scalar_lea.vmem %s7477_s1, %s6466_s9  ;;  %s7772_s9 = scalar_lea.vmem %s7477_s1, %s6371_s10 }
 0x164   : > { %v1938_v55 = vmul.f32 %v3646_v30, %v1897_v26  ;;  %v1105_v39 = vsel %vm428_vm2, %v1104_v18, %v1087_v37  ;;  %vm6468_vm11 = vcmp.lt.f32.partialorder %v1753_v41, 0.0004427343  ;;  %v1653_v60 = vmul.f32 1.442695, %v1623_v7  ;;  %v1123_v28 = vld [vmem:[%s7766_s28] sm:$0x1]  ;;  %s7768_s28 = scalar_lea.vmem %s7477_s1, %s6265_s6 }
 0x165   : > { %v1106_v45 = vsel %vm430_vm3, %v1105_v39, %v1090_v49  ;;  %4386 = vlog2.f32 %v1756_v44  ;;  %v1038_v2 = vrot.slane %v6407_v23, 2  ;;  %v1755_v22 = vsel %vm6468_vm11, %v1752_v52, %v1749_v61  ;;  %v6504_v3 = vld [vmem:[%s7767_s26] sm:$0x1]  ;;  %s6535_s2 = sld [smem:[#allocation5 + %s1201_s0]]  ;;  %s1238_s0 = sadd.s32 113, %s4732_s16 }
 0x166   : > { %v1970_v19 = vmul.f32 %v1938_v55, %v6283_v6  ;;  %v1759_v35 = vmul.f32 -0.5, %v6355_v17  ;;  %v6496_v47 = vpop.eup %4382  ;;  %v1041_v6 = vrot.slane %v6427_v8, 1  ;;  %v1655_v29 = vmul.f32 1.442695, %v1624_v42  ;;  %v6523_v12 = vld [vmem:[%s7768_s28] sm:$0x1] }
 0x167   : > { %v1096_v40 = vrot.slane %v6434_v13, 3  ;;  %v1145_v43 = vrot.slane %v1119_v15, 7  ;;  %v1047_v9 = vsel %vm434_vm5, %v1046_v56, %v1035_v11  ;;  %v1591_v27 = vmax.f32 %v6343_v10, 0.0  ;;  %v1180_v46 = vld [vmem:[%s1179_s17] sm:$0x1]  ;;  %s6537_s6 = sld [smem:[#allocation5 + %s1234_s24]]  ;;  %s1195_s28 = scalar_lea.vmem %s7477_s1, %s6493_s13 }
 0x168   : > { %v6513_v33 = vpack.c.bf16 %v1970_v19, %v1969_v58  ;;  %v1107_v21 = vsel %vm432_vm4, %v1106_v45, %v1093_v32  ;;  %v1811_v31 = vadd.f32 %v1755_v22, %v1587_v4  ;;  %4388 = vpow2.f32 %v1653_v60  ;;  %v6545_v4 = vld [vmem:[%s7769_s20] sm:$0x1]  ;;  %s6583_s11 = sld [smem:[#allocation5 + %s1238_s0]]  ;;  %s1246_s26 = sadd.s32 115, %s4732_s16 }
 0x169   : > { %v1099_v63 = vrot.slane %v6451_v16, 2  ;;  %v1148_v34 = vrot.slane %v1123_v28, 6  ;;  %v1760_v36 = vadd.f32 1.0, %v1759_v35  ;;  %v1762_v53 = vand.u32 2147483647, %v6355_v17  ;;  %v6567_v30 = vpop.eup %4384  ;;  %s6585_s24 = sld [smem:[#allocation5 + %s1242_s27]]  ;;  %s1199_s0 = scalar_lea.vmem %s7477_s1, %s6511_s30 }
 0x16a   : > { %v6552_v37 = vld [vmem:[%s1134_s22] sm:$0x1]  ;;  %v1165_v41 = vsel %vm426_vm1, %v1115_v0, %v1145_v43  ;;  %v1765_v49 = vadd.f32 1.0, %v6496_v47  ;;  %4186 = vmatprep.subr.bf16.mxu1 %v6513_v33  ;;  %4218 = vmatprep.subr.bf16.mxu0 %v6513_v33  ;;  %v1048_v23 = vsel %vm436_vm6, %v1047_v9, %v1038_v2  ;;  %4390 = vpow2.f32 %v1655_v29  ;;  %s6604_s12 = sld [smem:[#allocation5 + %s1246_s26]]  ;;  %v1902_v2 = vpop.permute.xlu0 %1901  ;;  %s1262_s13 = sadd.s32 119, %s4732_s16 }
 0x16b   : > { %v6559_v11 = vld [vmem:[%s1138_s7] sm:$0x1]  ;;  %v1108_v56 = vsel %vm434_vm5, %v1107_v21, %v1096_v40  ;;  %4188 = vmatpush3.bf16.msra.mxu1 %v6513_v33  ;;  %4220 = vmatpush3.bf16.msra.mxu0 %v6513_v33  ;;  %v1102_v20 = vrot.slane %v6504_v3, 1  ;;  %v1151_v58 = vrot.slane %v6523_v12, 5  ;;  %v1206_v42 = vrot.slane %v1180_v46, 7  ;;  %s1203_s25 = scalar_lea.vmem %s7477_s1, %s6535_s2  ;;  %s1299_s30 = sadd.s32 121, %s4732_s16 }
 0x16c   : > { %v6576_v52 = vld [vmem:[%s1142_s4] sm:$0x1]  ;;  %4392 = vlog2.f32 %v1765_v49  ;;  %v3647_v13 = vadd.f32 -0.6931472, %v1811_v31  ;;  %v1166_v18 = vsel %vm428_vm2, %v1165_v41, %v1148_v34  ;;  %v1768_v44 = vmul.f32 -0.5, %v6496_v47  ;;  %s6643_s4 = sld [smem:[#allocation5 + %s1250_s8]] }
 0x16d   : > { %v1184_v7 = vld [vmem:[%s1183_s14] sm:$0x1]  ;;  %v1771_v55 = vand.u32 2147483647, %v6496_v47  ;;  %v1109_v61 = vsel %vm436_vm6, %v1108_v56, %v1099_v63  ;;  %v1761_v16 = vmul.f32 %v6355_v17, %v1760_v36  ;;  %vm6608_vm12 = vcmp.lt.f32.partialorder %v1762_v53, 0.0004427343  ;;  %s1236_s29 = scalar_lea.vmem %s7477_s1, %s6537_s6 }
 0x16e   : > { %v1176_v26 = vld [vmem:[%s1175_s18] sm:$0x1]  ;;  %v1209_v15 = vrot.slane %v1184_v7, 6  ;;  %v1154_v60 = vrot.slane %v6545_v4, 4  ;;  %v1157_v17 = vrot.slane %v6552_v37, 3  ;;  %v1160_v45 = vrot.slane %v6559_v11, 2 }
 0x16f   : > { %v1188_v39 = vld [vmem:[%s7772_s9] sm:$0x1]  ;;  %v4387_v14 = vpop.eup %4386  ;;  %v1226_v19 = vsel %vm426_vm1, %v1176_v26, %v1206_v42  ;;  %v1163_v35 = vrot.slane %v6576_v52, 1  ;;  %v1167_v28 = vsel %vm430_vm3, %v1166_v18, %v1151_v58  ;;  %v1774_v29 = vadd.f32 1.0, %v6567_v30  ;;  %s1244_s18 = scalar_lea.vmem %s7477_s1, %s6585_s24  ;;  %s1254_s6 = sadd.s32 117, %s4732_s16  ;;  %v1907_v26 = vpop.permute.xlu1 %1906 }
 0x170   : > { %v6625_v0 = vld [vmem:[%s1191_s15] sm:$0x1]  ;;  %v1758_v22 = vmul.f32 0.6931472, %v4387_v14  ;;  %v1939_v3 = vmul.f32 %v3647_v13, %v1902_v2  ;;  %v1769_v40 = vadd.f32 1.0, %v1768_v44  ;;  %v1212_v9 = vrot.slane %v1188_v39, 5  ;;  %s1240_s15 = scalar_lea.vmem %s7477_s1, %s6583_s11  ;;  %s1248_s8 = scalar_lea.vmem %s7477_s1, %s6604_s12 }
 0x171   : > { %vm6645_vm13 = vcmp.lt.f32.partialorder %v1771_v55, 0.0004427343  ;;  %v1049_v21 = vsel %vm438_vm7, %v1048_v23, %v1041_v6  ;;  %v1227_v31 = vsel %vm428_vm2, %v1226_v19, %v1209_v15  ;;  %4394 = vlog2.f32 %v1774_v29  ;;  %v1241_v63 = vld [vmem:[%s1240_s15] sm:$0x1]  ;;  %s1258_s11 = sadd.s32 118, %s4732_s16  ;;  %s6680_s17 = sld [smem:[#allocation5 + %s1254_s6]] }
 0x172   : > { %v1764_v12 = vsel %vm6608_vm12, %v1761_v16, %v1758_v22  ;;  %v1245_v34 = vld [vmem:[%s1244_s18] sm:$0x1]  ;;  %v6665_v46 = vpop.eup %4388  ;;  %v1168_v8 = vsel %vm432_vm4, %v1167_v28, %v1154_v60  ;;  %v1215_v53 = vrot.slane %v6625_v0, 4  ;;  %v1110_v51 = vsel %vm438_vm7, %v1109_v61, %v1102_v20  ;;  %s6684_s10 = sld [smem:[#allocation5 + %s1258_s11]]  ;;  %s1307_s11 = sadd.s32 123, %s4732_s16 }
 0x173   : > { %v1812_v36 = vadd.f32 %v1764_v12, %v1588_v48  ;;  %v1196_v6 = vld [vmem:[%s1195_s28] sm:$0x1]  ;;  %v1777_v48 = vmul.f32 -0.5, %v6567_v30  ;;  %v1267_v41 = vrot.slane %v1241_v63, 7  ;;  %v1971_v23 = vmul.f32 %v1939_v3, %v1049_v21  ;;  %s6690_s12 = sld [smem:[#allocation5 + %s1262_s13]]  ;;  %s1295_s28 = sadd.s32 120, %s4732_s16 }
 0x174   : > { %v1237_v4 = vld [vmem:[%s1236_s29] sm:$0x1]  ;;  %v6687_v49 = vpop.eup %4390  ;;  %v1228_v7 = vsel %vm430_vm3, %v1227_v31, %v1212_v9  ;;  %v1270_v58 = vrot.slane %v1245_v34, 6  ;;  %v1169_v42 = vsel %vm434_vm5, %v1168_v8, %v1157_v17  ;;  %v1218_v18 = vrot.slane %v1196_v6, 3  ;;  %s1252_s29 = scalar_lea.vmem %s7477_s1, %s6643_s4  ;;  %s6705_s5 = sld [smem:[#allocation5 + %s1295_s28]] }
 0x175   : > { %v1249_v37 = vld [vmem:[%s1248_s8] sm:$0x1]  ;;  %v3648_v56 = vadd.f32 -0.6931472, %v1812_v36  ;;  %v1287_v44 = vsel %vm426_vm1, %v1237_v4, %v1267_v41  ;;  %v1783_v55 = vadd.f32 1.0, %v6665_v46  ;;  %v1770_v32 = vmul.f32 %v6496_v47, %v1769_v40  ;;  %s6712_s4 = sld [smem:[#allocation5 + %s1299_s30]] }
 0x176   : > { %v4393_v20 = vpop.eup %4392  ;;  %v1200_v13 = vld [vmem:[%s1199_s0] sm:$0x1]  ;;  %v1780_v39 = vand.u32 2147483647, %v6567_v30  ;;  %s1303_s0 = sadd.s32 122, %s4732_s16  ;;  %v1229_v15 = vsel %vm432_vm4, %v1228_v7, %v1215_v53  ;;  %v1778_v14 = vadd.f32 1.0, %v1777_v48  ;;  %v1288_v2 = vsel %vm428_vm2, %v1287_v44, %v1270_v58  ;;  %v1912_v48 = vpop.permute.xlu0 %1911 }
 0x177   : > { %v1940_v61 = vmul.f32 %v3648_v56, %v1907_v26  ;;  %v1767_v16 = vmul.f32 0.6931472, %v4393_v20  ;;  %v1253_v60 = vld [vmem:[%s1252_s29] sm:$0x1]  ;;  %v1273_v17 = vrot.slane %v1249_v37, 5  ;;  %4396 = vlog2.f32 %v1783_v55  ;;  %s6714_s14 = sld [smem:[#allocation5 + %s1303_s0]]  ;;  %s1256_s6 = scalar_lea.vmem %s7477_s1, %s6680_s17 }
 0x178   : > { %v1204_v19 = vld [vmem:[%s1203_s25] sm:$0x1]  ;;  %v1792_v22 = vadd.f32 1.0, %v6687_v49  ;;  %v1221_v29 = vrot.slane %v1200_v13, 2  ;;  %v1786_v3 = vmul.f32 -0.5, %v6665_v46  ;;  %s6734_s2 = sld [smem:[#allocation5 + %s1307_s11]]  ;;  %v1230_v9 = vsel %vm434_vm5, %v1229_v15, %v1218_v18  ;;  %s1260_s9 = scalar_lea.vmem %s7477_s1, %s6684_s10 }
 0x179   : > { %v1972_v0 = vmul.f32 %v1940_v61, %v1110_v51  ;;  %v1773_v47 = vsel %vm6645_vm13, %v1770_v32, %v1767_v16  ;;  %v1789_v40 = vand.u32 2147483647, %v6665_v46  ;;  %v1257_v21 = vld [vmem:[%s1256_s6] sm:$0x1]  ;;  %v1276_v5 = vrot.slane %v1253_v60, 4  ;;  %s6752_s13 = sld [smem:[#allocation5 + %s1311_s23]]  ;;  %s1264_s19 = scalar_lea.vmem %s7477_s1, %s6690_s12 }
 0x17a   : > { %v1813_v28 = vadd.f32 %v1773_v47, %v1589_v62  ;;  %4398 = vlog2.f32 %v1792_v22  ;;  %v1170_v12 = vsel %vm436_vm6, %v1169_v42, %v1160_v45  ;;  %v1224_v63 = vrot.slane %v1204_v19, 1  ;;  %s1297_s17 = scalar_lea.vmem %s7477_s1, %s6705_s5  ;;  %s1315_s7 = sadd.s32 125, %s4732_s16  ;;  %v1261_v20 = vld [vmem:[%s1260_s9] sm:$0x1] }
 0x17b   : > { %v6736_v43 = vpack.c.bf16 %v1972_v0, %v1971_v23  ;;  %v4395_v62 = vpop.eup %4394  ;;  %v1289_v34 = vsel %vm430_vm3, %v1288_v2, %v1273_v17  ;;  %v1779_v8 = vmul.f32 %v6567_v30, %v1778_v14  ;;  %vm6755_vm14 = vcmp.lt.f32.partialorder %v1780_v39, 0.0004427343  ;;  %v1298_v51 = vld [vmem:[%s1297_s17] sm:$0x1]  ;;  %s1301_s5 = scalar_lea.vmem %s7477_s1, %s6712_s4  ;;  %s6785_s26 = sld [smem:[#allocation5 + %s1315_s7]]  ;;  %v1917_v39 = vpop.permute.xlu1 %1916 }
 0x17c   : > { %v3649_v31 = vadd.f32 -0.6931472, %v1813_v28  ;;  %v1776_v36 = vmul.f32 0.6931472, %v4395_v62  ;;  %v1795_v11 = vmul.f32 -0.5, %v6687_v49  ;;  %v1231_v45 = vsel %vm436_vm6, %v1230_v9, %v1221_v29  ;;  %s1319_s4 = sadd.s32 126, %s4732_s16 }
 0x17d   : > { %4190 = vmatprep.subr.bf16.mxu1 %v6736_v43  ;;  %4222 = vmatprep.subr.bf16.mxu0 %v6736_v43  ;;  %v1279_v53 = vrot.slane %v1257_v21, 3  ;;  %v1787_v30 = vadd.f32 1.0, %v1786_v3  ;;  %vm6768_vm15 = vcmp.lt.f32.partialorder %v1789_v40, 0.0004427343  ;;  %s1305_s15 = scalar_lea.vmem %s7477_s1, %s6714_s14  ;;  %v1290_v41 = vsel %vm432_vm4, %v1289_v34, %v1276_v5  ;;  %v1302_v23 = vld [vmem:[%s1301_s5] sm:$0x1] }
 0x17e   : > { %4192 = vmatpush3.bf16.msra.mxu1 %v6736_v43  ;;  %4224 = vmatpush3.bf16.msra.mxu0 %v6736_v43  ;;  %v1782_v37 = vsel %vm6755_vm14, %v1779_v8, %v1776_v36  ;;  %v1306_v56 = vld [vmem:[%s1305_s15] sm:$0x1]  ;;  %v1941_v7 = vmul.f32 %v3649_v31, %v1912_v48  ;;  %s1309_s11 = scalar_lea.vmem %s7477_s1, %s6734_s2  ;;  %s6799_s25 = sld [smem:[#allocation5 + %s1319_s4]]  ;;  %v1328_v26 = vrot.slane %v1302_v23, 7  ;;  %v1171_v13 = vsel %vm438_vm7, %v1170_v12, %v1163_v35  ;;  %v1922_v8 = vpop.permute.xlu0 %1921 }
 0x17f   : > { %v1814_v58 = vadd.f32 %v1782_v37, %v1590_v54  ;;  %v1331_v42 = vrot.slane %v1306_v56, 6  ;;  %v1232_v38 = vsel %vm438_vm7, %v1231_v45, %v1224_v63  ;;  %v1310_v54 = vld [vmem:[%s1309_s11] sm:$0x1]  ;;  %s1323_s24 = sadd.s32 127, %s4732_s16  ;;  %v1796_v18 = vadd.f32 1.0, %v1795_v11  ;;  %s1313_s20 = scalar_lea.vmem %s7477_s1, %s6752_s13  ;;  %v1927_v48 = vpop.permute.xlu1 %1926 }
 0x180   : > { %v1798_v44 = vand.u32 2147483647, %v6687_v49  ;;  %v1265_v16 = vld [vmem:[%s1264_s19] sm:$0x1]  ;;  %v1788_v32 = vmul.f32 %v6665_v46, %v1787_v30  ;;  %s6817_s8 = sld [smem:[#allocation5 + %s1323_s24]]  ;;  %v1334_v52 = vrot.slane %v1310_v54, 5  ;;  %v1348_v35 = vsel %vm426_vm1, %v1298_v51, %v1328_v26 }
 0x181   : > { %v4397_v55 = vpop.eup %4396  ;;  %v3650_v61 = vadd.f32 -0.6931472, %v1814_v58  ;;  %v1282_v15 = vrot.slane %v1261_v20, 2  ;;  %v1291_v14 = vsel %vm434_vm5, %v1290_v41, %v1279_v53  ;;  %v1314_v17 = vld [vmem:[%s1313_s20] sm:$0x1]  ;;  %v1349_v0 = vsel %vm428_vm2, %v1348_v35, %v1331_v42  ;;  %s1317_s17 = scalar_lea.vmem %s7477_s1, %s6785_s26 }
 0x182   : > { %v1785_v60 = vmul.f32 0.6931472, %v4397_v55  ;;  %v1973_v46 = vmul.f32 %v1941_v7, %v1171_v13  ;;  %v1337_v19 = vrot.slane %v1314_v17, 4  ;;  %v1350_v2 = vsel %vm430_vm3, %v1349_v0, %v1334_v52  ;;  %v1318_v21 = vld [vmem:[%s1317_s17] sm:$0x1] }
 0x183   : > { %v1942_v47 = vmul.f32 %v3650_v61, %v1917_v39  ;;  %v1285_v28 = vrot.slane %v1265_v16, 1  ;;  %v1797_v3 = vmul.f32 %v6687_v49, %v1796_v18  ;;  %v1592_v12 = vmax.f32 %v6293_v50, 0.0 }
 0x184   : > { %v4399_v22 = vpop.eup %4398  ;;  %v1791_v29 = vsel %vm6768_vm15, %v1788_v32, %v1785_v60  ;;  %s1321_s27 = scalar_lea.vmem %s7477_s1, %s6799_s25  ;;  %v1351_v5 = vsel %vm432_vm4, %v1350_v2, %v1337_v19  ;;  %v1292_v31 = vsel %vm436_vm6, %v1291_v14, %v1282_v15  ;;  %v1340_v34 = vrot.slane %v1318_v21, 3 }
 0x185   : > { %v1974_v40 = vmul.f32 %v1942_v47, %v1232_v38  ;;  %v1815_v9 = vadd.f32 %v1791_v29, %v1591_v27  ;;  %v1794_v62 = vmul.f32 0.6931472, %v4399_v22  ;;  %v1322_v63 = vld [vmem:[%s1321_s27] sm:$0x1]  ;;  %vm1799_vm1 = vcmp.lt.f32.partialorder %v1798_v44, 0.0004427343 }
 0x186   : > { %s1325_s22 = scalar_lea.vmem %s7477_s1, %s6817_s8  ;;  %v1343_v10 = vrot.slane %v1322_v63, 2  ;;  %v1352_v11 = vsel %vm434_vm5, %v1351_v5, %v1340_v34  ;;  %v1293_v50 = vsel %vm438_vm7, %v1292_v31, %v1285_v28  ;;  %v1980_v56 = vadd.s32 8, %v5684_v1  ;;  %v6863_v38 = vld [vmem:[%s7722_s3] ss:$0 sm:$0xff]  ;;  %v2305_v28 = vld [vmem:[#allocation3 + $0x88] sm:$0xff]  ;;  %v2050_v63 = vld [vmem:[#allocation3 + $0x18] sm:$0xff] }
 0x187   : > { %v6839_v49 = vpack.c.bf16 %v1974_v40, %v1973_v46  ;;  %v3651_v36 = vadd.f32 -0.6931472, %v1815_v9  ;;  %v1800_v27 = vsel %vm1799_vm1, %v1797_v3, %v1794_v62  ;;  %v1326_v6 = vld [vmem:[%s1325_s22] sm:$0x1]  ;;  %v1981_v20 = vadd.s32 16, %v5684_v1  ;;  %s7780_s3 = sld [smem:[#allocation11_spill]] }
 0x188   : > { %v1816_v45 = vadd.f32 %v1800_v27, %v1592_v12  ;;  %v1346_v30 = vrot.slane %v1326_v6, 1  ;;  %v1353_v4 = vsel %vm436_vm6, %v1352_v11, %v1343_v10  ;;  %v2241_v58 = vadd.s32 128, %v1980_v56  ;;  %v2047_v29 = vld [vmem:[#allocation3] sm:$0xff]  ;;  %v2306_v10 = vld [vmem:[#allocation3 + $0x90] sm:$0xff] }
 0x189   : > { %v1943_v53 = vmul.f32 %v3651_v36, %v1922_v8  ;;  %4194 = vmatprep.subr.bf16.mxu1 %v6839_v49  ;;  %4226 = vmatprep.subr.bf16.mxu0 %v6839_v49  ;;  %v1982_v42 = vadd.s32 24, %v5684_v1  ;;  %v2242_v13 = vadd.s32 128, %v1981_v20  ;;  %vm2000_vm2 = vcmp.eq.s32.totalorder %v6863_v38, %v1980_v56  ;;  %v2304_v3 = vld [vmem:[#allocation3 + $0x80] sm:$0xff]  ;;  %v2049_v36 = vld [vmem:[#allocation3 + $0x10] sm:$0xff] }
 0x18a   : > { %v3652_v51 = vadd.f32 -0.6931472, %v1816_v45  ;;  %4196 = vmatpush3.bf16.msra.mxu1 %v6839_v49  ;;  %4228 = vmatpush3.bf16.msra.mxu0 %v6839_v49  ;;  %v1354_v37 = vsel %vm438_vm7, %v1353_v4, %v1346_v30  ;;  %v1983_v54 = vadd.s32 32, %v5684_v1  ;;  %vm2257_vm3 = vcmp.eq.s32.totalorder %v6863_v38, %v2241_v58  ;;  %v2052_v30 = vld [vmem:[#allocation3 + $0x28] sm:$0xff] }
 0x18b   : > { %v1975_v41 = vmul.f32 %v1943_v53, %v1293_v50  ;;  %v2243_v18 = vadd.s32 128, %v1982_v42  ;;  %vm2001_vm4 = vcmp.eq.s32.totalorder %v6863_v38, %v1981_v20  ;;  %v1984_v44 = vadd.s32 40, %v5684_v1 }
 0x18c   : > { %v1944_v23 = vmul.f32 %v3652_v51, %v1927_v48  ;;  %vm2258_vm5 = vcmp.eq.s32.totalorder %v6863_v38, %v2242_v13  ;;  %v2244_v55 = vadd.s32 128, %v1983_v54  ;;  %v7779_v61 = vmov 1.0   ;;  %v2309_v51 = vld [vmem:[#allocation3 + $0xa8] sm:$0xff]  ;;  %v2051_v48 = vld [vmem:[#allocation3 + $0x20] sm:$0xff] }
 0x18d   : > { %vm2002_vm6 = vcmp.eq.s32.totalorder %v6863_v38, %v1982_v42  ;;  %v1985_v16 = vadd.s32 48, %v5684_v1  ;;  %vm2259_vm7 = vcmp.eq.s32.totalorder %v6863_v38, %v2243_v18  ;;  %v2245_v32 = vadd.s32 128, %v1984_v44  ;;  %v2054_v42 = vld [vmem:[#allocation3 + $0x38] sm:$0xff]  ;;  %v2310_v18 = vld [vmem:[#allocation3 + $0xb0] sm:$0xff]  ;;  %p3718_p11 = scmp.ne.s32.totalorder %s7780_s3, 2 }
 0x18e   : > { %v1976_v7 = vmul.f32 %v1944_v23, %v1354_v37  ;;  %vm2003_vm0 = vcmp.eq.s32.totalorder %v6863_v38, %v1983_v54  ;;  %v1986_v52 = vadd.s32 56, %v5684_v1  ;;  %vm2260_vm8 = vcmp.eq.s32.totalorder %v6863_v38, %v2244_v55  ;;  %v2308_v37 = vld [vmem:[#allocation3 + $0xa0] sm:$0xff]  ;;  %v2053_v54 = vld [vmem:[#allocation3 + $0x30] sm:$0xff] }
 0x18f   : > { %vm2004_vm9 = vcmp.eq.s32.totalorder %v6863_v38, %v1984_v44  ;;  %v1987_v35 = vadd.s32 64, %v5684_v1  ;;  %vm2261_vm10 = vcmp.eq.s32.totalorder %v6863_v38, %v2245_v32  ;;  %vm2005_vm11 = vcmp.eq.s32.totalorder %v6863_v38, %v1985_v16 }
 0x190   : > { %v6855_v26 = vpack.c.bf16 %v1976_v7, %v1975_v41  ;;  %v2247_v39 = vadd.s32 128, %v1986_v52  ;;  %v1988_v15 = vadd.s32 72, %v5684_v1  ;;  %vm2006_vm13 = vcmp.eq.s32.totalorder %v6863_v38, %v1986_v52 }
 0x191   : > { %v1989_v14 = vadd.s32 80, %v5684_v1  ;;  %vm2007_vm15 = vcmp.eq.s32.totalorder %v6863_v38, %v1987_v35  ;;  %v1990_v17 = vadd.s32 88, %v5684_v1  ;;  %v1991_v0 = vadd.s32 96, %v5684_v1 }
 0x192   : > { %4198 = vmatprep.subr.bf16.mxu1 %v6855_v26  ;;  %4230 = vmatprep.subr.bf16.mxu0 %v6855_v26  ;;  %vm2263_vm14 = vcmp.eq.s32.totalorder %v6863_v38, %v2247_v39  ;;  %v2249_v60 = vadd.s32 128, %v1988_v15  ;;  %v1992_v47 = vadd.s32 104, %v5684_v1  ;;  %v1993_v2 = vadd.s32 112, %v5684_v1 }
 0x193   : > { %4200 = vmatpush3.bf16.msra.mxu1 %v6855_v26  ;;  %4232 = vmatpush3.bf16.msra.mxu0 %v6855_v26  ;;  %v2251_v46 = vadd.s32 128, %v1990_v17 }
 0x194   : > { %4297 = vmatprep.subr.bf16.mxu1 %v6096_v59  ;;  %v2253_v19 = vadd.s32 128, %v1992_v47  ;;  %v2254_v22 = vadd.s32 128, %v1993_v2 }
 0x196   : > { %3970 = vmatmul.mubr.msk.f32.vlgmr.msra.gmra.mrb[0].mxu1 %vm2000_vm2, %v7779_v61  ;;  %4026 = vmatmul.mubr.msk.f32.vlgmr.msra.gmra.mrb[16].mxu0 %vm2257_vm3, %v7779_v61  ;;  %vm2008_vm2 = vcmp.eq.s32.totalorder %v6863_v38, %v1988_v15  ;;  %vm2265_vm3 = vcmp.eq.s32.totalorder %v6863_v38, %v2249_v60  ;;  %v2313_v15 = vld [vmem:[#allocation3 + $0xc8] sm:$0xff] }
 0x197   : > { %4305 = vmatpush3.bf16.msra.mxu1 %v6096_v59  ;;  %3972 = vmatprep.mubr.msk.f32.mxu1 %vm2001_vm4, %v7779_v61  ;;  %v2246_v59 = vadd.s32 128, %v1985_v16  ;;  %vm2009_vm4 = vcmp.eq.s32.totalorder %v6863_v38, %v1989_v14 }
 0x198   : > { %4298 = vmatprep.subr.bf16.mxu1 %v6133_v57  ;;  %4028 = vmatprep.mubr.msk.f32.mxu0 %vm2258_vm5, %v7779_v61 }
 0x199   : > { %vm2262_vm12 = vcmp.eq.s32.totalorder %v6863_v38, %v2246_v59 }
 0x19a   : > { %3973 = vmatmul.mubr.msk.f32.gmra.mrb[2].mxu1 %vm2002_vm6, %v7779_v61  ;;  %4029 = vmatmul.mubr.msk.f32.gmra.mrb[18].mxu0 %vm2259_vm7, %v7779_v61  ;;  %vm2010_vm6 = vcmp.eq.s32.totalorder %v6863_v38, %v1990_v17  ;;  %vm2267_vm7 = vcmp.eq.s32.totalorder %v6863_v38, %v2251_v46 }
 0x19b   : > { %4306 = vmatpush3.bf16.msra.mxu1 %v6133_v57  ;;  %3975 = vmatprep.mubr.msk.f32.mxu1 %vm2003_vm0, %v7779_v61  ;;  %v2248_v57 = vadd.s32 128, %v1987_v35  ;;  %vm2011_vm0 = vcmp.eq.s32.totalorder %v6863_v38, %v1991_v0  ;;  %v2056_v35 = vld [vmem:[#allocation3 + $0x48] sm:$0xff] }
 0x19c   : > { %4299 = vmatprep.subr.bf16.mxu1 %v6177_v24  ;;  %4031 = vmatprep.mubr.msk.f32.mxu0 %vm2260_vm8, %v7779_v61 }
 0x19d   : > { %vm2264_vm1 = vcmp.eq.s32.totalorder %v6863_v38, %v2248_v57  ;;  %v2055_v57 = vld [vmem:[#allocation3 + $0x40] sm:$0xff] }
 0x19e   : > { %3976 = vmatmul.mubr.msk.f32.gmra.mrb[4].mxu1 %vm2004_vm9, %v7779_v61  ;;  %4032 = vmatmul.mubr.msk.f32.gmra.mrb[20].mxu0 %vm2261_vm10, %v7779_v61  ;;  %vm2012_vm9 = vcmp.eq.s32.totalorder %v6863_v38, %v1992_v47  ;;  %vm2269_vm10 = vcmp.eq.s32.totalorder %v6863_v38, %v2253_v19  ;;  %v2058_v19 = vld [vmem:[#allocation3 + $0x58] sm:$0xff] }
 0x19f   : > { %4307 = vmatpush3.bf16.msra.mxu1 %v6177_v24  ;;  %3978 = vmatprep.mubr.msk.f32.mxu1 %vm2005_vm11, %v7779_v61  ;;  %v2250_v24 = vadd.s32 128, %v1989_v14  ;;  %vm2013_vm11 = vcmp.eq.s32.totalorder %v6863_v38, %v1993_v2  ;;  %v2312_v14 = vld [vmem:[#allocation3 + $0xc0] sm:$0xff] }
 0x1a0   : > { %4300 = vmatprep.subr.bf16.mxu1 %v6357_v25  ;;  %4034 = vmatprep.mubr.msk.f32.mxu0 %vm2262_vm12, %v7779_v61 }
 0x1a1   : > { %vm2266_vm5 = vcmp.eq.s32.totalorder %v6863_v38, %v2250_v24 }
 0x1a2   : > { %3979 = vmatmul.mubr.msk.f32.gmra.mrb[6].mxu1 %vm2006_vm13, %v7779_v61  ;;  %4035 = vmatmul.mubr.msk.f32.gmra.mrb[22].mxu0 %vm2263_vm14, %v7779_v61  ;;  %vm2270_vm13 = vcmp.eq.s32.totalorder %v6863_v38, %v2254_v22  ;;  %v2057_v22 = vld [vmem:[#allocation3 + $0x50] sm:$0xff] }
 0x1a3   : > { %4308 = vmatpush3.bf16.msra.mxu1 %v6357_v25  ;;  %3981 = vmatprep.mubr.msk.f32.mxu1 %vm2007_vm15, %v7779_v61  ;;  %v2252_v25 = vadd.s32 128, %v1991_v0 }
 0x1a4   : > { %4301 = vmatprep.subr.bf16.mxu1 %v6513_v33  ;;  %4037 = vmatprep.mubr.msk.f32.mxu0 %vm2264_vm1, %v7779_v61 }
 0x1a5   : > { %vm2268_vm8 = vcmp.eq.s32.totalorder %v6863_v38, %v2252_v25 }
 0x1a6   : > { %3982 = vmatmul.mubr.msk.f32.gmra.mrb[8].mxu1 %vm2008_vm2, %v7779_v61  ;;  %4038 = vmatmul.mubr.msk.f32.gmra.mrb[24].mxu0 %vm2265_vm3, %v7779_v61 }
 0x1a7   : > { %4309 = vmatpush3.bf16.msra.mxu1 %v6513_v33  ;;  %3984 = vmatprep.mubr.msk.f32.mxu1 %vm2009_vm4, %v7779_v61  ;;  %v1994_v33 = vadd.s32 120, %v5684_v1 }
 0x1a8   : > { %4302 = vmatprep.subr.bf16.mxu1 %v6736_v43  ;;  %4040 = vmatprep.mubr.msk.f32.mxu0 %vm2266_vm5, %v7779_v61 }
 0x1a9   : > { %vm2014_vm12 = vcmp.eq.s32.totalorder %v6863_v38, %v1994_v33  ;;  %v2255_v1 = vadd.s32 128, %v1994_v33  ;;  %v2315_v33 = vld [vmem:[#allocation3 + $0xd8] sm:$0xff] }
 0x1aa   : > { %3985 = vmatmul.mubr.msk.f32.gmra.mrb[10].mxu1 %vm2010_vm6, %v7779_v61  ;;  %4041 = vmatmul.mubr.msk.f32.gmra.mrb[26].mxu0 %vm2267_vm7, %v7779_v61 }
 0x1ab   : > { %4310 = vmatpush3.bf16.msra.mxu1 %v6736_v43  ;;  %3987 = vmatprep.mubr.msk.f32.mxu1 %vm2011_vm0, %v7779_v61  ;;  %vm2271_vm14 = vcmp.eq.s32.totalorder %v6863_v38, %v2255_v1  ;;  %v2048_v43 = vld [vmem:[#allocation3 + $0x8] sm:$0xff]  ;;  %v2311_v38 = vld [vmem:[#allocation3 + $0xb8] sm:$0xff]  ;;  %v2314_v1 = vld [vmem:[#allocation3 + $0xd0] sm:$0xff] }
 0x1ac   : > { %4303 = vmatprep.subr.bf16.mxu1 %v6839_v49  ;;  %4043 = vmatprep.mubr.msk.f32.mxu0 %vm2268_vm8, %v7779_v61 }
 0x1ae   : > { %3988 = vmatmul.mubr.msk.f32.gmra.mrb[12].mxu1 %vm2012_vm9, %v7779_v61  ;;  %4044 = vmatmul.mubr.msk.f32.gmra.mrb[28].mxu0 %vm2269_vm10, %v7779_v61 }
 0x1af   : > { %4311 = vmatpush3.bf16.msra.mxu1 %v6839_v49  ;;  %3990 = vmatprep.mubr.msk.f32.mxu1 %vm2013_vm11, %v7779_v61  ;;  %v2307_v49 = vld [vmem:[#allocation3 + $0x98] sm:$0xff] }
 0x1b0   : > { %4304 = vmatprep.subr.bf16.mxu1 %v6855_v26 }
 0x1b2   : > { %3991 = vmatmul.mubr.msk.f32.gmra.mrb[14].mxu1 %vm2014_vm12, %v7779_v61 }
 0x1b3   : > { %4312 = vmatpush3.bf16.msra.mxu1 %v6855_v26  ;;  %4046 = vmatprep.mubr.msk.f32.mxu1 %vm2270_vm13, %v7779_v61 }
 0x1b6   : > { %4047 = vmatmul.mubr.msk.f32.vlgmr.msra.gmra.mrb[16].mxu1 %vm2271_vm14, %v7779_v61 }
 0x269   : > { %v3971_v40 = vpop.f32.mrb[0].mxu1  ;;  %v4027_v9 = vpop.f32.mrb[16].mxu0 }
 0x26a   : > { %v2209_v21 = vadd.f32 %v3971_v40, %v2048_v43  ;;  %v2129_v5 = vpop.f32.mrb[1].mxu1  ;;  %v2466_v62 = vadd.f32 %v4027_v9, %v2305_v28  ;;  %v2386_v12 = vpop.f32.mrb[17].mxu0 }
 0x26b   : > { %v2208_v31 = vadd.f32 %v2129_v5, %v2047_v29  ;;  %v2465_v34 = vadd.f32 %v2386_v12, %v2304_v3  ;;  %v2060_v5 = vld [vmem:[#allocation3 + $0x68] sm:$0xff] }
 0x26c   : > { %2225 = vst [vmem:[#allocation3 + $0x8] sm:$0xff] %v2209_v21  ;;  %2482 = vst [vmem:[#allocation3 + $0x88] sm:$0xff] %v2466_v62  ;;  %v2317_v12 = vld [vmem:[#allocation3 + $0xe8] sm:$0xff] }
 0x26d   : > { %2224 = vst [vmem:[#allocation3] sm:$0xff] %v2208_v31  ;;  %v3974_v27 = vpop.f32.mrb[2].mxu1  ;;  %2481 = vst [vmem:[#allocation3 + $0x80] sm:$0xff] %v2465_v34  ;;  %v4030_v8 = vpop.f32.mrb[18].mxu0  ;;  %v2059_v31 = vld [vmem:[#allocation3 + $0x60] sm:$0xff] }
 0x26e   : > { %v2211_v6 = vadd.f32 %v3974_v27, %v2050_v63  ;;  %v2139_v11 = vpop.f32.mrb[3].mxu1  ;;  %v2468_v45 = vadd.f32 %v4030_v8, %v2307_v49  ;;  %v2396_v50 = vpop.f32.mrb[19].mxu0  ;;  %v2316_v63 = vld [vmem:[#allocation3 + $0xe0] sm:$0xff] }
 0x26f   : > { %v2210_v53 = vadd.f32 %v2139_v11, %v2049_v36  ;;  %v2467_v4 = vadd.f32 %v2396_v50, %v2306_v10  ;;  %v2062_v11 = vld [vmem:[#allocation3 + $0x78] sm:$0xff]  ;;  %v2061_v50 = vld [vmem:[#allocation3 + $0x70] sm:$0xff] }
 0x270   : > { %2227 = vst [vmem:[#allocation3 + $0x18] sm:$0xff] %v2211_v6  ;;  %2484 = vst [vmem:[#allocation3 + $0x98] sm:$0xff] %v2468_v45 }
 0x271   : > { %2226 = vst [vmem:[#allocation3 + $0x10] sm:$0xff] %v2210_v53  ;;  %v3977_v41 = vpop.f32.mrb[4].mxu1  ;;  %2483 = vst [vmem:[#allocation3 + $0x90] sm:$0xff] %v2467_v4  ;;  %v4033_v23 = vpop.f32.mrb[20].mxu0 }
 0x272   : > { %v2213_v56 = vadd.f32 %v3977_v41, %v2052_v30  ;;  %v2149_v7 = vpop.f32.mrb[5].mxu1  ;;  %v2470_v58 = vadd.f32 %v4033_v23, %v2309_v51  ;;  %v2406_v20 = vpop.f32.mrb[21].mxu0 }
 0x273   : > { %v2212_v26 = vadd.f32 %v2149_v7, %v2051_v48  ;;  %v2469_v13 = vadd.f32 %v2406_v20, %v2308_v37  ;;  %v2319_v48 = vld [vmem:[#allocation3 + $0xf8] sm:$0xff]  ;;  %v2318_v37 = vld [vmem:[#allocation3 + $0xf0] sm:$0xff] }
 0x274   : > { %2229 = vst [vmem:[#allocation3 + $0x28] sm:$0xff] %v2213_v56  ;;  %2486 = vst [vmem:[#allocation3 + $0xa8] sm:$0xff] %v2470_v58 }
 0x275   : > { %2228 = vst [vmem:[#allocation3 + $0x20] sm:$0xff] %v2212_v26  ;;  %v3980_v44 = vpop.f32.mrb[6].mxu1  ;;  %2485 = vst [vmem:[#allocation3 + $0xa0] sm:$0xff] %v2469_v13  ;;  %v4036_v55 = vpop.f32.mrb[22].mxu0 }
 0x276   : > { %v2215_v61 = vadd.f32 %v3980_v44, %v2054_v42  ;;  %v2159_v16 = vpop.f32.mrb[7].mxu1  ;;  %v2472_v32 = vadd.f32 %v4036_v55, %v2311_v38  ;;  %v2416_v52 = vpop.f32.mrb[23].mxu0 }
 0x277   : > { %v2214_v59 = vadd.f32 %v2159_v16, %v2053_v54  ;;  %v2471_v39 = vadd.f32 %v2416_v52, %v2310_v18 }
 0x278   : > { %2231 = vst [vmem:[#allocation3 + $0x38] sm:$0xff] %v2215_v61  ;;  %2488 = vst [vmem:[#allocation3 + $0xb8] sm:$0xff] %v2472_v32 }
 0x279   : > { %2230 = vst [vmem:[#allocation3 + $0x30] sm:$0xff] %v2214_v59  ;;  %v3983_v60 = vpop.f32.mrb[8].mxu1  ;;  %2487 = vst [vmem:[#allocation3 + $0xb0] sm:$0xff] %v2471_v39  ;;  %v4039_v17 = vpop.f32.mrb[24].mxu0 }
 0x27a   : > { %v2217_v24 = vadd.f32 %v3983_v60, %v2056_v35  ;;  %v2169_v0 = vpop.f32.mrb[9].mxu1  ;;  %v2474_v46 = vadd.f32 %v4039_v17, %v2313_v15  ;;  %v2426_v47 = vpop.f32.mrb[25].mxu0 }
 0x27b   : > { %v2216_v25 = vadd.f32 %v2169_v0, %v2055_v57  ;;  %v2473_v2 = vadd.f32 %v2426_v47, %v2312_v14 }
 0x27c   : > { %2233 = vst [vmem:[#allocation3 + $0x48] sm:$0xff] %v2217_v24  ;;  %2490 = vst [vmem:[#allocation3 + $0xc8] sm:$0xff] %v2474_v46 }
 0x27d   : > { %2232 = vst [vmem:[#allocation3 + $0x40] sm:$0xff] %v2216_v25  ;;  %v3986_v43 = vpop.f32.mrb[10].mxu1  ;;  %2489 = vst [vmem:[#allocation3 + $0xc0] sm:$0xff] %v2473_v2  ;;  %v4042_v28 = vpop.f32.mrb[26].mxu0 }
 0x27e   : > { %v2219_v29 = vadd.f32 %v3986_v43, %v2058_v19  ;;  %v2179_v3 = vpop.f32.mrb[11].mxu1  ;;  %v2476_v40 = vadd.f32 %v4042_v28, %v2315_v33  ;;  %v2436_v9 = vpop.f32.mrb[27].mxu0 }
 0x27f   : > { %v2218_v21 = vadd.f32 %v2179_v3, %v2057_v22  ;;  %v2475_v62 = vadd.f32 %v2436_v9, %v2314_v1 }
 0x280   : > { %2235 = vst [vmem:[#allocation3 + $0x58] sm:$0xff] %v2219_v29  ;;  %2492 = vst [vmem:[#allocation3 + $0xd8] sm:$0xff] %v2476_v40 }
 0x281   : > { %2234 = vst [vmem:[#allocation3 + $0x50] sm:$0xff] %v2218_v21  ;;  %v3989_v34 = vpop.f32.mrb[12].mxu1  ;;  %2491 = vst [vmem:[#allocation3 + $0xd0] sm:$0xff] %v2475_v62  ;;  %v4045_v49 = vpop.f32.mrb[28].mxu0 }
 0x282   : > { %v2221_v36 = vadd.f32 %v3989_v34, %v2060_v5  ;;  %v2189_v10 = vpop.f32.mrb[13].mxu1  ;;  %v2478_v27 = vadd.f32 %v4045_v49, %v2317_v12  ;;  %v2446_v8 = vpop.f32.mrb[29].mxu0 }
 0x283   : > { %v2220_v6 = vadd.f32 %v2189_v10, %v2059_v31  ;;  %v2477_v45 = vadd.f32 %v2446_v8, %v2316_v63 }
 0x284   : > { %2237 = vst [vmem:[#allocation3 + $0x68] sm:$0xff] %v2221_v36  ;;  %2494 = vst [vmem:[#allocation3 + $0xe8] sm:$0xff] %v2478_v27 }
 0x285   : > { %2236 = vst [vmem:[#allocation3 + $0x60] sm:$0xff] %v2220_v6  ;;  %v3992_v53 = vpop.f32.mrb[14].mxu1  ;;  %2493 = vst [vmem:[#allocation3 + $0xe0] sm:$0xff] %v2477_v45 }
 0x286   : > { %v2223_v30 = vadd.f32 %v3992_v53, %v2062_v11  ;;  %v2199_v4 = vpop.f32.mrb[15].mxu1 }
 0x287   : > { %v2222_v51 = vadd.f32 %v2199_v4, %v2061_v50  ;;  %2500 = sbr.rel (%p3718_p11) target bundleno = 1067 (0x42b), region = 60 }
 0x288   : > { %2239 = vst [vmem:[#allocation3 + $0x78] sm:$0xff] %v2223_v30 }
 0x289   : > { %2238 = vst [vmem:[#allocation3 + $0x70] sm:$0xff] %v2222_v51  ;;  %v4048_v41 = vpop.f32.mrb[16].mxu1 }
 0x28a   : > { %v2480_v23 = vadd.f32 %v4048_v41, %v2319_v48  ;;  %v2456_v56 = vpop.f32.mrb[17].mxu1 }
 0x28b   : > { %v2479_v7 = vadd.f32 %v2456_v56, %v2318_v37 }
 0x28c   : > { %2496 = vst [vmem:[#allocation3 + $0xf8] sm:$0xff] %v2480_v23 }
 0x28d   : > { %2495 = vst [vmem:[#allocation3 + $0xf0] sm:$0xff] %v2479_v7 }
 0x28e   : > { %s7781_s30 = sld [smem:[#allocation68_spill]]  ;;  %v2501_v55 = vld [vmem:[#allocation3] sm:$0xff]  ;;  %v2502_v25 = vld [vmem:[#allocation3 + $0x8] sm:$0xff]  ;;  %v2503_v2 = vld [vmem:[#allocation3 + $0x10] sm:$0xff]  ;;  %s7782_s4 = sld [smem:[#allocation69_spill]] }
 0x28f   : > { %v2957_v61 = vld [vmem:[#allocation3 + $0x80] sm:$0xff]  ;;  %4081 = vmatprep.mubr.f32.mxu0 %v2501_v55  ;;  %v2958_v19 = vld [vmem:[#allocation3 + $0x88] sm:$0xff]  ;;  %v2959_v33 = vld [vmem:[#allocation3 + $0x90] sm:$0xff] }
 0x290   : > { %4137 = vmatprep.mubr.f32.mxu1 %v2957_v61  ;;  %v2504_v22 = vld [vmem:[#allocation3 + $0x18] sm:$0xff]  ;;  %v2505_v43 = vld [vmem:[#allocation3 + $0x20] sm:$0xff]  ;;  %v2506_v29 = vld [vmem:[#allocation3 + $0x28] sm:$0xff] }
 0x291   : > { %v2960_v1 = vld [vmem:[#allocation3 + $0x98] sm:$0xff]  ;;  %v2961_v28 = vld [vmem:[#allocation3 + $0xa0] sm:$0xff]  ;;  %v2962_v3 = vld [vmem:[#allocation3 + $0xa8] sm:$0xff] }
 0x292   : > { %v2507_v40 = vld [vmem:[#allocation3 + $0x30] sm:$0xff]  ;;  %v2508_v21 = vld [vmem:[#allocation3 + $0x38] sm:$0xff]  ;;  %v2509_v62 = vld [vmem:[#allocation3 + $0x40] sm:$0xff] }
 0x293   : > { %v2963_v9 = vld [vmem:[#allocation3 + $0xb0] sm:$0xff]  ;;  %v2964_v5 = vld [vmem:[#allocation3 + $0xb8] sm:$0xff]  ;;  %v2965_v12 = vld [vmem:[#allocation3 + $0xc0] sm:$0xff] }
 0x294   : > { %v2517_v58 = vld [vmem:[%s7781_s30] sm:$0xff]  ;;  %v2518_v20 = vld [vmem:[%s7781_s30 + $0x8] sm:$0xff]  ;;  %v2519_v26 = vld [vmem:[%s7781_s30 + $0x10] sm:$0xff] }
 0x295   : > { %v4233_v42 = vpack.c.bf16 %v2518_v20, %v2517_v58  ;;  %v2520_v13 = vld [vmem:[%s7781_s30 + $0x18] sm:$0xff]  ;;  %v2521_v54 = vld [vmem:[%s7781_s30 + $0x20] sm:$0xff]  ;;  %v2522_v18 = vld [vmem:[%s7781_s30 + $0x28] sm:$0xff] }
 0x296   : > { %v4237_v38 = vpack.c.bf16 %v2520_v13, %v2519_v26  ;;  %v4241_v44 = vpack.c.bf16 %v2522_v18, %v2521_v54  ;;  %v2523_v16 = vld [vmem:[%s7781_s30 + $0x30] sm:$0xff]  ;;  %v2524_v32 = vld [vmem:[%s7781_s30 + $0x38] sm:$0xff]  ;;  %v2525_v59 = vld [vmem:[%s7781_s30 + $0x40] sm:$0xff] }
 0x297   : > { %4234 = vmatprep.subr.bf16.mxu0 %v4233_v42  ;;  %4266 = vmatprep.subr.bf16.mxu1 %v4233_v42  ;;  %v4245_v52 = vpack.c.bf16 %v2524_v32, %v2523_v16  ;;  %v2526_v35 = vld [vmem:[%s7781_s30 + $0x48] sm:$0xff]  ;;  %v2527_v15 = vld [vmem:[%s7781_s30 + $0x50] sm:$0xff]  ;;  %v2528_v57 = vld [vmem:[%s7781_s30 + $0x58] sm:$0xff] }
 0x298   : > { %4236 = vmatpush3.bf16.msra.mxu0 %v4233_v42  ;;  %4268 = vmatpush3.bf16.msra.mxu1 %v4233_v42  ;;  %v4249_v39 = vpack.c.bf16 %v2526_v35, %v2525_v59  ;;  %v4253_v14 = vpack.c.bf16 %v2528_v57, %v2527_v15  ;;  %v2529_v60 = vld [vmem:[%s7781_s30 + $0x60] sm:$0xff]  ;;  %v2530_v17 = vld [vmem:[%s7781_s30 + $0x68] sm:$0xff]  ;;  %v2531_v0 = vld [vmem:[%s7781_s30 + $0x70] sm:$0xff] }
 0x299   : > { %4238 = vmatprep.subr.bf16.mxu0 %v4237_v38  ;;  %4270 = vmatprep.subr.bf16.mxu1 %v4237_v38  ;;  %v4257_v24 = vpack.c.bf16 %v2530_v17, %v2529_v60  ;;  %v2532_v46 = vld [vmem:[%s7781_s30 + $0x78] sm:$0xff]  ;;  %v2510_v31 = vld [vmem:[#allocation3 + $0x48] sm:$0xff]  ;;  %v2511_v34 = vld [vmem:[#allocation3 + $0x50] sm:$0xff] }
 0x29a   : > { %v4261_v47 = vpack.c.bf16 %v2532_v46, %v2531_v0  ;;  %v2966_v63 = vld [vmem:[#allocation3 + $0xc8] sm:$0xff]  ;;  %v2967_v49 = vld [vmem:[#allocation3 + $0xd0] sm:$0xff]  ;;  %v2512_v36 = vld [vmem:[#allocation3 + $0x58] sm:$0xff] }
 0x29b   : > { %v2968_v10 = vld [vmem:[#allocation3 + $0xd8] sm:$0xff]  ;;  %v2513_v27 = vld [vmem:[#allocation3 + $0x60] sm:$0xff]  ;;  %v2514_v6 = vld [vmem:[#allocation3 + $0x68] sm:$0xff] }
 0x29c   : > { %4240 = vmatpush3.bf16.msra.mxu0 %v4237_v38  ;;  %4272 = vmatpush3.bf16.msra.mxu1 %v4237_v38  ;;  %v2969_v8 = vld [vmem:[#allocation3 + $0xe0] sm:$0xff]  ;;  %v2970_v11 = vld [vmem:[#allocation3 + $0xe8] sm:$0xff]  ;;  %v2515_v45 = vld [vmem:[#allocation3 + $0x70] sm:$0xff] }
 0x29d   : > { %4242 = vmatprep.subr.bf16.mxu0 %v4241_v44  ;;  %4274 = vmatprep.subr.bf16.mxu1 %v4241_v44  ;;  %v2971_v50 = vld [vmem:[#allocation3 + $0xf0] sm:$0xff]  ;;  %v2516_v53 = vld [vmem:[#allocation3 + $0x78] sm:$0xff]  ;;  %v7005_v4 = vld [vmem:[%s7782_s4] ss:$0 sm:$0xff] }
 0x29e   : > { %v2972_v30 = vld [vmem:[#allocation3 + $0xf8] sm:$0xff] }
 0x2a0   : > { %4244 = vmatpush3.bf16.msra.mxu0 %v4241_v44  ;;  %4276 = vmatpush3.bf16.msra.mxu1 %v4241_v44 }
 0x2a1   : > { %4246 = vmatprep.subr.bf16.mxu0 %v4245_v52  ;;  %4278 = vmatprep.subr.bf16.mxu1 %v4245_v52 }
 0x2a4   : > { %4248 = vmatpush3.bf16.msra.mxu0 %v4245_v52  ;;  %4280 = vmatpush3.bf16.msra.mxu1 %v4245_v52 }
 0x2a5   : > { %4250 = vmatprep.subr.bf16.mxu0 %v4249_v39  ;;  %4282 = vmatprep.subr.bf16.mxu1 %v4249_v39 }
 0x2a8   : > { %4252 = vmatpush3.bf16.msra.mxu0 %v4249_v39  ;;  %4284 = vmatpush3.bf16.msra.mxu1 %v4249_v39 }
 0x2a9   : > { %4254 = vmatprep.subr.bf16.mxu0 %v4253_v14  ;;  %4286 = vmatprep.subr.bf16.mxu1 %v4253_v14 }
 0x2ac   : > { %4256 = vmatpush3.bf16.msra.mxu0 %v4253_v14  ;;  %4288 = vmatpush3.bf16.msra.mxu1 %v4253_v14 }
 0x2ad   : > { %4258 = vmatprep.subr.bf16.mxu0 %v4257_v24  ;;  %4290 = vmatprep.subr.bf16.mxu1 %v4257_v24 }
 0x2b0   : > { %4260 = vmatpush3.bf16.msra.mxu0 %v4257_v24  ;;  %4292 = vmatpush3.bf16.msra.mxu1 %v4257_v24 }
 0x2b1   : > { %4262 = vmatprep.subr.bf16.mxu0 %v4261_v47  ;;  %4294 = vmatprep.subr.bf16.mxu1 %v4261_v47 }
 0x2b4   : > { %4264 = vmatpush3.bf16.msra.mxu0 %v4261_v47  ;;  %4296 = vmatpush3.bf16.msra.mxu1 %v4261_v47 }
 0x2b7   : > { %4082 = vmatmul.mubr.f32.vlgmr.msra.gmra.mrb[0].mxu0 %v2502_v25  ;;  %4138 = vmatmul.mubr.f32.vlgmr.msra.gmra.mrb[0].mxu1 %v2958_v19 }
 0x2b8   : > { %4084 = vmatprep.mubr.f32.mxu0 %v2503_v2  ;;  %4140 = vmatprep.mubr.f32.mxu1 %v2959_v33 }
 0x2bb   : > { %4085 = vmatmul.mubr.f32.gmra.mrb[2].mxu0 %v2504_v22  ;;  %4141 = vmatmul.mubr.f32.gmra.mrb[2].mxu1 %v2960_v1 }
 0x2bc   : > { %4087 = vmatprep.mubr.f32.mxu0 %v2505_v43  ;;  %4143 = vmatprep.mubr.f32.mxu1 %v2961_v28 }
 0x2bf   : > { %4088 = vmatmul.mubr.f32.gmra.mrb[4].mxu0 %v2506_v29  ;;  %4144 = vmatmul.mubr.f32.gmra.mrb[4].mxu1 %v2962_v3 }
 0x2c0   : > { %4090 = vmatprep.mubr.f32.mxu0 %v2507_v40  ;;  %4146 = vmatprep.mubr.f32.mxu1 %v2963_v9 }
 0x2c3   : > { %4091 = vmatmul.mubr.f32.gmra.mrb[6].mxu0 %v2508_v21  ;;  %4147 = vmatmul.mubr.f32.gmra.mrb[6].mxu1 %v2964_v5 }
 0x2c4   : > { %4093 = vmatprep.mubr.f32.mxu0 %v2509_v62  ;;  %4149 = vmatprep.mubr.f32.mxu1 %v2965_v12 }
 0x2c7   : > { %4094 = vmatmul.mubr.f32.gmra.mrb[8].mxu0 %v2510_v31  ;;  %4150 = vmatmul.mubr.f32.gmra.mrb[8].mxu1 %v2966_v63 }
 0x2c8   : > { %4096 = vmatprep.mubr.f32.mxu0 %v2511_v34  ;;  %4152 = vmatprep.mubr.f32.mxu1 %v2967_v49 }
 0x2cb   : > { %4097 = vmatmul.mubr.f32.gmra.mrb[10].mxu0 %v2512_v36  ;;  %4153 = vmatmul.mubr.f32.gmra.mrb[10].mxu1 %v2968_v10 }
 0x2cc   : > { %4099 = vmatprep.mubr.f32.mxu0 %v2513_v27  ;;  %4155 = vmatprep.mubr.f32.mxu1 %v2969_v8 }
 0x2cf   : > { %4100 = vmatmul.mubr.f32.gmra.mrb[12].mxu0 %v2514_v6  ;;  %4156 = vmatmul.mubr.f32.gmra.mrb[12].mxu1 %v2970_v11 }
 0x2d0   : > { %4102 = vmatprep.mubr.f32.mxu0 %v2515_v45  ;;  %4158 = vmatprep.mubr.f32.mxu1 %v2971_v50 }
 0x2d3   : > { %4103 = vmatmul.mubr.f32.gmra.mrb[14].mxu0 %v2516_v53  ;;  %4159 = vmatmul.mubr.f32.gmra.mrb[14].mxu1 %v2972_v30 }
 0x38a   : > { %v4083_v51 = vpop.f32.mrb[0].mxu0  ;;  %v4139_v48 = vpop.f32.mrb[0].mxu1 }
 0x38b   : > { %v7008_v37 = vadd.f32 %v4083_v51, %v7005_v4  ;;  %v7011_v41 = vadd.f32 %v4139_v48, %v7005_v4  ;;  %v2606_v23 = vpop.f32.mrb[1].mxu0  ;;  %v3062_v56 = vpop.f32.mrb[1].mxu1 }
 0x38c   : > { %v7014_v7 = vadd.f32 %v7005_v4, %v2606_v23  ;;  %v7017_v58 = vadd.f32 %v7005_v4, %v3062_v56 }
 0x38d   : > { %v2702_v20 = vand.u32 2147483647, %v7008_v37  ;;  %v3158_v26 = vand.u32 2147483647, %v7011_v41 }
 0x38e   : > { %v2701_v42 = vand.u32 2147483647, %v7014_v7  ;;  %v3157_v13 = vand.u32 2147483647, %v7017_v58  ;;  %v4086_v18 = vpop.f32.mrb[2].mxu0  ;;  %v4142_v44 = vpop.f32.mrb[2].mxu1 }
 0x38f   : > { %v2718_v38 = vsub.f32 0.0, %v2702_v20  ;;  %v3174_v54 = vsub.f32 0.0, %v3158_v26  ;;  %v7024_v16 = vadd.f32 %v4086_v18, %v7005_v4  ;;  %v7027_v32 = vadd.f32 %v4142_v44, %v7005_v4  ;;  %v2616_v52 = vpop.f32.mrb[3].mxu0  ;;  %v3072_v59 = vpop.f32.mrb[3].mxu1 }
 0x390   : > { %v2717_v55 = vsub.f32 0.0, %v2701_v42  ;;  %v3173_v61 = vsub.f32 0.0, %v3157_v13  ;;  %v7030_v15 = vadd.f32 %v7005_v4, %v2616_v52  ;;  %v7033_v57 = vadd.f32 %v7005_v4, %v3072_v59 }
 0x391   : > { %v2735_v35 = vmul.f32 1.442695, %v2718_v38  ;;  %v3191_v39 = vmul.f32 1.442695, %v3174_v54  ;;  %v2704_v17 = vand.u32 2147483647, %v7024_v16 }
 0x392   : > { %v2733_v14 = vmul.f32 1.442695, %v2717_v55  ;;  %v3189_v60 = vmul.f32 1.442695, %v3173_v61  ;;  %v3160_v24 = vand.u32 2147483647, %v7027_v32 }
 0x393   : > { %4401 = vpow2.f32 %v2735_v35  ;;  %v4089_v0 = vpop.f32.mrb[4].mxu0  ;;  %v2703_v46 = vand.u32 2147483647, %v7030_v15  ;;  %v3159_v47 = vand.u32 2147483647, %v7033_v57  ;;  %v4145_v25 = vpop.f32.mrb[4].mxu1 }
 0x394   : > { %4403 = vpow2.f32 %v3191_v39  ;;  %v2720_v19 = vsub.f32 0.0, %v2704_v17  ;;  %v3176_v2 = vsub.f32 0.0, %v3160_v24  ;;  %v7040_v33 = vadd.f32 %v4089_v0, %v7005_v4  ;;  %v2626_v22 = vpop.f32.mrb[5].mxu0  ;;  %v3082_v1 = vpop.f32.mrb[5].mxu1 }
 0x395   : > { %4405 = vpow2.f32 %v2733_v14  ;;  %v2719_v43 = vsub.f32 0.0, %v2703_v46  ;;  %v3175_v28 = vsub.f32 0.0, %v3159_v47  ;;  %v7043_v29 = vadd.f32 %v4145_v25, %v7005_v4 }
 0x396   : > { %4407 = vpow2.f32 %v3189_v60  ;;  %v4092_v3 = vpop.f32.mrb[6].mxu0  ;;  %v4148_v40 = vpop.f32.mrb[6].mxu1  ;;  %v2739_v21 = vmul.f32 1.442695, %v2720_v19  ;;  %v3195_v5 = vmul.f32 1.442695, %v3176_v2  ;;  %v7047_v62 = vadd.f32 %v7005_v4, %v2626_v22 }
 0x397   : > { %v7049_v12 = vpop.f32.mrb[7].mxu0  ;;  %v2737_v31 = vmul.f32 1.442695, %v2719_v43  ;;  %v3193_v63 = vmul.f32 1.442695, %v3175_v28  ;;  %v7055_v10 = vadd.f32 %v7005_v4, %v3082_v1  ;;  %v7057_v27 = vpop.f32.mrb[7].mxu1  ;;  %v7077_v18 = vadd.f32 %v4092_v3, %v7005_v4 }
 0x398   : > { %v2706_v34 = vand.u32 2147483647, %v7040_v33  ;;  %4409 = vpow2.f32 %v2739_v21  ;;  %v3162_v36 = vand.u32 2147483647, %v7043_v29  ;;  %v2705_v11 = vand.u32 2147483647, %v7047_v62 }
 0x399   : > { %4411 = vpow2.f32 %v3195_v5  ;;  %v3161_v54 = vand.u32 2147483647, %v7055_v10  ;;  %v7086_v24 = vadd.f32 %v4148_v40, %v7005_v4 }
 0x39a   : > { %v2722_v6 = vsub.f32 0.0, %v2706_v34  ;;  %v7061_v45 = vpop.f32.mrb[8].mxu0  ;;  %v7063_v50 = vpop.f32.mrb[8].mxu1  ;;  %4413 = vpow2.f32 %v2737_v31  ;;  %v3178_v51 = vsub.f32 0.0, %v3162_v36  ;;  %v7079_v52 = vsub.f32 0.0, %v2705_v11 }
 0x39b   : > { %v7067_v48 = vpop.f32.mrb[9].mxu0  ;;  %v7069_v23 = vpop.f32.mrb[9].mxu1  ;;  %4415 = vpow2.f32 %v3193_v63  ;;  %v7092_v3 = vsub.f32 0.0, %v3161_v54 }
 0x39c   : > { %v2743_v26 = vmul.f32 1.442695, %v2722_v6  ;;  %v3199_v17 = vmul.f32 1.442695, %v3178_v51 }
 0x39d   : > { %v4402_v42 = vpop.eup %4401 }
 0x39e   : > { %v4404_v44 = vpop.eup %4403  ;;  %v2774_v55 = vadd.f32 1.0, %v4402_v42  ;;  %v2777_v61 = vmul.f32 -0.5, %v4402_v42  ;;  %4417 = vpow2.f32 %v2743_v26  ;;  %v7081_v59 = vpop.f32.mrb[10].mxu0  ;;  %v2780_v25 = vand.u32 2147483647, %v4402_v42 }
 0x39f   : > { %v7083_v35 = vpop.f32.mrb[10].mxu1  ;;  %v4406_v39 = vpop.eup %4405  ;;  %v3230_v14 = vadd.f32 1.0, %v4404_v44  ;;  %v3233_v60 = vmul.f32 -0.5, %v4404_v44  ;;  %v3236_v19 = vand.u32 2147483647, %v4404_v44  ;;  %v7805_v26 = vmax.f32 %v7011_v41, 0.0 }
 0x3a0   : > { %v7088_v0 = vpop.f32.mrb[11].mxu0  ;;  %v7090_v46 = vpop.f32.mrb[11].mxu1  ;;  %4419 = vlog2.f32 %v2774_v55  ;;  %v2765_v2 = vadd.f32 1.0, %v4406_v39  ;;  %v2778_v22 = vadd.f32 1.0, %v2777_v61  ;;  %v2768_v43 = vmul.f32 -0.5, %v4406_v39 }
 0x3a1   : > { %v4408_v47 = vpop.eup %4407  ;;  %4421 = vlog2.f32 %v3230_v14  ;;  %v3234_v1 = vadd.f32 1.0, %v3233_v60  ;;  %v2771_v34 = vand.u32 2147483647, %v4406_v39  ;;  %vm7103_vm15 = vcmp.lt.f32.partialorder %v2780_v25, 0.0004427343 }
 0x3a2   : > { %4423 = vlog2.f32 %v2765_v2  ;;  %v3221_v28 = vadd.f32 1.0, %v4408_v47  ;;  %v7095_v21 = vpop.f32.mrb[12].mxu0  ;;  %v7097_v5 = vpop.f32.mrb[12].mxu1  ;;  %v2769_v63 = vadd.f32 1.0, %v2768_v43  ;;  %v3224_v36 = vmul.f32 -0.5, %v4408_v47 }
 0x3a3   : > { %7783 = vst [vmem:[#allocation56_spill] sm:$0xff] %v7097_v5  ;;  %v4410_v31 = vpop.eup %4409  ;;  %4425 = vpow2.f32 %v3199_v17  ;;  %v7099_v6 = vpop.f32.mrb[13].mxu0  ;;  %v2779_v14 = vmul.f32 %v4402_v42, %v2778_v22  ;;  %v3235_v60 = vmul.f32 %v4404_v44, %v3234_v1  ;;  %vm7107_vm1 = vcmp.lt.f32.partialorder %v3236_v19, 0.0004427343 }
 0x3a4   : > { %7784 = vst [vmem:[#allocation57_spill] sm:$0xff] %v7099_v6  ;;  %v7101_v11 = vpop.f32.mrb[13].mxu1  ;;  %v4412_v51 = vpop.eup %4411  ;;  %4427 = vlog2.f32 %v3221_v28  ;;  %v2792_v54 = vadd.f32 1.0, %v4410_v31  ;;  %v2795_v55 = vmul.f32 -0.5, %v4410_v31  ;;  %v3225_v17 = vadd.f32 1.0, %v3224_v36 }
 0x3a5   : > { %7785 = vst [vmem:[#allocation58_spill] sm:$0xff] %v7101_v11  ;;  %v4414_v61 = vpop.eup %4413  ;;  %v3227_v43 = vand.u32 2147483647, %v4408_v47  ;;  %v2798_v13 = vand.u32 2147483647, %v4410_v31  ;;  %v3248_v25 = vadd.f32 1.0, %v4412_v51  ;;  %v2770_v56 = vmul.f32 %v4406_v39, %v2769_v63 }
 0x3a6   : > { %v7111_v38 = vpop.eup %4415  ;;  %4429 = vlog2.f32 %v2792_v54  ;;  %v3251_v40 = vmul.f32 -0.5, %v4412_v51  ;;  %v7113_v20 = vpop.f32.mrb[14].mxu0  ;;  %vm7117_vm2 = vcmp.lt.f32.partialorder %v2771_v34, 0.0004427343  ;;  %v2796_v44 = vadd.f32 1.0, %v2795_v55 }
 0x3a7   : > { %7790 = vst [vmem:[#allocation59_spill] sm:$0xff] %v7113_v20  ;;  %v7115_v28 = vpop.f32.mrb[14].mxu1  ;;  %v2783_v19 = vadd.f32 1.0, %v4414_v61  ;;  %v7121_v22 = vpop.f32.mrb[15].mxu0  ;;  %4431 = vlog2.f32 %v3248_v25  ;;  %v3254_v54 = vand.u32 2147483647, %v4412_v51  ;;  %v3226_v55 = vmul.f32 %v4408_v47, %v3225_v17 }
 0x3a8   : > { %7791 = vst [vmem:[#allocation60_spill] sm:$0xff] %v7115_v28  ;;  %7794 = vst [vmem:[#allocation61_spill] sm:$0xff] %v7121_v22  ;;  %v7123_v1 = vpop.eup %4417  ;;  %v3252_v36 = vadd.f32 1.0, %v3251_v40  ;;  %v2786_v30 = vmul.f32 -0.5, %v4414_v61  ;;  %v7125_v53 = vpop.f32.mrb[15].mxu1  ;;  %v3239_v63 = vadd.f32 1.0, %v7111_v38 }
 0x3a9   : > { %7795 = vst [vmem:[#allocation62_spill] sm:$0xff] %v7125_v53  ;;  %vm7127_vm3 = vcmp.lt.f32.partialorder %v3227_v43, 0.0004427343  ;;  %4433 = vlog2.f32 %v2783_v19  ;;  %v2789_v39 = vand.u32 2147483647, %v4414_v61  ;;  %v3242_v40 = vmul.f32 -0.5, %v7111_v38 }
 0x3aa   : > { %v4420_v34 = vpop.eup %4419  ;;  %vm7132_vm4 = vcmp.lt.f32.partialorder %v2798_v13, 0.0004427343  ;;  %v2787_v25 = vadd.f32 1.0, %v2786_v30  ;;  %v2797_v53 = vmul.f32 %v4410_v31, %v2796_v44  ;;  %4435 = vlog2.f32 %v3239_v63 }
 0x3ab   : > { %v4422_v9 = vpop.eup %4421  ;;  %v2776_v22 = vmul.f32 0.6931472, %v4420_v34  ;;  %v2810_v43 = vadd.f32 1.0, %v7123_v1  ;;  %v3253_v20 = vmul.f32 %v4412_v51, %v3252_v36  ;;  %vm7138_vm5 = vcmp.lt.f32.partialorder %v3254_v54, 0.0004427343 }
 0x3ac   : > { %v4424_v28 = vpop.eup %4423  ;;  %v3232_v19 = vmul.f32 0.6931472, %v4422_v9  ;;  %v3245_v13 = vand.u32 2147483647, %v7111_v38  ;;  %vm7147_vm6 = vcmp.lt.f32.partialorder %v2789_v39, 0.0004427343  ;;  %v2788_v63 = vmul.f32 %v4414_v61, %v2787_v25 }
 0x3ad   : > { %v7143_v47 = vpop.eup %4425  ;;  %v2782_v30 = vsel %vm7103_vm15, %v2779_v14, %v2776_v22  ;;  %v2767_v17 = vmul.f32 0.6931472, %v4424_v28  ;;  %4437 = vlog2.f32 %v2810_v43  ;;  %v2813_v9 = vmul.f32 -0.5, %v7123_v1 }
 0x3ae   : > { %v4428_v51 = vpop.eup %4427  ;;  %v7804_v44 = vmax.f32 %v7008_v37, 0.0  ;;  %v3238_v54 = vsel %vm7107_vm1, %v3235_v60, %v3232_v19  ;;  %v3243_v34 = vadd.f32 1.0, %v3242_v40  ;;  %v2816_v39 = vand.u32 2147483647, %v7123_v1 }
 0x3af   : > { %v3366_v14 = vadd.f32 %v3238_v54, %v7805_v26  ;;  %v2773_v28 = vsel %vm7117_vm2, %v2770_v56, %v2767_v17  ;;  %v3223_v22 = vmul.f32 0.6931472, %v4428_v51  ;;  %v7806_v5 = vmax.f32 %v7014_v7, 0.0 }
 0x3b0   : > { %v2910_v36 = vadd.f32 %v2782_v30, %v7804_v44  ;;  %v4430_v43 = vpop.eup %4429  ;;  %vm7163_vm7 = vcmp.lt.f32.partialorder %v3245_v13, 0.0004427343  ;;  %v3266_v61 = vadd.f32 1.0, %v7143_v47  ;;  %v2814_v56 = vadd.f32 1.0, %v2813_v9 }
 0x3b1   : > { %v2909_v37 = vadd.f32 %v2773_v28, %v7806_v5  ;;  %v3738_v60 = vadd.f32 -0.6931472, %v3366_v14  ;;  %v3229_v41 = vsel %vm7127_vm3, %v3226_v55, %v3223_v22  ;;  %v2794_v2 = vmul.f32 0.6931472, %v4430_v43  ;;  %v4432_v42 = vpop.eup %4431 }
 0x3b2   : > { %v3721_v6 = vadd.f32 -0.6931472, %v2910_v36  ;;  %v7809_v40 = vmax.f32 %v7017_v58, 0.0  ;;  %v3244_v7 = vmul.f32 %v7111_v38, %v3243_v34  ;;  %4439 = vlog2.f32 %v3266_v61 }
 0x3b3   : > { %v3720_v25 = vadd.f32 -0.6931472, %v2909_v37  ;;  %v4434_v5 = vpop.eup %4433  ;;  %3398 = vst [vmem:[#allocation6 + $0x88] sm:$0xff] %v3738_v60  ;;  %v2800_v13 = vsel %vm7132_vm4, %v2797_v53, %v2794_v2  ;;  %v3250_v17 = vmul.f32 0.6931472, %v4432_v42  ;;  %v7812_v58 = vmax.f32 %v7024_v16, 0.0 }
 0x3b4   : > { %2942 = vst [vmem:[#allocation6 + $0x8] sm:$0xff] %v3721_v6  ;;  %v3365_v19 = vadd.f32 %v3229_v41, %v7809_v40  ;;  %vm7175_vm0 = vcmp.lt.f32.partialorder %v2816_v39, 0.0004427343  ;;  %v2741_v55 = vmul.f32 1.442695, %v7079_v52  ;;  %v3269_v38 = vmul.f32 -0.5, %v7143_v47  ;;  %v4436_v44 = vpop.eup %4435 }
 0x3b5   : > { %2941 = vst [vmem:[#allocation6] sm:$0xff] %v3720_v25  ;;  %v2912_v9 = vadd.f32 %v2800_v13, %v7812_v58  ;;  %v2785_v51 = vmul.f32 0.6931472, %v4434_v5  ;;  %v3256_v49 = vsel %vm7138_vm5, %v3253_v20, %v3250_v17  ;;  %v2815_v53 = vmul.f32 %v7123_v1, %v2814_v56 }
 0x3b6   : > { %v3737_v6 = vadd.f32 -0.6931472, %v3365_v19  ;;  %4441 = vpow2.f32 %v2741_v55  ;;  %v3197_v36 = vmul.f32 1.442695, %v7092_v3  ;;  %v7813_v52 = vmax.f32 %v7027_v32, 0.0 }
 0x3b7   : > { %v3723_v54 = vadd.f32 -0.6931472, %v2912_v9  ;;  %v2791_v16 = vsel %vm7147_vm6, %v2788_v63, %v2785_v51  ;;  %v3241_v26 = vmul.f32 0.6931472, %v4436_v44  ;;  %v4438_v14 = vpop.eup %4437  ;;  %v7814_v28 = vmax.f32 %v7030_v15, 0.0 }
 0x3b8   : > { %3397 = vst [vmem:[#allocation6 + $0x80] sm:$0xff] %v3737_v6  ;;  %v3368_v34 = vadd.f32 %v3256_v49, %v7813_v52  ;;  %v3272_v20 = vand.u32 2147483647, %v7143_v47  ;;  %4443 = vpow2.f32 %v3197_v36  ;;  %v7815_v11 = vand.u32 2147483647, %v7077_v18 }
 0x3b9   : > { %v2911_v22 = vadd.f32 %v2791_v16, %v7814_v28  ;;  %2944 = vst [vmem:[#allocation6 + $0x18] sm:$0xff] %v3723_v54  ;;  %v3247_v32 = vsel %vm7163_vm7, %v3244_v7, %v3241_v26  ;;  %v2812_v39 = vmul.f32 0.6931472, %v4438_v14  ;;  %v3270_v43 = vadd.f32 1.0, %v3269_v38 }
 0x3ba   : > { %v2724_v1 = vsub.f32 0.0, %v7815_v11  ;;  %v3740_v3 = vadd.f32 -0.6931472, %v3368_v34  ;;  %v7816_v63 = vmax.f32 %v7033_v57, 0.0  ;;  %v3164_v15 = vand.u32 2147483647, %v7086_v24 }
 0x3bb   : > { %v3722_v31 = vadd.f32 -0.6931472, %v2911_v22  ;;  %v2818_v60 = vsel %vm7175_vm0, %v2815_v53, %v2812_v39  ;;  %v7205_v41 = vadd.f32 %v7005_v4, %v7049_v12  ;;  %v7209_v30 = vadd.f32 %v7005_v4, %v7057_v27 }
 0x3bc   : > { %v3367_v37 = vadd.f32 %v3247_v32, %v7816_v63  ;;  %v2747_v61 = vmul.f32 1.442695, %v2724_v1  ;;  %3400 = vst [vmem:[#allocation6 + $0x98] sm:$0xff] %v3740_v3  ;;  %v7213_v2 = vadd.f32 %v7061_v45, %v7005_v4  ;;  %v7817_v56 = vmax.f32 %v7040_v33, 0.0  ;;  %v4440_v40 = vpop.eup %4439 }
 0x3bd   : > { %2943 = vst [vmem:[#allocation6 + $0x10] sm:$0xff] %v3722_v31  ;;  %v3180_v25 = vsub.f32 0.0, %v3164_v15  ;;  %v3146_v19 = vmax.f32 %v7043_v29, 0.0  ;;  %v3271_v12 = vmul.f32 %v7143_v47, %v3270_v43  ;;  %v2707_v7 = vand.u32 2147483647, %v7205_v41 }
 0x3be   : > { %v3739_v57 = vadd.f32 -0.6931472, %v3367_v37  ;;  %v2914_v42 = vadd.f32 %v2818_v60, %v7817_v56  ;;  %4445 = vpow2.f32 %v2747_v61  ;;  %v3163_v27 = vand.u32 2147483647, %v7209_v30 }
 0x3bf   : > { %v3268_v45 = vmul.f32 0.6931472, %v4440_v40  ;;  %v3203_v13 = vmul.f32 1.442695, %v3180_v25  ;;  %v7223_v17 = vadd.f32 %v7063_v50, %v7005_v4  ;;  %vm3273_vm8 = vcmp.lt.f32.partialorder %v3272_v20, 0.0004427343 }
 0x3c0   : > { %3399 = vst [vmem:[#allocation6 + $0x90] sm:$0xff] %v3739_v57  ;;  %v3725_v5 = vadd.f32 -0.6931472, %v2914_v42  ;;  %v2723_v33 = vsub.f32 0.0, %v2707_v7  ;;  %v3179_v8 = vsub.f32 0.0, %v3163_v27  ;;  %v4442_v29 = vpop.eup %4441  ;;  %v2689_v36 = vmax.f32 %v7047_v62, 0.0 }
 0x3c1   : > { %v2710_v55 = vand.u32 2147483647, %v7213_v2  ;;  %v3274_v47 = vsel %vm3273_vm8, %v3271_v12, %v3268_v45  ;;  %4447 = vpow2.f32 %v3203_v13  ;;  %v3166_v6 = vand.u32 2147483647, %v7223_v17 }
 0x3c2   : > { %2946 = vst [vmem:[#allocation6 + $0x28] sm:$0xff] %v3725_v5  ;;  %v3370_v58 = vadd.f32 %v3274_v47, %v3146_v19  ;;  %v2801_v9 = vadd.f32 1.0, %v4442_v29  ;;  %v4444_v51 = vpop.eup %4443  ;;  %v2745_v38 = vmul.f32 1.442695, %v2723_v33  ;;  %v3201_v44 = vmul.f32 1.442695, %v3179_v8 }
 0x3c3   : > { %v2726_v49 = vsub.f32 0.0, %v2710_v55  ;;  %v3182_v53 = vsub.f32 0.0, %v3166_v6  ;;  %v2804_v54 = vmul.f32 -0.5, %v4442_v29  ;;  %v3145_v52 = vmax.f32 %v7055_v10, 0.0 }
 0x3c4   : > { %v3742_v50 = vadd.f32 -0.6931472, %v3370_v58  ;;  %4449 = vlog2.f32 %v2801_v9  ;;  %v3257_v34 = vadd.f32 1.0, %v4444_v51  ;;  %v3260_v16 = vmul.f32 -0.5, %v4444_v51 }
 0x3c5   : > { %4451 = vpow2.f32 %v2745_v38  ;;  %v2692_v26 = vmax.f32 %v7077_v18, 0.0  ;;  %v2751_v14 = vmul.f32 1.442695, %v2726_v49  ;;  %v3207_v28 = vmul.f32 1.442695, %v3182_v53 }
 0x3c6   : > { %3402 = vst [vmem:[#allocation6 + $0xa8] sm:$0xff] %v3742_v50  ;;  %4453 = vpow2.f32 %v3201_v44  ;;  %v2807_v20 = vand.u32 2147483647, %v4442_v29  ;;  %v3148_v11 = vmax.f32 %v7086_v24, 0.0  ;;  %v7233_v1 = vadd.f32 %v7005_v4, %v7067_v48 }
 0x3c7   : > { %4455 = vlog2.f32 %v3257_v34  ;;  %v2805_v3 = vadd.f32 1.0, %v2804_v54  ;;  %v3261_v43 = vadd.f32 1.0, %v3260_v16  ;;  %v3263_v31 = vand.u32 2147483647, %v4444_v51 }
 0x3c8   : > { %v4446_v22 = vpop.eup %4445  ;;  %4457 = vpow2.f32 %v2751_v14  ;;  %v2709_v63 = vand.u32 2147483647, %v7233_v1  ;;  %v2691_v61 = vmax.f32 %v7205_v41, 0.0  ;;  %v3147_v15 = vmax.f32 %v7209_v30, 0.0  ;;  %v7834_v41 = vld [vmem:[#allocation56_spill] sm:$0xff] }
 0x3c9   : > { %v2828_v32 = vadd.f32 1.0, %v4446_v22  ;;  %v2831_v39 = vmul.f32 -0.5, %v4446_v22  ;;  %4459 = vpow2.f32 %v3207_v28  ;;  %v2834_v37 = vand.u32 2147483647, %v4446_v22 }
 0x3ca   : > { %v2694_v57 = vmax.f32 %v7213_v2, 0.0  ;;  %v3150_v48 = vmax.f32 %v7223_v17, 0.0  ;;  %v2725_v56 = vsub.f32 0.0, %v2709_v63  ;;  %v7242_v42 = vadd.f32 %v7005_v4, %v7069_v23 }
 0x3cb   : > { %4461 = vlog2.f32 %v2828_v32  ;;  %v4448_v60 = vpop.eup %4447  ;;  %v2806_v25 = vmul.f32 %v4442_v29, %v2805_v3  ;;  %vm7244_vm9 = vcmp.lt.f32.partialorder %v2807_v20, 0.0004427343  ;;  %v2832_v19 = vadd.f32 1.0, %v2831_v39 }
 0x3cc   : > { %v3284_v12 = vadd.f32 1.0, %v4448_v60  ;;  %v3262_v7 = vmul.f32 %v4444_v51, %v3261_v43  ;;  %vm7248_vm10 = vcmp.lt.f32.partialorder %v3263_v31, 0.0004427343  ;;  %v3287_v5 = vmul.f32 -0.5, %v4448_v60 }
 0x3cd   : > { %v2749_v45 = vmul.f32 1.442695, %v2725_v56  ;;  %vm7252_vm11 = vcmp.lt.f32.partialorder %v2834_v37, 0.0004427343  ;;  %v3290_v23 = vand.u32 2147483647, %v4448_v60  ;;  %v7258_v8 = vadd.f32 %v7081_v59, %v7005_v4 }
 0x3ce   : > { %v4450_v13 = vpop.eup %4449  ;;  %4463 = vlog2.f32 %v3284_v12  ;;  %v3165_v47 = vand.u32 2147483647, %v7242_v42  ;;  %v7263_v6 = vadd.f32 %v7083_v35, %v7005_v4  ;;  %v2833_v9 = vmul.f32 %v4446_v22, %v2832_v19 }
 0x3cf   : > { %v4452_v55 = vpop.eup %4451  ;;  %v2803_v29 = vmul.f32 0.6931472, %v4450_v13  ;;  %4465 = vpow2.f32 %v2749_v45  ;;  %v7267_v44 = vadd.f32 %v7005_v4, %v7088_v0  ;;  %v3288_v53 = vadd.f32 1.0, %v3287_v5 }
 0x3d0   : > { %v4454_v58 = vpop.eup %4453  ;;  %v2819_v51 = vadd.f32 1.0, %v4452_v55  ;;  %v2822_v38 = vmul.f32 -0.5, %v4452_v55  ;;  %vm7273_vm12 = vcmp.lt.f32.partialorder %v3290_v23, 0.0004427343  ;;  %v2712_v0 = vand.u32 2147483647, %v7258_v8 }
 0x3d1   : > { %v4456_v49 = vpop.eup %4455  ;;  %v2809_v59 = vsel %vm7244_vm9, %v2806_v25, %v2803_v29  ;;  %v3275_v50 = vadd.f32 1.0, %v4454_v58  ;;  %v3278_v54 = vmul.f32 -0.5, %v4454_v58  ;;  %v2825_v22 = vand.u32 2147483647, %v4452_v55 }
 0x3d2   : > { %v4458_v34 = vpop.eup %4457  ;;  %v2913_v35 = vadd.f32 %v2809_v59, %v2689_v36  ;;  %v3259_v16 = vmul.f32 0.6931472, %v4456_v49  ;;  %4467 = vlog2.f32 %v2819_v51  ;;  %v3281_v20 = vand.u32 2147483647, %v4454_v58 }
 0x3d3   : > { %v4460_v28 = vpop.eup %4459  ;;  %4469 = vlog2.f32 %v3275_v50  ;;  %v3181_v3 = vsub.f32 0.0, %v3165_v47  ;;  %v2823_v62 = vadd.f32 1.0, %v2822_v38  ;;  %v2846_v36 = vadd.f32 1.0, %v4458_v34 }
 0x3d4   : > { %v3724_v39 = vadd.f32 -0.6931472, %v2913_v35  ;;  %v3265_v43 = vsel %vm7248_vm10, %v3262_v7, %v3259_v16  ;;  %v3289_v37 = vmul.f32 %v4448_v60, %v3288_v53  ;;  %v3279_v56 = vadd.f32 1.0, %v3278_v54 }
 0x3d5   : > { %v4462_v32 = vpop.eup %4461  ;;  %v3369_v31 = vadd.f32 %v3265_v43, %v3145_v52  ;;  %4471 = vlog2.f32 %v2846_v36  ;;  %v2849_v25 = vmul.f32 -0.5, %v4458_v34  ;;  %v2852_v40 = vand.u32 2147483647, %v4458_v34 }
 0x3d6   : > { %v2830_v63 = vmul.f32 0.6931472, %v4462_v32  ;;  %2945 = vst [vmem:[#allocation6 + $0x20] sm:$0xff] %v3724_v39  ;;  %v3302_v19 = vadd.f32 1.0, %v4460_v28  ;;  %vm7284_vm13 = vcmp.lt.f32.partialorder %v2825_v22, 0.0004427343  ;;  %v2824_v52 = vmul.f32 %v4452_v55, %v2823_v62 }
 0x3d7   : > { %v3741_v12 = vadd.f32 -0.6931472, %v3369_v31  ;;  %v3305_v7 = vmul.f32 -0.5, %v4460_v28  ;;  %vm7290_vm14 = vcmp.lt.f32.partialorder %v3281_v20, 0.0004427343  ;;  %v3280_v23 = vmul.f32 %v4454_v58, %v3279_v56 }
 0x3d8   : > { %v2836_v5 = vsel %vm7252_vm11, %v2833_v9, %v2830_v63  ;;  %v4464_v45 = vpop.eup %4463  ;;  %4473 = vlog2.f32 %v3302_v19  ;;  %v3308_v29 = vand.u32 2147483647, %v4460_v28  ;;  %v3205_v47 = vmul.f32 1.442695, %v3181_v3 }
 0x3d9   : > { %v2916_v10 = vadd.f32 %v2836_v5, %v2692_v26  ;;  %v7294_v13 = vpop.eup %4465  ;;  %3401 = vst [vmem:[#allocation6 + $0xa0] sm:$0xff] %v3741_v12  ;;  %v3286_v33 = vmul.f32 0.6931472, %v4464_v45  ;;  %v2850_v51 = vadd.f32 1.0, %v2849_v25  ;;  %vm7296_vm15 = vcmp.lt.f32.partialorder %v2852_v40, 0.0004427343 }
 0x3da   : > { %v2837_v18 = vadd.f32 1.0, %v7294_v13  ;;  %v3306_v55 = vadd.f32 1.0, %v3305_v7  ;;  %4475 = vpow2.f32 %v3205_v47  ;;  %v2728_v49 = vsub.f32 0.0, %v2712_v0 }
 0x3db   : > { %v3727_v9 = vadd.f32 -0.6931472, %v2916_v10  ;;  %v3292_v26 = vsel %vm7273_vm12, %v3289_v37, %v3286_v33  ;;  %v2840_v53 = vmul.f32 -0.5, %v7294_v13  ;;  %v3168_v50 = vand.u32 2147483647, %v7263_v6 }
 0x3dc   : > { %v4468_v59 = vpop.eup %4467  ;;  %v3372_v58 = vadd.f32 %v3292_v26, %v3148_v11  ;;  %4477 = vlog2.f32 %v2837_v18  ;;  %vm7307_vm1 = vcmp.lt.f32.partialorder %v3308_v29, 0.0004427343  ;;  %v2755_v14 = vmul.f32 1.442695, %v2728_v49 }
 0x3dd   : > { %2948 = vst [vmem:[#allocation6 + $0x38] sm:$0xff] %v3727_v9  ;;  %v4470_v54 = vpop.eup %4469  ;;  %v2821_v35 = vmul.f32 0.6931472, %v4468_v59  ;;  %v7313_v0 = vadd.f32 %v7005_v4, %v7090_v46  ;;  %v2851_v24 = vmul.f32 %v4458_v34, %v2850_v51  ;;  %v3184_v11 = vsub.f32 0.0, %v3168_v50 }
 0x3de   : > { %v3744_v22 = vadd.f32 -0.6931472, %v3372_v58  ;;  %v3277_v20 = vmul.f32 0.6931472, %v4470_v54  ;;  %v3307_v32 = vmul.f32 %v4460_v28, %v3306_v55  ;;  %4479 = vpow2.f32 %v2755_v14 }
 0x3df   : > { %v2827_v3 = vsel %vm7284_vm13, %v2824_v52, %v2821_v35  ;;  %v2711_v39 = vand.u32 2147483647, %v7267_v44  ;;  %v4472_v43 = vpop.eup %4471  ;;  %v2841_v36 = vadd.f32 1.0, %v2840_v53  ;;  %v3211_v31 = vmul.f32 1.442695, %v3184_v11 }
 0x3e0   : > { %3404 = vst [vmem:[#allocation6 + $0xb8] sm:$0xff] %v3744_v22  ;;  %v2915_v62 = vadd.f32 %v2827_v3, %v2691_v61  ;;  %v3283_v46 = vsel %vm7290_vm14, %v3280_v23, %v3277_v20  ;;  %v2848_v63 = vmul.f32 0.6931472, %v4472_v43  ;;  %v3167_v28 = vand.u32 2147483647, %v7313_v0 }
 0x3e1   : > { %v3371_v34 = vadd.f32 %v3283_v46, %v3147_v15  ;;  %v2727_v37 = vsub.f32 0.0, %v2711_v39  ;;  %4481 = vpow2.f32 %v3211_v31  ;;  %v7327_v40 = vadd.f32 %v7095_v21, %v7005_v4 }
 0x3e2   : > { %v4474_v56 = vpop.eup %4473  ;;  %v3726_v25 = vadd.f32 -0.6931472, %v2915_v62  ;;  %v7331_v61 = vadd.f32 %v7834_v41, %v7005_v4  ;;  %v2854_v30 = vsel %vm7296_vm15, %v2851_v24, %v2848_v63  ;;  %v2843_v27 = vand.u32 2147483647, %v7294_v13 }
 0x3e3   : > { %v3743_v19 = vadd.f32 -0.6931472, %v3371_v34  ;;  %v3304_v15 = vmul.f32 0.6931472, %v4474_v56  ;;  %v2753_v12 = vmul.f32 1.442695, %v2727_v37  ;;  %v2918_v5 = vadd.f32 %v2854_v30, %v2694_v57 }
 0x3e4   : > { %2947 = vst [vmem:[#allocation6 + $0x30] sm:$0xff] %v3726_v25  ;;  %v3183_v7 = vsub.f32 0.0, %v3167_v28  ;;  %v2714_v21 = vand.u32 2147483647, %v7327_v40  ;;  %v4476_v45 = vpop.eup %4475  ;;  %v3170_v52 = vand.u32 2147483647, %v7331_v61  ;;  %v2842_v47 = vmul.f32 %v7294_v13, %v2841_v36 }
 0x3e5   : > { %3403 = vst [vmem:[#allocation6 + $0xb0] sm:$0xff] %v3743_v19  ;;  %v3310_v10 = vsel %vm7307_vm1, %v3307_v32, %v3304_v15  ;;  %4483 = vpow2.f32 %v2753_v12  ;;  %v3729_v33 = vadd.f32 -0.6931472, %v2918_v5  ;;  %v3293_v2 = vadd.f32 1.0, %v4476_v45  ;;  %v7836_v13 = vld [vmem:[#allocation58_spill] sm:$0xff]  ;;  %v7837_v34 = vld [vmem:[#allocation59_spill] sm:$0xff] }
 0x3e6   : > { %v4478_v60 = vpop.eup %4477  ;;  %v3374_v23 = vadd.f32 %v3310_v10, %v3150_v48  ;;  %v2693_v57 = vmax.f32 %v7233_v1, 0.0  ;;  %v3209_v9 = vmul.f32 1.442695, %v3183_v7  ;;  %vm2844_vm2 = vcmp.lt.f32.partialorder %v2843_v27, 0.0004427343  ;;  %v7835_v48 = vld [vmem:[#allocation57_spill] sm:$0xff] }
 0x3e7   : > { %v2839_v29 = vmul.f32 0.6931472, %v4478_v60  ;;  %2950 = vst [vmem:[#allocation6 + $0x48] sm:$0xff] %v3729_v33  ;;  %4485 = vlog2.f32 %v3293_v2  ;;  %v2730_v38 = vsub.f32 0.0, %v2714_v21  ;;  %v3186_v55 = vsub.f32 0.0, %v3170_v52  ;;  %v7842_v27 = vld [vmem:[#allocation60_spill] sm:$0xff] }
 0x3e8   : > { %v3746_v51 = vadd.f32 -0.6931472, %v3374_v23  ;;  %v4480_v18 = vpop.eup %4479  ;;  %4487 = vpow2.f32 %v3209_v9  ;;  %v7348_v59 = vadd.f32 %v7005_v4, %v7835_v48  ;;  %v3296_v1 = vmul.f32 -0.5, %v4476_v45  ;;  %v7848_v15 = vld [vmem:[#allocation62_spill] sm:$0xff] }
 0x3e9   : > { %v2845_v26 = vsel %vm2844_vm2, %v2842_v47, %v2839_v29  ;;  %v2864_v17 = vadd.f32 1.0, %v4480_v18  ;;  %v2759_v58 = vmul.f32 1.442695, %v2730_v38  ;;  %v7352_v53 = vadd.f32 %v7005_v4, %v7836_v13 }
 0x3ea   : > { %3406 = vst [vmem:[#allocation6 + $0xc8] sm:$0xff] %v3746_v51  ;;  %v2917_v49 = vadd.f32 %v2845_v26, %v2693_v57  ;;  %v3215_v35 = vmul.f32 1.442695, %v3186_v55  ;;  %v3149_v16 = vmax.f32 %v7242_v42, 0.0  ;;  %v3299_v22 = vand.u32 2147483647, %v4476_v45 }
 0x3eb   : > { %v4482_v50 = vpop.eup %4481  ;;  %4489 = vlog2.f32 %v2864_v17  ;;  %v2867_v20 = vmul.f32 -0.5, %v4480_v18  ;;  %v2713_v24 = vand.u32 2147483647, %v7348_v59  ;;  %v3297_v3 = vadd.f32 1.0, %v3296_v1 }
 0x3ec   : > { %v3728_v54 = vadd.f32 -0.6931472, %v2917_v49  ;;  %v3320_v14 = vadd.f32 1.0, %v4482_v50  ;;  %4491 = vpow2.f32 %v2759_v58  ;;  %v2696_v32 = vmax.f32 %v7258_v8, 0.0 }
 0x3ed   : > { %v3169_v39 = vand.u32 2147483647, %v7352_v53  ;;  %v2870_v43 = vand.u32 2147483647, %v4480_v18  ;;  %v3323_v62 = vmul.f32 -0.5, %v4482_v50  ;;  %v3152_v42 = vmax.f32 %v7263_v6, 0.0 }
 0x3ee   : > { %2949 = vst [vmem:[#allocation6 + $0x40] sm:$0xff] %v3728_v54  ;;  %4493 = vlog2.f32 %v3320_v14  ;;  %v2729_v36 = vsub.f32 0.0, %v2713_v24  ;;  %v7364_v63 = vadd.f32 %v7837_v34, %v7005_v4  ;;  %vm7366_vm3 = vcmp.lt.f32.partialorder %v3299_v22, 0.0004427343 }
 0x3ef   : > { %v7356_v11 = vpop.eup %4483  ;;  %4495 = vpow2.f32 %v3215_v35  ;;  %v3185_v31 = vsub.f32 0.0, %v3169_v39  ;;  %v2868_v8 = vadd.f32 1.0, %v2867_v20  ;;  %v3326_v56 = vand.u32 2147483647, %v4482_v50 }
 0x3f0   : > { %v2855_v46 = vadd.f32 1.0, %v7356_v11  ;;  %v3298_v19 = vmul.f32 %v4476_v45, %v3297_v3  ;;  %v2757_v30 = vmul.f32 1.442695, %v2729_v36  ;;  %vm7372_vm4 = vcmp.lt.f32.partialorder %v2870_v43, 0.0004427343 }
 0x3f1   : > { %v4486_v37 = vpop.eup %4485  ;;  %v3213_v6 = vmul.f32 1.442695, %v3185_v31  ;;  %v3324_v12 = vadd.f32 1.0, %v3323_v62  ;;  %v7379_v7 = vadd.f32 %v7842_v27, %v7005_v4  ;;  %v2858_v10 = vmul.f32 -0.5, %v7356_v11 }
 0x3f2   : > { %4497 = vlog2.f32 %v2855_v46  ;;  %v7370_v25 = vpop.eup %4487  ;;  %v3295_v41 = vmul.f32 0.6931472, %v4486_v37  ;;  %v2716_v45 = vand.u32 2147483647, %v7364_v63  ;;  %v2869_v33 = vmul.f32 %v4480_v18, %v2868_v8 }
 0x3f3   : > { %v3311_v5 = vadd.f32 1.0, %v7370_v25  ;;  %4499 = vpow2.f32 %v2757_v30  ;;  %vm7385_vm5 = vcmp.lt.f32.partialorder %v3326_v56, 0.0004427343  ;;  %v2861_v4 = vand.u32 2147483647, %v7356_v11 }
 0x3f4   : > { %v3301_v21 = vsel %vm7366_vm3, %v3298_v19, %v3295_v41  ;;  %v2732_v57 = vsub.f32 0.0, %v2716_v45  ;;  %v2695_v9 = vmax.f32 %v7267_v44, 0.0  ;;  %v3314_v51 = vmul.f32 -0.5, %v7370_v25 }
 0x3f5   : > { %v4490_v52 = vpop.eup %4489  ;;  %v3373_v60 = vadd.f32 %v3301_v21, %v3149_v16  ;;  %4501 = vlog2.f32 %v3311_v5  ;;  %v3172_v38 = vand.u32 2147483647, %v7379_v7  ;;  %v3325_v55 = vmul.f32 %v4482_v50, %v3324_v12  ;;  %v4529_v16 = vld [vmem:[%s7782_s4] ss:$0 sm:$0xff]  ;;  %v7845_v50 = vld [vmem:[#allocation61_spill] sm:$0xff] }
 0x3f6   : > { %v2866_v2 = vmul.f32 0.6931472, %v4490_v52  ;;  %4503 = vpow2.f32 %v3213_v6  ;;  %v7390_v29 = vpop.eup %4491  ;;  %v2859_v49 = vadd.f32 1.0, %v2858_v10  ;;  %v2763_v13 = vmul.f32 1.442695, %v2732_v57 }
 0x3f7   : > { %v3745_v47 = vadd.f32 -0.6931472, %v3373_v60  ;;  %v2882_v17 = vadd.f32 1.0, %v7390_v29  ;;  %v3188_v54 = vsub.f32 0.0, %v3172_v38  ;;  %v3317_v44 = vand.u32 2147483647, %v7370_v25 }
 0x3f8   : > { %v4494_v18 = vpop.eup %4493  ;;  %v2872_v26 = vsel %vm7372_vm4, %v2869_v33, %v2866_v2  ;;  %v7406_v14 = vadd.f32 %v4529_v16, %v7845_v50  ;;  %v3151_v3 = vmax.f32 %v7313_v0, 0.0  ;;  %v2860_v62 = vmul.f32 %v7356_v11, %v2859_v49 }
 0x3f9   : > { %v7398_v48 = vpop.eup %4495  ;;  %3405 = vst [vmem:[#allocation6 + $0xc0] sm:$0xff] %v3745_v47  ;;  %v2920_v1 = vadd.f32 %v2872_v26, %v2696_v32  ;;  %v3322_v58 = vmul.f32 0.6931472, %v4494_v18  ;;  %4505 = vlog2.f32 %v2882_v17  ;;  %v3315_v32 = vadd.f32 1.0, %v3314_v51 }
 0x3fa   : > { %v3338_v35 = vadd.f32 1.0, %v7398_v48  ;;  %vm2862_vm6 = vcmp.lt.f32.partialorder %v2861_v4, 0.0004427343  ;;  %v2885_v46 = vmul.f32 -0.5, %v7390_v29  ;;  %v3219_v36 = vmul.f32 1.442695, %v3188_v54 }
 0x3fb   : > { %v3731_v20 = vadd.f32 -0.6931472, %v2920_v1  ;;  %v3328_v24 = vsel %vm7385_vm5, %v3325_v55, %v3322_v58  ;;  %vm7415_vm7 = vcmp.lt.f32.partialorder %v3317_v44, 0.0004427343  ;;  %v2715_v0 = vand.u32 2147483647, %v7406_v14 }
 0x3fc   : > { %v4498_v22 = vpop.eup %4497  ;;  %v3376_v39 = vadd.f32 %v3328_v24, %v3152_v42  ;;  %4507 = vlog2.f32 %v3338_v35  ;;  %v3316_v11 = vmul.f32 %v7370_v25, %v3315_v32  ;;  %v3341_v56 = vmul.f32 -0.5, %v7398_v48 }
 0x3fd   : > { %v2857_v43 = vmul.f32 0.6931472, %v4498_v22  ;;  %2952 = vst [vmem:[#allocation6 + $0x58] sm:$0xff] %v3731_v20  ;;  %4509 = vpow2.f32 %v2763_v13  ;;  %v7413_v31 = vpop.eup %4499  ;;  %v2731_v6 = vsub.f32 0.0, %v2715_v0  ;;  %v7426_v12 = vadd.f32 %v4529_v16, %v7848_v15 }
 0x3fe   : > { %v3748_v34 = vadd.f32 -0.6931472, %v3376_v39  ;;  %v2873_v41 = vadd.f32 1.0, %v7413_v31  ;;  %4511 = vpow2.f32 %v3219_v36  ;;  %v2886_v27 = vadd.f32 1.0, %v2885_v46 }
 0x3ff   : > { %v2863_v37 = vsel %vm2862_vm6, %v2860_v62, %v2857_v43  ;;  %v4502_v42 = vpop.eup %4501  ;;  %v2888_v10 = vand.u32 2147483647, %v7390_v29  ;;  %v3342_v52 = vadd.f32 1.0, %v3341_v56  ;;  %v2761_v60 = vmul.f32 1.442695, %v2731_v6 }
 0x400   : > { %v2919_v8 = vadd.f32 %v2863_v37, %v2695_v9  ;;  %v7423_v19 = vpop.eup %4503  ;;  %3408 = vst [vmem:[#allocation6 + $0xd8] sm:$0xff] %v3748_v34  ;;  %v3313_v30 = vmul.f32 0.6931472, %v4502_v42  ;;  %4513 = vlog2.f32 %v2873_v41  ;;  %v3344_v23 = vand.u32 2147483647, %v7398_v48 }
 0x401   : > { %v3329_v21 = vadd.f32 1.0, %v7423_v19  ;;  %v2876_v2 = vmul.f32 -0.5, %v7413_v31  ;;  %v3171_v4 = vand.u32 2147483647, %v7426_v12  ;;  %v2887_v9 = vmul.f32 %v7390_v29, %v2886_v27 }
 0x402   : > { %v3730_v5 = vadd.f32 -0.6931472, %v2919_v8  ;;  %v3319_v25 = vsel %vm7415_vm7, %v3316_v11, %v3313_v30  ;;  %v2698_v38 = vmax.f32 %v7327_v40, 0.0  ;;  %vm2889_vm0 = vcmp.lt.f32.partialorder %v2888_v10, 0.0004427343 }
 0x403   : > { %v3375_v45 = vadd.f32 %v3319_v25, %v3151_v3  ;;  %4515 = vlog2.f32 %v3329_v21  ;;  %v4506_v33 = vpop.eup %4505  ;;  %v3332_v18 = vmul.f32 -0.5, %v7423_v19  ;;  %v3187_v26 = vsub.f32 0.0, %v3171_v4 }
 0x404   : > { %2951 = vst [vmem:[#allocation6 + $0x50] sm:$0xff] %v3730_v5  ;;  %v2884_v47 = vmul.f32 0.6931472, %v4506_v33  ;;  %4517 = vpow2.f32 %v2761_v60  ;;  %v3154_v17 = vmax.f32 %v7331_v61, 0.0  ;;  %v3343_v58 = vmul.f32 %v7398_v48, %v3342_v52 }
 0x405   : > { %v3747_v57 = vadd.f32 -0.6931472, %v3375_v45  ;;  %vm3345_vm8 = vcmp.lt.f32.partialorder %v3344_v23, 0.0004427343  ;;  %v2877_v54 = vadd.f32 1.0, %v2876_v2  ;;  %v3333_v20 = vadd.f32 1.0, %v3332_v18 }
 0x406   : > { %v4508_v51 = vpop.eup %4507  ;;  %v2890_v49 = vsel %vm2889_vm0, %v2887_v9, %v2884_v47  ;;  %v2879_v35 = vand.u32 2147483647, %v7413_v31  ;;  %v3217_v40 = vmul.f32 1.442695, %v3187_v26  ;;  %v3335_v3 = vand.u32 2147483647, %v7423_v19 }
 0x407   : > { %v4510_v55 = vpop.eup %4509  ;;  %3407 = vst [vmem:[#allocation6 + $0xd0] sm:$0xff] %v3747_v57  ;;  %v3340_v1 = vmul.f32 0.6931472, %v4508_v51  ;;  %v2922_v13 = vadd.f32 %v2890_v49, %v2698_v38  ;;  %v2878_v39 = vmul.f32 %v7413_v31, %v2877_v54  ;;  %v2697_v62 = vmax.f32 %v7348_v59, 0.0 }
 0x408   : > { %v2900_v29 = vadd.f32 1.0, %v4510_v55  ;;  %v4512_v16 = vpop.eup %4511  ;;  %vm2880_vm9 = vcmp.lt.f32.partialorder %v2879_v35, 0.0004427343  ;;  %v2903_v46 = vmul.f32 -0.5, %v4510_v55  ;;  %v3334_v37 = vmul.f32 %v7423_v19, %v3333_v20 }
 0x409   : > { %v3346_v44 = vsel %vm3345_vm8, %v3343_v58, %v3340_v1  ;;  %v3733_v50 = vadd.f32 -0.6931472, %v2922_v13  ;;  %v3356_v61 = vadd.f32 1.0, %v4512_v16  ;;  %v3153_v42 = vmax.f32 %v7352_v53, 0.0 }
 0x40a   : > { %v3378_v22 = vadd.f32 %v3346_v44, %v3154_v17  ;;  %4519 = vlog2.f32 %v2900_v29  ;;  %v4514_v24 = vpop.eup %4513  ;;  %vm3336_vm10 = vcmp.lt.f32.partialorder %v3335_v3, 0.0004427343  ;;  %v3359_v11 = vmul.f32 -0.5, %v4512_v16 }
 0x40b   : > { %2954 = vst [vmem:[#allocation6 + $0x68] sm:$0xff] %v3733_v50  ;;  %v2875_v48 = vmul.f32 0.6931472, %v4514_v24  ;;  %4521 = vpow2.f32 %v3217_v40  ;;  %v2904_v30 = vadd.f32 1.0, %v2903_v46  ;;  %v2906_v59 = vand.u32 2147483647, %v4510_v55 }
 0x40c   : > { %v3750_v32 = vadd.f32 -0.6931472, %v3378_v22  ;;  %4523 = vlog2.f32 %v3356_v61  ;;  %v3360_v5 = vadd.f32 1.0, %v3359_v11  ;;  %v3362_v21 = vand.u32 2147483647, %v4512_v16 }
 0x40d   : > { %v4516_v43 = vpop.eup %4515  ;;  %v2881_v36 = vsel %vm2880_vm9, %v2878_v39, %v2875_v48  ;;  %v2905_v19 = vmul.f32 %v4510_v55, %v2904_v30  ;;  %v2700_v53 = vmax.f32 %v7364_v63, 0.0  ;;  %vm2907_vm11 = vcmp.lt.f32.partialorder %v2906_v59, 0.0004427343 }
 0x40e   : > { %3410 = vst [vmem:[#allocation6 + $0xe8] sm:$0xff] %v3750_v32  ;;  %v3331_v34 = vmul.f32 0.6931472, %v4516_v43  ;;  %v4518_v28 = vpop.eup %4517  ;;  %v2921_v0 = vadd.f32 %v2881_v36, %v2697_v62  ;;  %v3361_v2 = vmul.f32 %v4512_v16, %v3360_v5  ;;  %v3156_v4 = vmax.f32 %v7379_v7, 0.0 }
 0x40f   : > { %v2891_v31 = vadd.f32 1.0, %v4518_v28  ;;  %v2894_v25 = vmul.f32 -0.5, %v4518_v28  ;;  %vm3363_vm12 = vcmp.lt.f32.partialorder %v3362_v21, 0.0004427343  ;;  %v2897_v51 = vand.u32 2147483647, %v4518_v28 }
 0x410   : > { %v3337_v8 = vsel %vm3336_vm10, %v3334_v37, %v3331_v34  ;;  %v3732_v56 = vadd.f32 -0.6931472, %v2921_v0  ;;  %v2699_v17 = vmax.f32 %v7406_v14, 0.0  ;;  %v3155_v40 = vmax.f32 %v7426_v12, 0.0 }
 0x411   : > { %v3377_v41 = vadd.f32 %v3337_v8, %v3153_v42  ;;  %4525 = vlog2.f32 %v2891_v31  ;;  %v2895_v57 = vadd.f32 1.0, %v2894_v25  ;;  %vm2898_vm13 = vcmp.lt.f32.partialorder %v2897_v51, 0.0004427343 }
 0x412   : > { %2953 = vst [vmem:[#allocation6 + $0x60] sm:$0xff] %v3732_v56 }
 0x413   : > { %v3749_v6 = vadd.f32 -0.6931472, %v3377_v41  ;;  %v2896_v49 = vmul.f32 %v4518_v28, %v2895_v57 }
 0x414   : > { %v4520_v15 = vpop.eup %4519 }
 0x415   : > { %3409 = vst [vmem:[#allocation6 + $0xe0] sm:$0xff] %v3749_v6  ;;  %v2902_v27 = vmul.f32 0.6931472, %v4520_v15  ;;  %v4522_v10 = vpop.eup %4521 }
 0x416   : > { %v4524_v45 = vpop.eup %4523  ;;  %v3347_v60 = vadd.f32 1.0, %v4522_v10  ;;  %v3350_v26 = vmul.f32 -0.5, %v4522_v10  ;;  %v3353_v13 = vand.u32 2147483647, %v4522_v10 }
 0x417   : > { %v2908_v52 = vsel %vm2907_vm11, %v2905_v19, %v2902_v27  ;;  %v3358_v23 = vmul.f32 0.6931472, %v4524_v45 }
 0x418   : > { %v2924_v33 = vadd.f32 %v2908_v52, %v2700_v53  ;;  %4527 = vlog2.f32 %v3347_v60  ;;  %v3351_v7 = vadd.f32 1.0, %v3350_v26  ;;  %vm3354_vm14 = vcmp.lt.f32.partialorder %v3353_v13, 0.0004427343 }
 0x419   : > { %v3364_v9 = vsel %vm3363_vm12, %v3361_v2, %v3358_v23 }
 0x41a   : > { %v3735_v47 = vadd.f32 -0.6931472, %v2924_v33  ;;  %v3380_v38 = vadd.f32 %v3364_v9, %v3156_v4  ;;  %v3352_v35 = vmul.f32 %v4522_v10, %v3351_v7 }
 0x41b   : > { %v4526_v18 = vpop.eup %4525 }
 0x41c   : > { %2956 = vst [vmem:[#allocation6 + $0x78] sm:$0xff] %v3735_v47  ;;  %v3752_v63 = vadd.f32 -0.6931472, %v3380_v38  ;;  %v2893_v55 = vmul.f32 0.6931472, %v4526_v18 }
 0x41e   : > { %3412 = vst [vmem:[#allocation6 + $0xf8] sm:$0xff] %v3752_v63  ;;  %v2899_v1 = vsel %vm2898_vm13, %v2896_v49, %v2893_v55 }
 0x41f   : > { %v2923_v58 = vadd.f32 %v2899_v1, %v2699_v17 }
 0x421   : > { %v3734_v54 = vadd.f32 -0.6931472, %v2923_v58 }
 0x422   : > { %v4528_v29 = vpop.eup %4527 }
 0x423   : > { %2955 = vst [vmem:[#allocation6 + $0x70] sm:$0xff] %v3734_v54  ;;  %v3349_v44 = vmul.f32 0.6931472, %v4528_v29 }
 0x425   : > { %v3355_v16 = vsel %vm3354_vm14, %v3352_v35, %v3349_v44 }
 0x426   : > { %v3379_v50 = vadd.f32 %v3355_v16, %v3155_v40 }
 0x428   : > { %v3751_v22 = vadd.f32 -0.6931472, %v3379_v50 }
 0x42a   : > { %3411 = vst [vmem:[#allocation6 + $0xf0] sm:$0xff] %v3751_v22 }
 0x42b PF: > { %s7849_s18 = sld [smem:[#allocation11_spill]]  ;;  %s4586_s6 = smov [#allocation6]  }
 0x42c   : > { %s3419_s11 = sshll.u32 %s4586_s6, 4  ;;  %s3420_s11 = int_to_ptr.vmem [resolvable:$true] %s3419_s11 }
 0x42d   : > { %s4542_s25 = scalar_lea.vmem %s3420_s11, 4096  ;;  %p4549_p2 = scmp.lt.s32.totalorder %s3420_s11, %s3420_s11 }
 0x42e   : > { %p4543_p13 = scmp.ne.s32.totalorder %s3420_s11, %s4542_s25  ;;  %p4550_p3 = scmp.lt.s32.totalorder %s4542_s25, %s4542_s25 }
 0x430   : > { %p4551_p4 = por %p4550_p3, %p4549_p2 }
 0x431   : > { %p4317_p12 = scmp.eq.s32.totalorder %s7849_s18, 2 }
 0x433   : > { %p4544_p0 = pnand %p4543_p13, %p4317_p12 }
 0x435   : > { %p4545_p1 = pneg %p4544_p0 }
 0x437   : > { %p4552_p5 = pnand %p4551_p4, %p4545_p1 }
 0x439   : > { %4555 = shalt.err (!%p4552_p5)
}
 0x43a   : > { %s7850_s9 = sld [smem:[#allocation70_spill]] }
 0x440   : > { %s4556_s2 = scalar_lea.hbm %s7850_s9, 4096 }
 0x441   : > { %p4557_p6 = scmp.ne.s32.totalorder %s7850_s9, %s4556_s2  ;;  %p4562_p9 = scmp.lt.u32.totalorder %s4556_s2, %s7850_s9 }
 0x443   : > { %p4558_p7 = pnand %p4557_p6, %p4317_p12 }
 0x445   : > { %p4559_p8 = pneg %p4558_p7 }
 0x447   : > { %p4564_p10 = pnand %p4562_p9, %p4559_p8 }
 0x449   : > { %4567 = shalt.err (!%p4564_p10)
}
 0x44a   : > { %s4587_s12 = smov 128   ;;  %s4588_s17 = smov 8  }
 0x44b   : > { %4314 = dma.vmem_to_hbm [thread:$0]  (%p4317_p12), %s3420_s11, 4096, %s7850_s9, [#allocation7], %s4587_s12, %s4587_s12, %s4588_s17  }
 0x44c   : > { %4575 = dma.done.wait (%p4317_p12), [#allocation7], 4096  }
 0x44d   : > { %4577 = vsyncadd (%p4317_p12), [#allocation7], 4294963200 }
 0x44e PF: > { %s7851_s27 = sld [smem:[#allocation10_spill]] }
 0x454   : > { %s26_s15 = sadd.s32 1, %s7851_s27  }
 0x455   : > { %p23_p11 = scmp.ge.s32.totalorder %s26_s15, 5  }
 0x457   :  { %25 = sbr.rel (!%p23_p11) target bundleno = 19 (0x13), region = 221 }
 0x45e   :  { %3435 = vsyncpa [#allocation7], 1 }
 0x45f   :  { %3437 = vsyncpa [#allocation7 + $0x1], 1 }

</bundles_post_ra>
